<compile_context>
chip_gen: v7x
topology: tpu7x:2x2x1
jax: 0.10.0
libtpu: 0.0.40
codegen_flags: <defaults>
</compile_context>

<pallas_src>
import functools

import jax
import jax.numpy as jnp
from jax.experimental import pallas as pl
from jax.experimental.pallas import tpu as pltpu


# ----------------------------------------------------------------------------
# Fused model kernel: one grid step == one block of Bt sequences.
# ----------------------------------------------------------------------------
def _layernorm(h, g, b, eps):
    mu = jnp.mean(h, axis=-1, keepdims=True)
    var = jnp.mean((h - mu) * (h - mu), axis=-1, keepdims=True)
    return (h - mu) * jax.lax.rsqrt(var + eps) * g + b


def _model_kernel(x_ref,
                  w_qkv_ref, b_qkv_ref, w_out_ref, b_out_ref,
                  ln1_g_ref, ln1_b_ref,
                  w_ff1_ref, b_ff1_ref, w_ff2_ref, b_ff2_ref,
                  ln2_g_ref, ln2_b_ref,
                  w_d1t_ref, b_d1_ref, w_d2_ref, b_d2_ref,
                  o_ref, *, num_heads, num_candidates, eps):
    Bt, S, D = x_ref.shape
    H = num_heads
    C = num_candidates
    Dh = D // H
    scale = 1.0 / float(Dh) ** 0.5
    bf16 = jnp.bfloat16

    # --- flatten the batch block: every projection matmul runs with M = Bt*S
    x = x_ref[...].reshape(Bt * S, D)                       # f32 residual path
    qkv = (jnp.dot(x.astype(bf16), w_qkv_ref[...],
                   preferred_element_type=jnp.float32) + b_qkv_ref[...])

    # --- per-(sequence, head) self attention; heads merged along lanes -------
    # TODO(synk): for production head counts use lax.fori_loop(unroll=True)
    # to bound vreg live ranges.
    attn_rows = []
    for b in range(Bt):
        r0 = b * S
        head_outs = []
        for h in range(H):
            lo = h * Dh
            qh = qkv[r0:r0 + S, lo:lo + Dh].astype(bf16)
            kh = qkv[r0:r0 + S, D + lo:D + lo + Dh].astype(bf16)
            vh = qkv[r0:r0 + S, 2 * D + lo:2 * D + lo + Dh].astype(bf16)
            s = jnp.dot(qh, kh.T, preferred_element_type=jnp.float32) * scale
            s = s - jnp.max(s, axis=-1, keepdims=True)
            p = jnp.exp(s)
            p = p / jnp.sum(p, axis=-1, keepdims=True)      # exact softmax, f32
            head_outs.append(jnp.dot(p.astype(bf16), vh,
                                     preferred_element_type=jnp.float32))
        attn_rows.append(jnp.concatenate(head_outs, axis=-1))    # (S, D)
    attn = jnp.concatenate(attn_rows, axis=0)                    # (Bt*S, D)
    attn = (jnp.dot(attn.astype(bf16), w_out_ref[...],
                    preferred_element_type=jnp.float32) + b_out_ref[...])

    # --- post-LN residual 1, ReLU FFN, post-LN residual 2 (f32 elementwise) --
    h1 = _layernorm(x + attn, ln1_g_ref[...], ln1_b_ref[...], eps)
    ff = (jnp.dot(h1.astype(bf16), w_ff1_ref[...],
                  preferred_element_type=jnp.float32) + b_ff1_ref[...])
    ff = jnp.maximum(ff, 0.0)
    ff = (jnp.dot(ff.astype(bf16), w_ff2_ref[...],
                  preferred_element_type=jnp.float32) + b_ff2_ref[...])
    h2 = _layernorm(h1 + ff, ln2_g_ref[...], ln2_b_ref[...], eps)  # (Bt*S, D)

    # --- fused decoder head on the last C rows of each sequence --------------
    # Transposed formulation keeps the final scores lane-dense (1, Bt*C).
    cand = jnp.concatenate(
        [h2[b * S + (S - C):b * S + S, :] for b in range(Bt)], axis=0)  # (Bt*C, D)
    cand_t = cand.T.astype(bf16)                                        # (D, Bt*C)
    hd = (jnp.dot(w_d1t_ref[...], cand_t,
                  preferred_element_type=jnp.float32) + b_d1_ref[...])  # (DH, Bt*C)
    hd = jnp.maximum(hd, 0.0)
    scores = (jnp.sum(hd * w_d2_ref[...], axis=0, keepdims=True)
              + b_d2_ref[...])                                          # (1, Bt*C)
    o_ref[...] = scores


def _pick_block_b(B, S):
    # Target >= 256 matmul rows per grid step on v6e/v7x (>=128 ok on v5e),
    # while Bt divides B.
    bt = int(max(1, min(B, pl.cdiv(256, S))))
    while B % bt:
        bt -= 1
    return bt


def model_forward(x, enc, dec, *, num_heads, num_candidates,
                  freeze_encoder=False, block_b=None,
                  single_buffer_weights=True):
    # forward identical whether the encoder is frozen or not (no_grad is a
    # gradient-only concept); see TODO at top about custom VJP for training.
    del freeze_encoder
    B, S, D = x.shape
    FF = enc["w_ff1"].shape[1]
    DH = dec["w_d1"].shape[1]
    C = num_candidates
    Bt = _pick_block_b(B, S) if block_b is None else block_b
    assert B % Bt == 0

    f32 = jnp.float32
    bf = lambda a: a.astype(jnp.bfloat16)            # bf16 MXU operands
    row = lambda a: a.reshape(1, -1).astype(f32)
    col = lambda a: a.reshape(-1, 1).astype(f32)

    def wspec(shape):
        # Resident weights: constant index_map, single-buffered (double
        # buffering a never-changing block is pure VMEM waste).
        if single_buffer_weights:
            return pl.BlockSpec(shape, lambda b: (0, 0),
                                pipeline_mode=pl.Buffered(1))
        return pl.BlockSpec(shape, lambda b: (0, 0))

    kernel = functools.partial(_model_kernel, num_heads=num_heads,
                               num_candidates=C, eps=1e-5)

    scores = pl.pallas_call(
        kernel,
        out_shape=jax.ShapeDtypeStruct((B // Bt, Bt * C), f32),
        grid=(B // Bt,),
        in_specs=[
            pl.BlockSpec((Bt, S, D), lambda b: (b, 0, 0)),   # activations
            wspec((D, 3 * D)), wspec((1, 3 * D)),            # qkv proj
            wspec((D, D)), wspec((1, D)),                    # out proj
            wspec((1, D)), wspec((1, D)),                    # ln1
            wspec((D, FF)), wspec((1, FF)),                  # ff1
            wspec((FF, D)), wspec((1, D)),                   # ff2
            wspec((1, D)), wspec((1, D)),                    # ln2
            wspec((DH, D)), wspec((DH, 1)),                  # decoder d1 (pre-T)
            wspec((DH, 1)), wspec((1, 1)),                   # decoder d2
        ],
        out_specs=pl.BlockSpec((1, Bt * C), lambda b: (b, 0)),  # lane-dense
        compiler_params=pltpu.CompilerParams(
            dimension_semantics=("parallel",)),
    )(x.astype(f32),
      bf(enc["w_qkv"]), row(enc["b_qkv"]),
      bf(enc["w_out"]), row(enc["b_out"]),
      row(enc["ln1_g"]), row(enc["ln1_b"]),
      bf(enc["w_ff1"]), row(enc["b_ff1"]),
      bf(enc["w_ff2"]), row(enc["b_ff2"]),
      row(enc["ln2_g"]), row(enc["ln2_b"]),
      bf(dec["w_d1"].T), col(dec["b_d1"]),
      col(dec["w_d2"]), dec["b_d2"].reshape(1, 1).astype(f32))

    return scores.reshape(B, C)


# ----------------------------------------------------------------------------
# Deterministic parameter init + pure-JAX reference for verification
# ----------------------------------------------------------------------------
def init_params(key, D, FF, DEC_H):
    ks = jax.random.split(key, 16)
    n = lambda k, shp, s=0.02: (s * jax.random.normal(k, shp)).astype(jnp.float32)
    enc = {
        "w_qkv": n(ks[0], (D, 3 * D)), "b_qkv": jnp.zeros((3 * D,), jnp.float32),
        "w_out": n(ks[1], (D, D)),     "b_out": jnp.zeros((D,), jnp.float32),
        "ln1_g": jnp.ones((D,), jnp.float32), "ln1_b": jnp.zeros((D,), jnp.float32),
        "w_ff1": n(ks[2], (D, FF)),    "b_ff1": jnp.zeros((FF,), jnp.float32),
        "w_ff2": n(ks[3], (FF, D)),    "b_ff2": jnp.zeros((D,), jnp.float32),
        "ln2_g": jnp.ones((D,), jnp.float32), "ln2_b": jnp.zeros((D,), jnp.float32),
    }
    dec = {
        "w_d1": n(ks[4], (D, DEC_H)),  "b_d1": jnp.zeros((DEC_H,), jnp.float32),
        "w_d2": n(ks[5], (DEC_H, 1)),  "b_d2": jnp.zeros((1,), jnp.float32),
    }
    return enc, dec


def reference_forward(x, enc, dec, *, num_heads, num_candidates, eps=1e-5):
    B, S, D = x.shape
    Dh = D // num_heads
    x2 = x.reshape(B * S, D)
    qkv = x2 @ enc["w_qkv"] + enc["b_qkv"]
    q, k, v = jnp.split(qkv, 3, axis=-1)
    heads = lambda t: t.reshape(B, S, num_heads, Dh).transpose(0, 2, 1, 3)
    q, k, v = heads(q), heads(k), heads(v)
    s = jnp.einsum('bhqd,bhkd->bhqk', q, k) / (Dh ** 0.5)
    p = jax.nn.softmax(s, axis=-1)
    o = jnp.einsum('bhqk,bhkd->bhqd', p, v).transpose(0, 2, 1, 3).reshape(B * S, D)
    attn = o @ enc["w_out"] + enc["b_out"]

    def ln(h, g, b):
        mu = h.mean(-1, keepdims=True)
        var = ((h - mu) ** 2).mean(-1, keepdims=True)
        return (h - mu) / jnp.sqrt(var + eps) * g + b

    h1 = ln(x2 + attn, enc["ln1_g"], enc["ln1_b"])
    ff = jnp.maximum(h1 @ enc["w_ff1"] + enc["b_ff1"], 0.0)
    ff = ff @ enc["w_ff2"] + enc["b_ff2"]
    h2 = ln(h1 + ff, enc["ln2_g"], enc["ln2_b"]).reshape(B, S, D)
    cand = h2[:, S - num_candidates:, :].reshape(B * num_candidates, D)
    hd = jnp.maximum(cand @ dec["w_d1"] + dec["b_d1"], 0.0)
    sc = hd @ dec["w_d2"] + dec["b_d2"]
    return sc.reshape(B, num_candidates)


# ----------------------------------------------------------------------------
if __name__ == "__main__":
    B, S, D = 2, 8, 32       # batch, sequence, hidden
    H, FF = 4, 64            # attention heads, FFN width
    C, DEC_H = 4, 32         # candidate tokens scored by decoder, decoder hidden

    key = jax.random.PRNGKey(0)
    k_x, k_p = jax.random.split(key)
    x = jax.random.normal(k_x, (B, S, D), dtype=jnp.float32)
    enc_params, dec_params = init_params(k_p, D, FF, DEC_H)

    def run(single_buffer_weights):
        fwd = jax.jit(functools.partial(
            model_forward, num_heads=H, num_candidates=C,
            freeze_encoder=False, single_buffer_weights=single_buffer_weights))
        return jax.block_until_ready(fwd(x, enc_params, dec_params))

    try:
        out = run(True)
    except Exception:
        # Fallback for JAX builds that reject pipeline_mode=pl.Buffered(1).
        out = run(False)

    assert out.shape == (B, C), out.shape
    assert out.dtype == jnp.float32
    assert bool(jnp.all(jnp.isfinite(out)))

    ref = reference_forward(x, enc_params, dec_params,
                            num_heads=H, num_candidates=C)
    max_err = float(jnp.max(jnp.abs(out - ref)))
    # bf16 MXU operands (with f32 accumulation) give small deviations vs the
    # pure-f32 reference; softmax normalization itself is exact.
    assert max_err < 2e-2, f"max abs error vs reference: {max_err}"

    print("KERNEL_OK")
</pallas_src>

<mosaic_0001>
module attributes {stable_mosaic.version = 11 : i64} {
  func.func @_model_kernel(%arg0: i32, %arg1: memref<2x8x32xf32, #tpu.memory_space<vmem>>, %arg2: memref<32x96xbf16, #tpu.memory_space<vmem>>, %arg3: memref<1x96xf32, #tpu.memory_space<vmem>>, %arg4: memref<32x32xbf16, #tpu.memory_space<vmem>>, %arg5: memref<1x32xf32, #tpu.memory_space<vmem>>, %arg6: memref<1x32xf32, #tpu.memory_space<vmem>>, %arg7: memref<1x32xf32, #tpu.memory_space<vmem>>, %arg8: memref<32x64xbf16, #tpu.memory_space<vmem>>, %arg9: memref<1x64xf32, #tpu.memory_space<vmem>>, %arg10: memref<64x32xbf16, #tpu.memory_space<vmem>>, %arg11: memref<1x32xf32, #tpu.memory_space<vmem>>, %arg12: memref<1x32xf32, #tpu.memory_space<vmem>>, %arg13: memref<1x32xf32, #tpu.memory_space<vmem>>, %arg14: memref<32x32xbf16, #tpu.memory_space<vmem>>, %arg15: memref<32x1xf32, #tpu.memory_space<vmem>>, %arg16: memref<32x1xf32, #tpu.memory_space<vmem>>, %arg17: memref<1x1xf32, #tpu.memory_space<vmem>>, %arg18: memref<1x8xf32, #tpu.memory_space<vmem>>) attributes {dimension_semantics = [#tpu.dimension_semantics<parallel>], iteration_bounds = array<i64: 1>, scalar_prefetch = 0 : i64, scratch_operands = 0 : i64, tpu.core_type = #tpu.core_type<tc>, window_params = [{transform_indices = @transform_0, window_bounds = array<i64: 2, 8, 32>}, {pipeline_mode = #tpu.pipeline_mode<synchronous>, transform_indices = @transform_1, window_bounds = array<i64: 32, 96>}, {pipeline_mode = #tpu.pipeline_mode<synchronous>, transform_indices = @transform_2, window_bounds = array<i64: 1, 96>}, {pipeline_mode = #tpu.pipeline_mode<synchronous>, transform_indices = @transform_3, window_bounds = array<i64: 32, 32>}, {pipeline_mode = #tpu.pipeline_mode<synchronous>, transform_indices = @transform_4, window_bounds = array<i64: 1, 32>}, {pipeline_mode = #tpu.pipeline_mode<synchronous>, transform_indices = @transform_5, window_bounds = array<i64: 1, 32>}, {pipeline_mode = #tpu.pipeline_mode<synchronous>, transform_indices = @transform_6, window_bounds = array<i64: 1, 32>}, {pipeline_mode = #tpu.pipeline_mode<synchronous>, transform_indices = @transform_7, window_bounds = array<i64: 32, 64>}, {pipeline_mode = #tpu.pipeline_mode<synchronous>, transform_indices = @transform_8, window_bounds = array<i64: 1, 64>}, {pipeline_mode = #tpu.pipeline_mode<synchronous>, transform_indices = @transform_9, window_bounds = array<i64: 64, 32>}, {pipeline_mode = #tpu.pipeline_mode<synchronous>, transform_indices = @transform_10, window_bounds = array<i64: 1, 32>}, {pipeline_mode = #tpu.pipeline_mode<synchronous>, transform_indices = @transform_11, window_bounds = array<i64: 1, 32>}, {pipeline_mode = #tpu.pipeline_mode<synchronous>, transform_indices = @transform_12, window_bounds = array<i64: 1, 32>}, {pipeline_mode = #tpu.pipeline_mode<synchronous>, transform_indices = @transform_13, window_bounds = array<i64: 32, 32>}, {pipeline_mode = #tpu.pipeline_mode<synchronous>, transform_indices = @transform_14, window_bounds = array<i64: 32, 1>}, {pipeline_mode = #tpu.pipeline_mode<synchronous>, transform_indices = @transform_15, window_bounds = array<i64: 32, 1>}, {pipeline_mode = #tpu.pipeline_mode<synchronous>, transform_indices = @transform_16, window_bounds = array<i64: 1, 1>}, {transform_indices = @transform_17, window_bounds = array<i64: 1, 8>}]} {
    %c0 = arith.constant 0 : index
    %c0_0 = arith.constant 0 : index
    %c0_1 = arith.constant 0 : index
    %0 = vector.load %arg1[%c0, %c0_0, %c0_1] : memref<2x8x32xf32, #tpu.memory_space<vmem>>, vector<2x8x32xf32>
    %1 = vector.shape_cast %0 : vector<2x8x32xf32> to vector<16x32xf32>
    %2 = arith.truncf %1 : vector<16x32xf32> to vector<16x32xbf16>
    %c0_2 = arith.constant 0 : index
    %c0_3 = arith.constant 0 : index
    %3 = vector.load %arg2[%c0_2, %c0_3] : memref<32x96xbf16, #tpu.memory_space<vmem>>, vector<32x96xbf16>
    %cst = arith.constant dense<0.000000e+00> : vector<16x96xf32>
    %4 = tpu.matmul %2, %3, %cst {dimension_numbers = #tpu.dot_dimension_numbers<[1], [0], [0], [1], [0, 0, 1, 1], [], []>} : vector<16x32xbf16>, vector<32x96xbf16>, vector<16x96xf32> -> vector<16x96xf32>
    %c0_4 = arith.constant 0 : index
    %c0_5 = arith.constant 0 : index
    %5 = vector.load %arg3[%c0_4, %c0_5] : memref<1x96xf32, #tpu.memory_space<vmem>>, vector<1x96xf32>
    %6 = vector.broadcast %5 : vector<1x96xf32> to vector<16x96xf32>
    %7 = arith.addf %4, %6 : vector<16x96xf32>
    %8 = vector.extract_strided_slice %7 {offsets = [0, 0], sizes = [8, 8], strides = [1, 1]} : vector<16x96xf32> to vector<8x8xf32>
    %9 = arith.truncf %8 : vector<8x8xf32> to vector<8x8xbf16>
    %10 = vector.extract_strided_slice %7 {offsets = [0, 32], sizes = [8, 8], strides = [1, 1]} : vector<16x96xf32> to vector<8x8xf32>
    %11 = arith.truncf %10 : vector<8x8xf32> to vector<8x8xbf16>
    %12 = vector.extract_strided_slice %7 {offsets = [0, 64], sizes = [8, 8], strides = [1, 1]} : vector<16x96xf32> to vector<8x8xf32>
    %13 = arith.truncf %12 : vector<8x8xf32> to vector<8x8xbf16>
    %14 = tpu.transpose %11, [1, 0] : vector<8x8xbf16> -> vector<8x8xbf16>
    %cst_6 = arith.constant dense<0.000000e+00> : vector<8x8xf32>
    %15 = tpu.matmul %9, %14, %cst_6 {dimension_numbers = #tpu.dot_dimension_numbers<[1], [0], [0], [1], [0, 0, 1, 1], [], []>} : vector<8x8xbf16>, vector<8x8xbf16>, vector<8x8xf32> -> vector<8x8xf32>
    %cst_7 = arith.constant 0.353553385 : f32
    %16 = vector.broadcast %cst_7 : f32 to vector<8x8xf32>
    %17 = arith.mulf %15, %16 : vector<8x8xf32>
    %cst_8 = arith.constant dense<0xFF800000> : vector<8xf32>
    %18 = vector.multi_reduction <maximumf>, %17, %cst_8 [1] : vector<8x8xf32> to vector<8xf32>
    %19 = vector.shape_cast %18 : vector<8xf32> to vector<8x1xf32>
    %20 = vector.broadcast %19 : vector<8x1xf32> to vector<8x8xf32>
    %21 = arith.subf %17, %20 : vector<8x8xf32>
    %22 = math.exp %21 : vector<8x8xf32>
    %cst_9 = arith.constant dense<0.000000e+00> : vector<8xf32>
    %23 = vector.multi_reduction <add>, %22, %cst_9 [1] : vector<8x8xf32> to vector<8xf32>
    %24 = vector.shape_cast %23 : vector<8xf32> to vector<8x1xf32>
    %25 = vector.broadcast %24 : vector<8x1xf32> to vector<8x8xf32>
    %26 = arith.divf %22, %25 : vector<8x8xf32>
    %27 = arith.truncf %26 : vector<8x8xf32> to vector<8x8xbf16>
    %cst_10 = arith.constant dense<0.000000e+00> : vector<8x8xf32>
    %28 = tpu.matmul %27, %13, %cst_10 {dimension_numbers = #tpu.dot_dimension_numbers<[1], [0], [0], [1], [0, 0, 1, 1], [], []>} : vector<8x8xbf16>, vector<8x8xbf16>, vector<8x8xf32> -> vector<8x8xf32>
    %29 = vector.extract_strided_slice %7 {offsets = [0, 8], sizes = [8, 8], strides = [1, 1]} : vector<16x96xf32> to vector<8x8xf32>
    %30 = arith.truncf %29 : vector<8x8xf32> to vector<8x8xbf16>
    %31 = vector.extract_strided_slice %7 {offsets = [0, 40], sizes = [8, 8], strides = [1, 1]} : vector<16x96xf32> to vector<8x8xf32>
    %32 = arith.truncf %31 : vector<8x8xf32> to vector<8x8xbf16>
    %33 = vector.extract_strided_slice %7 {offsets = [0, 72], sizes = [8, 8], strides = [1, 1]} : vector<16x96xf32> to vector<8x8xf32>
    %34 = arith.truncf %33 : vector<8x8xf32> to vector<8x8xbf16>
    %35 = tpu.transpose %32, [1, 0] : vector<8x8xbf16> -> vector<8x8xbf16>
    %cst_11 = arith.constant dense<0.000000e+00> : vector<8x8xf32>
    %36 = tpu.matmul %30, %35, %cst_11 {dimension_numbers = #tpu.dot_dimension_numbers<[1], [0], [0], [1], [0, 0, 1, 1], [], []>} : vector<8x8xbf16>, vector<8x8xbf16>, vector<8x8xf32> -> vector<8x8xf32>
    %cst_12 = arith.constant 0.353553385 : f32
    %37 = vector.broadcast %cst_12 : f32 to vector<8x8xf32>
    %38 = arith.mulf %36, %37 : vector<8x8xf32>
    %cst_13 = arith.constant dense<0xFF800000> : vector<8xf32>
    %39 = vector.multi_reduction <maximumf>, %38, %cst_13 [1] : vector<8x8xf32> to vector<8xf32>
    %40 = vector.shape_cast %39 : vector<8xf32> to vector<8x1xf32>
    %41 = vector.broadcast %40 : vector<8x1xf32> to vector<8x8xf32>
    %42 = arith.subf %38, %41 : vector<8x8xf32>
    %43 = math.exp %42 : vector<8x8xf32>
    %cst_14 = arith.constant dense<0.000000e+00> : vector<8xf32>
    %44 = vector.multi_reduction <add>, %43, %cst_14 [1] : vector<8x8xf32> to vector<8xf32>
    %45 = vector.shape_cast %44 : vector<8xf32> to vector<8x1xf32>
    %46 = vector.broadcast %45 : vector<8x1xf32> to vector<8x8xf32>
    %47 = arith.divf %43, %46 : vector<8x8xf32>
    %48 = arith.truncf %47 : vector<8x8xf32> to vector<8x8xbf16>
    %cst_15 = arith.constant dense<0.000000e+00> : vector<8x8xf32>
    %49 = tpu.matmul %48, %34, %cst_15 {dimension_numbers = #tpu.dot_dimension_numbers<[1], [0], [0], [1], [0, 0, 1, 1], [], []>} : vector<8x8xbf16>, vector<8x8xbf16>, vector<8x8xf32> -> vector<8x8xf32>
    %50 = vector.extract_strided_slice %7 {offsets = [0, 16], sizes = [8, 8], strides = [1, 1]} : vector<16x96xf32> to vector<8x8xf32>
    %51 = arith.truncf %50 : vector<8x8xf32> to vector<8x8xbf16>
    %52 = vector.extract_strided_slice %7 {offsets = [0, 48], sizes = [8, 8], strides = [1, 1]} : vector<16x96xf32> to vector<8x8xf32>
    %53 = arith.truncf %52 : vector<8x8xf32> to vector<8x8xbf16>
    %54 = vector.extract_strided_slice %7 {offsets = [0, 80], sizes = [8, 8], strides = [1, 1]} : vector<16x96xf32> to vector<8x8xf32>
    %55 = arith.truncf %54 : vector<8x8xf32> to vector<8x8xbf16>
    %56 = tpu.transpose %53, [1, 0] : vector<8x8xbf16> -> vector<8x8xbf16>
    %cst_16 = arith.constant dense<0.000000e+00> : vector<8x8xf32>
    %57 = tpu.matmul %51, %56, %cst_16 {dimension_numbers = #tpu.dot_dimension_numbers<[1], [0], [0], [1], [0, 0, 1, 1], [], []>} : vector<8x8xbf16>, vector<8x8xbf16>, vector<8x8xf32> -> vector<8x8xf32>
    %cst_17 = arith.constant 0.353553385 : f32
    %58 = vector.broadcast %cst_17 : f32 to vector<8x8xf32>
    %59 = arith.mulf %57, %58 : vector<8x8xf32>
    %cst_18 = arith.constant dense<0xFF800000> : vector<8xf32>
    %60 = vector.multi_reduction <maximumf>, %59, %cst_18 [1] : vector<8x8xf32> to vector<8xf32>
    %61 = vector.shape_cast %60 : vector<8xf32> to vector<8x1xf32>
    %62 = vector.broadcast %61 : vector<8x1xf32> to vector<8x8xf32>
    %63 = arith.subf %59, %62 : vector<8x8xf32>
    %64 = math.exp %63 : vector<8x8xf32>
    %cst_19 = arith.constant dense<0.000000e+00> : vector<8xf32>
    %65 = vector.multi_reduction <add>, %64, %cst_19 [1] : vector<8x8xf32> to vector<8xf32>
    %66 = vector.shape_cast %65 : vector<8xf32> to vector<8x1xf32>
    %67 = vector.broadcast %66 : vector<8x1xf32> to vector<8x8xf32>
    %68 = arith.divf %64, %67 : vector<8x8xf32>
    %69 = arith.truncf %68 : vector<8x8xf32> to vector<8x8xbf16>
    %cst_20 = arith.constant dense<0.000000e+00> : vector<8x8xf32>
    %70 = tpu.matmul %69, %55, %cst_20 {dimension_numbers = #tpu.dot_dimension_numbers<[1], [0], [0], [1], [0, 0, 1, 1], [], []>} : vector<8x8xbf16>, vector<8x8xbf16>, vector<8x8xf32> -> vector<8x8xf32>
    %71 = vector.extract_strided_slice %7 {offsets = [0, 24], sizes = [8, 8], strides = [1, 1]} : vector<16x96xf32> to vector<8x8xf32>
    %72 = arith.truncf %71 : vector<8x8xf32> to vector<8x8xbf16>
    %73 = vector.extract_strided_slice %7 {offsets = [0, 56], sizes = [8, 8], strides = [1, 1]} : vector<16x96xf32> to vector<8x8xf32>
    %74 = arith.truncf %73 : vector<8x8xf32> to vector<8x8xbf16>
    %75 = vector.extract_strided_slice %7 {offsets = [0, 88], sizes = [8, 8], strides = [1, 1]} : vector<16x96xf32> to vector<8x8xf32>
    %76 = arith.truncf %75 : vector<8x8xf32> to vector<8x8xbf16>
    %77 = tpu.transpose %74, [1, 0] : vector<8x8xbf16> -> vector<8x8xbf16>
    %cst_21 = arith.constant dense<0.000000e+00> : vector<8x8xf32>
    %78 = tpu.matmul %72, %77, %cst_21 {dimension_numbers = #tpu.dot_dimension_numbers<[1], [0], [0], [1], [0, 0, 1, 1], [], []>} : vector<8x8xbf16>, vector<8x8xbf16>, vector<8x8xf32> -> vector<8x8xf32>
    %cst_22 = arith.constant 0.353553385 : f32
    %79 = vector.broadcast %cst_22 : f32 to vector<8x8xf32>
    %80 = arith.mulf %78, %79 : vector<8x8xf32>
    %cst_23 = arith.constant dense<0xFF800000> : vector<8xf32>
    %81 = vector.multi_reduction <maximumf>, %80, %cst_23 [1] : vector<8x8xf32> to vector<8xf32>
    %82 = vector.shape_cast %81 : vector<8xf32> to vector<8x1xf32>
    %83 = vector.broadcast %82 : vector<8x1xf32> to vector<8x8xf32>
    %84 = arith.subf %80, %83 : vector<8x8xf32>
    %85 = math.exp %84 : vector<8x8xf32>
    %cst_24 = arith.constant dense<0.000000e+00> : vector<8xf32>
    %86 = vector.multi_reduction <add>, %85, %cst_24 [1] : vector<8x8xf32> to vector<8xf32>
    %87 = vector.shape_cast %86 : vector<8xf32> to vector<8x1xf32>
    %88 = vector.broadcast %87 : vector<8x1xf32> to vector<8x8xf32>
    %89 = arith.divf %85, %88 : vector<8x8xf32>
    %90 = arith.truncf %89 : vector<8x8xf32> to vector<8x8xbf16>
    %cst_25 = arith.constant dense<0.000000e+00> : vector<8x8xf32>
    %91 = tpu.matmul %90, %76, %cst_25 {dimension_numbers = #tpu.dot_dimension_numbers<[1], [0], [0], [1], [0, 0, 1, 1], [], []>} : vector<8x8xbf16>, vector<8x8xbf16>, vector<8x8xf32> -> vector<8x8xf32>
    %92 = tpu.concatenate %28, %49, %70, %91 in 1 : vector<8x8xf32>, vector<8x8xf32>, vector<8x8xf32>, vector<8x8xf32> -> vector<8x32xf32>
    %93 = vector.extract_strided_slice %7 {offsets = [8, 0], sizes = [8, 8], strides = [1, 1]} : vector<16x96xf32> to vector<8x8xf32>
    %94 = arith.truncf %93 : vector<8x8xf32> to vector<8x8xbf16>
    %95 = vector.extract_strided_slice %7 {offsets = [8, 32], sizes = [8, 8], strides = [1, 1]} : vector<16x96xf32> to vector<8x8xf32>
    %96 = arith.truncf %95 : vector<8x8xf32> to vector<8x8xbf16>
    %97 = vector.extract_strided_slice %7 {offsets = [8, 64], sizes = [8, 8], strides = [1, 1]} : vector<16x96xf32> to vector<8x8xf32>
    %98 = arith.truncf %97 : vector<8x8xf32> to vector<8x8xbf16>
    %99 = tpu.transpose %96, [1, 0] : vector<8x8xbf16> -> vector<8x8xbf16>
    %cst_26 = arith.constant dense<0.000000e+00> : vector<8x8xf32>
    %100 = tpu.matmul %94, %99, %cst_26 {dimension_numbers = #tpu.dot_dimension_numbers<[1], [0], [0], [1], [0, 0, 1, 1], [], []>} : vector<8x8xbf16>, vector<8x8xbf16>, vector<8x8xf32> -> vector<8x8xf32>
    %cst_27 = arith.constant 0.353553385 : f32
    %101 = vector.broadcast %cst_27 : f32 to vector<8x8xf32>
    %102 = arith.mulf %100, %101 : vector<8x8xf32>
    %cst_28 = arith.constant dense<0xFF800000> : vector<8xf32>
    %103 = vector.multi_reduction <maximumf>, %102, %cst_28 [1] : vector<8x8xf32> to vector<8xf32>
    %104 = vector.shape_cast %103 : vector<8xf32> to vector<8x1xf32>
    %105 = vector.broadcast %104 : vector<8x1xf32> to vector<8x8xf32>
    %106 = arith.subf %102, %105 : vector<8x8xf32>
    %107 = math.exp %106 : vector<8x8xf32>
    %cst_29 = arith.constant dense<0.000000e+00> : vector<8xf32>
    %108 = vector.multi_reduction <add>, %107, %cst_29 [1] : vector<8x8xf32> to vector<8xf32>
    %109 = vector.shape_cast %108 : vector<8xf32> to vector<8x1xf32>
    %110 = vector.broadcast %109 : vector<8x1xf32> to vector<8x8xf32>
    %111 = arith.divf %107, %110 : vector<8x8xf32>
    %112 = arith.truncf %111 : vector<8x8xf32> to vector<8x8xbf16>
    %cst_30 = arith.constant dense<0.000000e+00> : vector<8x8xf32>
    %113 = tpu.matmul %112, %98, %cst_30 {dimension_numbers = #tpu.dot_dimension_numbers<[1], [0], [0], [1], [0, 0, 1, 1], [], []>} : vector<8x8xbf16>, vector<8x8xbf16>, vector<8x8xf32> -> vector<8x8xf32>
    %114 = vector.extract_strided_slice %7 {offsets = [8, 8], sizes = [8, 8], strides = [1, 1]} : vector<16x96xf32> to vector<8x8xf32>
    %115 = arith.truncf %114 : vector<8x8xf32> to vector<8x8xbf16>
    %116 = vector.extract_strided_slice %7 {offsets = [8, 40], sizes = [8, 8], strides = [1, 1]} : vector<16x96xf32> to vector<8x8xf32>
    %117 = arith.truncf %116 : vector<8x8xf32> to vector<8x8xbf16>
    %118 = vector.extract_strided_slice %7 {offsets = [8, 72], sizes = [8, 8], strides = [1, 1]} : vector<16x96xf32> to vector<8x8xf32>
    %119 = arith.truncf %118 : vector<8x8xf32> to vector<8x8xbf16>
    %120 = tpu.transpose %117, [1, 0] : vector<8x8xbf16> -> vector<8x8xbf16>
    %cst_31 = arith.constant dense<0.000000e+00> : vector<8x8xf32>
    %121 = tpu.matmul %115, %120, %cst_31 {dimension_numbers = #tpu.dot_dimension_numbers<[1], [0], [0], [1], [0, 0, 1, 1], [], []>} : vector<8x8xbf16>, vector<8x8xbf16>, vector<8x8xf32> -> vector<8x8xf32>
    %cst_32 = arith.constant 0.353553385 : f32
    %122 = vector.broadcast %cst_32 : f32 to vector<8x8xf32>
    %123 = arith.mulf %121, %122 : vector<8x8xf32>
    %cst_33 = arith.constant dense<0xFF800000> : vector<8xf32>
    %124 = vector.multi_reduction <maximumf>, %123, %cst_33 [1] : vector<8x8xf32> to vector<8xf32>
    %125 = vector.shape_cast %124 : vector<8xf32> to vector<8x1xf32>
    %126 = vector.broadcast %125 : vector<8x1xf32> to vector<8x8xf32>
    %127 = arith.subf %123, %126 : vector<8x8xf32>
    %128 = math.exp %127 : vector<8x8xf32>
    %cst_34 = arith.constant dense<0.000000e+00> : vector<8xf32>
    %129 = vector.multi_reduction <add>, %128, %cst_34 [1] : vector<8x8xf32> to vector<8xf32>
    %130 = vector.shape_cast %129 : vector<8xf32> to vector<8x1xf32>
    %131 = vector.broadcast %130 : vector<8x1xf32> to vector<8x8xf32>
    %132 = arith.divf %128, %131 : vector<8x8xf32>
    %133 = arith.truncf %132 : vector<8x8xf32> to vector<8x8xbf16>
    %cst_35 = arith.constant dense<0.000000e+00> : vector<8x8xf32>
    %134 = tpu.matmul %133, %119, %cst_35 {dimension_numbers = #tpu.dot_dimension_numbers<[1], [0], [0], [1], [0, 0, 1, 1], [], []>} : vector<8x8xbf16>, vector<8x8xbf16>, vector<8x8xf32> -> vector<8x8xf32>
    %135 = vector.extract_strided_slice %7 {offsets = [8, 16], sizes = [8, 8], strides = [1, 1]} : vector<16x96xf32> to vector<8x8xf32>
    %136 = arith.truncf %135 : vector<8x8xf32> to vector<8x8xbf16>
    %137 = vector.extract_strided_slice %7 {offsets = [8, 48], sizes = [8, 8], strides = [1, 1]} : vector<16x96xf32> to vector<8x8xf32>
    %138 = arith.truncf %137 : vector<8x8xf32> to vector<8x8xbf16>
    %139 = vector.extract_strided_slice %7 {offsets = [8, 80], sizes = [8, 8], strides = [1, 1]} : vector<16x96xf32> to vector<8x8xf32>
    %140 = arith.truncf %139 : vector<8x8xf32> to vector<8x8xbf16>
    %141 = tpu.transpose %138, [1, 0] : vector<8x8xbf16> -> vector<8x8xbf16>
    %cst_36 = arith.constant dense<0.000000e+00> : vector<8x8xf32>
    %142 = tpu.matmul %136, %141, %cst_36 {dimension_numbers = #tpu.dot_dimension_numbers<[1], [0], [0], [1], [0, 0, 1, 1], [], []>} : vector<8x8xbf16>, vector<8x8xbf16>, vector<8x8xf32> -> vector<8x8xf32>
    %cst_37 = arith.constant 0.353553385 : f32
    %143 = vector.broadcast %cst_37 : f32 to vector<8x8xf32>
    %144 = arith.mulf %142, %143 : vector<8x8xf32>
    %cst_38 = arith.constant dense<0xFF800000> : vector<8xf32>
    %145 = vector.multi_reduction <maximumf>, %144, %cst_38 [1] : vector<8x8xf32> to vector<8xf32>
    %146 = vector.shape_cast %145 : vector<8xf32> to vector<8x1xf32>
    %147 = vector.broadcast %146 : vector<8x1xf32> to vector<8x8xf32>
    %148 = arith.subf %144, %147 : vector<8x8xf32>
    %149 = math.exp %148 : vector<8x8xf32>
    %cst_39 = arith.constant dense<0.000000e+00> : vector<8xf32>
    %150 = vector.multi_reduction <add>, %149, %cst_39 [1] : vector<8x8xf32> to vector<8xf32>
    %151 = vector.shape_cast %150 : vector<8xf32> to vector<8x1xf32>
    %152 = vector.broadcast %151 : vector<8x1xf32> to vector<8x8xf32>
    %153 = arith.divf %149, %152 : vector<8x8xf32>
    %154 = arith.truncf %153 : vector<8x8xf32> to vector<8x8xbf16>
    %cst_40 = arith.constant dense<0.000000e+00> : vector<8x8xf32>
    %155 = tpu.matmul %154, %140, %cst_40 {dimension_numbers = #tpu.dot_dimension_numbers<[1], [0], [0], [1], [0, 0, 1, 1], [], []>} : vector<8x8xbf16>, vector<8x8xbf16>, vector<8x8xf32> -> vector<8x8xf32>
    %156 = vector.extract_strided_slice %7 {offsets = [8, 24], sizes = [8, 8], strides = [1, 1]} : vector<16x96xf32> to vector<8x8xf32>
    %157 = arith.truncf %156 : vector<8x8xf32> to vector<8x8xbf16>
    %158 = vector.extract_strided_slice %7 {offsets = [8, 56], sizes = [8, 8], strides = [1, 1]} : vector<16x96xf32> to vector<8x8xf32>
    %159 = arith.truncf %158 : vector<8x8xf32> to vector<8x8xbf16>
    %160 = vector.extract_strided_slice %7 {offsets = [8, 88], sizes = [8, 8], strides = [1, 1]} : vector<16x96xf32> to vector<8x8xf32>
    %161 = arith.truncf %160 : vector<8x8xf32> to vector<8x8xbf16>
    %162 = tpu.transpose %159, [1, 0] : vector<8x8xbf16> -> vector<8x8xbf16>
    %cst_41 = arith.constant dense<0.000000e+00> : vector<8x8xf32>
    %163 = tpu.matmul %157, %162, %cst_41 {dimension_numbers = #tpu.dot_dimension_numbers<[1], [0], [0], [1], [0, 0, 1, 1], [], []>} : vector<8x8xbf16>, vector<8x8xbf16>, vector<8x8xf32> -> vector<8x8xf32>
    %cst_42 = arith.constant 0.353553385 : f32
    %164 = vector.broadcast %cst_42 : f32 to vector<8x8xf32>
    %165 = arith.mulf %163, %164 : vector<8x8xf32>
    %cst_43 = arith.constant dense<0xFF800000> : vector<8xf32>
    %166 = vector.multi_reduction <maximumf>, %165, %cst_43 [1] : vector<8x8xf32> to vector<8xf32>
    %167 = vector.shape_cast %166 : vector<8xf32> to vector<8x1xf32>
    %168 = vector.broadcast %167 : vector<8x1xf32> to vector<8x8xf32>
    %169 = arith.subf %165, %168 : vector<8x8xf32>
    %170 = math.exp %169 : vector<8x8xf32>
    %cst_44 = arith.constant dense<0.000000e+00> : vector<8xf32>
    %171 = vector.multi_reduction <add>, %170, %cst_44 [1] : vector<8x8xf32> to vector<8xf32>
    %172 = vector.shape_cast %171 : vector<8xf32> to vector<8x1xf32>
    %173 = vector.broadcast %172 : vector<8x1xf32> to vector<8x8xf32>
    %174 = arith.divf %170, %173 : vector<8x8xf32>
    %175 = arith.truncf %174 : vector<8x8xf32> to vector<8x8xbf16>
    %cst_45 = arith.constant dense<0.000000e+00> : vector<8x8xf32>
    %176 = tpu.matmul %175, %161, %cst_45 {dimension_numbers = #tpu.dot_dimension_numbers<[1], [0], [0], [1], [0, 0, 1, 1], [], []>} : vector<8x8xbf16>, vector<8x8xbf16>, vector<8x8xf32> -> vector<8x8xf32>
    %177 = tpu.concatenate %113, %134, %155, %176 in 1 : vector<8x8xf32>, vector<8x8xf32>, vector<8x8xf32>, vector<8x8xf32> -> vector<8x32xf32>
    %178 = tpu.concatenate %92, %177 in 0 : vector<8x32xf32>, vector<8x32xf32> -> vector<16x32xf32>
    %179 = arith.truncf %178 : vector<16x32xf32> to vector<16x32xbf16>
    %c0_46 = arith.constant 0 : index
    %c0_47 = arith.constant 0 : index
    %180 = vector.load %arg4[%c0_46, %c0_47] : memref<32x32xbf16, #tpu.memory_space<vmem>>, vector<32x32xbf16>
    %cst_48 = arith.constant dense<0.000000e+00> : vector<16x32xf32>
    %181 = tpu.matmul %179, %180, %cst_48 {dimension_numbers = #tpu.dot_dimension_numbers<[1], [0], [0], [1], [0, 0, 1, 1], [], []>} : vector<16x32xbf16>, vector<32x32xbf16>, vector<16x32xf32> -> vector<16x32xf32>
    %c0_49 = arith.constant 0 : index
    %c0_50 = arith.constant 0 : index
    %182 = vector.load %arg5[%c0_49, %c0_50] : memref<1x32xf32, #tpu.memory_space<vmem>>, vector<1x32xf32>
    %183 = vector.broadcast %182 : vector<1x32xf32> to vector<16x32xf32>
    %184 = arith.addf %181, %183 : vector<16x32xf32>
    %185 = arith.addf %1, %184 : vector<16x32xf32>
    %c0_51 = arith.constant 0 : index
    %c0_52 = arith.constant 0 : index
    %186 = vector.load %arg6[%c0_51, %c0_52] : memref<1x32xf32, #tpu.memory_space<vmem>>, vector<1x32xf32>
    %c0_53 = arith.constant 0 : index
    %c0_54 = arith.constant 0 : index
    %187 = vector.load %arg7[%c0_53, %c0_54] : memref<1x32xf32, #tpu.memory_space<vmem>>, vector<1x32xf32>
    %cst_55 = arith.constant dense<0.000000e+00> : vector<16xf32>
    %188 = vector.multi_reduction <add>, %185, %cst_55 [1] : vector<16x32xf32> to vector<16xf32>
    %189 = vector.shape_cast %188 : vector<16xf32> to vector<16x1xf32>
    %cst_56 = arith.constant 3.200000e+01 : f32
    %190 = vector.broadcast %cst_56 : f32 to vector<16x1xf32>
    %191 = arith.divf %189, %190 : vector<16x1xf32>
    %192 = vector.broadcast %191 : vector<16x1xf32> to vector<16x32xf32>
    %193 = arith.subf %185, %192 : vector<16x32xf32>
    %194 = vector.broadcast %191 : vector<16x1xf32> to vector<16x32xf32>
    %195 = arith.subf %185, %194 : vector<16x32xf32>
    %196 = arith.mulf %193, %195 : vector<16x32xf32>
    %cst_57 = arith.constant dense<0.000000e+00> : vector<16xf32>
    %197 = vector.multi_reduction <add>, %196, %cst_57 [1] : vector<16x32xf32> to vector<16xf32>
    %198 = vector.shape_cast %197 : vector<16xf32> to vector<16x1xf32>
    %cst_58 = arith.constant 3.200000e+01 : f32
    %199 = vector.broadcast %cst_58 : f32 to vector<16x1xf32>
    %200 = arith.divf %198, %199 : vector<16x1xf32>
    %201 = vector.broadcast %191 : vector<16x1xf32> to vector<16x32xf32>
    %202 = arith.subf %185, %201 : vector<16x32xf32>
    %cst_59 = arith.constant 9.99999974E-6 : f32
    %203 = vector.broadcast %cst_59 : f32 to vector<16x1xf32>
    %204 = arith.addf %200, %203 : vector<16x1xf32>
    %205 = math.rsqrt %204 : vector<16x1xf32>
    %206 = vector.broadcast %205 : vector<16x1xf32> to vector<16x32xf32>
    %207 = arith.mulf %202, %206 : vector<16x32xf32>
    %208 = vector.broadcast %186 : vector<1x32xf32> to vector<16x32xf32>
    %209 = arith.mulf %207, %208 : vector<16x32xf32>
    %210 = vector.broadcast %187 : vector<1x32xf32> to vector<16x32xf32>
    %211 = arith.addf %209, %210 : vector<16x32xf32>
    %212 = arith.truncf %211 : vector<16x32xf32> to vector<16x32xbf16>
    %c0_60 = arith.constant 0 : index
    %c0_61 = arith.constant 0 : index
    %213 = vector.load %arg8[%c0_60, %c0_61] : memref<32x64xbf16, #tpu.memory_space<vmem>>, vector<32x64xbf16>
    %cst_62 = arith.constant dense<0.000000e+00> : vector<16x64xf32>
    %214 = tpu.matmul %212, %213, %cst_62 {dimension_numbers = #tpu.dot_dimension_numbers<[1], [0], [0], [1], [0, 0, 1, 1], [], []>} : vector<16x32xbf16>, vector<32x64xbf16>, vector<16x64xf32> -> vector<16x64xf32>
    %c0_63 = arith.constant 0 : index
    %c0_64 = arith.constant 0 : index
    %215 = vector.load %arg9[%c0_63, %c0_64] : memref<1x64xf32, #tpu.memory_space<vmem>>, vector<1x64xf32>
    %216 = vector.broadcast %215 : vector<1x64xf32> to vector<16x64xf32>
    %217 = arith.addf %214, %216 : vector<16x64xf32>
    %cst_65 = arith.constant 0.000000e+00 : f32
    %218 = vector.broadcast %cst_65 : f32 to vector<16x64xf32>
    %219 = arith.maximumf %217, %218 : vector<16x64xf32>
    %220 = arith.truncf %219 : vector<16x64xf32> to vector<16x64xbf16>
    %c0_66 = arith.constant 0 : index
    %c0_67 = arith.constant 0 : index
    %221 = vector.load %arg10[%c0_66, %c0_67] : memref<64x32xbf16, #tpu.memory_space<vmem>>, vector<64x32xbf16>
    %cst_68 = arith.constant dense<0.000000e+00> : vector<16x32xf32>
    %222 = tpu.matmul %220, %221, %cst_68 {dimension_numbers = #tpu.dot_dimension_numbers<[1], [0], [0], [1], [0, 0, 1, 1], [], []>} : vector<16x64xbf16>, vector<64x32xbf16>, vector<16x32xf32> -> vector<16x32xf32>
    %c0_69 = arith.constant 0 : index
    %c0_70 = arith.constant 0 : index
    %223 = vector.load %arg11[%c0_69, %c0_70] : memref<1x32xf32, #tpu.memory_space<vmem>>, vector<1x32xf32>
    %224 = vector.broadcast %223 : vector<1x32xf32> to vector<16x32xf32>
    %225 = arith.addf %222, %224 : vector<16x32xf32>
    %226 = arith.addf %211, %225 : vector<16x32xf32>
    %c0_71 = arith.constant 0 : index
    %c0_72 = arith.constant 0 : index
    %227 = vector.load %arg12[%c0_71, %c0_72] : memref<1x32xf32, #tpu.memory_space<vmem>>, vector<1x32xf32>
    %c0_73 = arith.constant 0 : index
    %c0_74 = arith.constant 0 : index
    %228 = vector.load %arg13[%c0_73, %c0_74] : memref<1x32xf32, #tpu.memory_space<vmem>>, vector<1x32xf32>
    %cst_75 = arith.constant dense<0.000000e+00> : vector<16xf32>
    %229 = vector.multi_reduction <add>, %226, %cst_75 [1] : vector<16x32xf32> to vector<16xf32>
    %230 = vector.shape_cast %229 : vector<16xf32> to vector<16x1xf32>
    %cst_76 = arith.constant 3.200000e+01 : f32
    %231 = vector.broadcast %cst_76 : f32 to vector<16x1xf32>
    %232 = arith.divf %230, %231 : vector<16x1xf32>
    %233 = vector.broadcast %232 : vector<16x1xf32> to vector<16x32xf32>
    %234 = arith.subf %226, %233 : vector<16x32xf32>
    %235 = vector.broadcast %232 : vector<16x1xf32> to vector<16x32xf32>
    %236 = arith.subf %226, %235 : vector<16x32xf32>
    %237 = arith.mulf %234, %236 : vector<16x32xf32>
    %cst_77 = arith.constant dense<0.000000e+00> : vector<16xf32>
    %238 = vector.multi_reduction <add>, %237, %cst_77 [1] : vector<16x32xf32> to vector<16xf32>
    %239 = vector.shape_cast %238 : vector<16xf32> to vector<16x1xf32>
    %cst_78 = arith.constant 3.200000e+01 : f32
    %240 = vector.broadcast %cst_78 : f32 to vector<16x1xf32>
    %241 = arith.divf %239, %240 : vector<16x1xf32>
    %242 = vector.broadcast %232 : vector<16x1xf32> to vector<16x32xf32>
    %243 = arith.subf %226, %242 : vector<16x32xf32>
    %cst_79 = arith.constant 9.99999974E-6 : f32
    %244 = vector.broadcast %cst_79 : f32 to vector<16x1xf32>
    %245 = arith.addf %241, %244 : vector<16x1xf32>
    %246 = math.rsqrt %245 : vector<16x1xf32>
    %247 = vector.broadcast %246 : vector<16x1xf32> to vector<16x32xf32>
    %248 = arith.mulf %243, %247 : vector<16x32xf32>
    %249 = vector.broadcast %227 : vector<1x32xf32> to vector<16x32xf32>
    %250 = arith.mulf %248, %249 : vector<16x32xf32>
    %251 = vector.broadcast %228 : vector<1x32xf32> to vector<16x32xf32>
    %252 = arith.addf %250, %251 : vector<16x32xf32>
    %253 = vector.extract_strided_slice %252 {offsets = [4, 0], sizes = [4, 32], strides = [1, 1]} : vector<16x32xf32> to vector<4x32xf32>
    %254 = vector.extract_strided_slice %252 {offsets = [12, 0], sizes = [4, 32], strides = [1, 1]} : vector<16x32xf32> to vector<4x32xf32>
    %255 = tpu.concatenate %253, %254 in 0 : vector<4x32xf32>, vector<4x32xf32> -> vector<8x32xf32>
    %256 = tpu.transpose %255, [1, 0] : vector<8x32xf32> -> vector<32x8xf32>
    %257 = arith.truncf %256 : vector<32x8xf32> to vector<32x8xbf16>
    %c0_80 = arith.constant 0 : index
    %c0_81 = arith.constant 0 : index
    %258 = vector.load %arg14[%c0_80, %c0_81] : memref<32x32xbf16, #tpu.memory_space<vmem>>, vector<32x32xbf16>
    %cst_82 = arith.constant dense<0.000000e+00> : vector<32x8xf32>
    %259 = tpu.matmul %258, %257, %cst_82 {dimension_numbers = #tpu.dot_dimension_numbers<[1], [0], [0], [1], [0, 0, 1, 1], [], []>} : vector<32x32xbf16>, vector<32x8xbf16>, vector<32x8xf32> -> vector<32x8xf32>
    %c0_83 = arith.constant 0 : index
    %c0_84 = arith.constant 0 : index
    %260 = vector.load %arg15[%c0_83, %c0_84] : memref<32x1xf32, #tpu.memory_space<vmem>>, vector<32x1xf32>
    %261 = vector.broadcast %260 : vector<32x1xf32> to vector<32x8xf32>
    %262 = arith.addf %259, %261 : vector<32x8xf32>
    %cst_85 = arith.constant 0.000000e+00 : f32
    %263 = vector.broadcast %cst_85 : f32 to vector<32x8xf32>
    %264 = arith.maximumf %262, %263 : vector<32x8xf32>
    %c0_86 = arith.constant 0 : index
    %c0_87 = arith.constant 0 : index
    %265 = vector.load %arg16[%c0_86, %c0_87] : memref<32x1xf32, #tpu.memory_space<vmem>>, vector<32x1xf32>
    %266 = vector.broadcast %265 : vector<32x1xf32> to vector<32x8xf32>
    %267 = arith.mulf %264, %266 : vector<32x8xf32>
    %cst_88 = arith.constant dense<0.000000e+00> : vector<8xf32>
    %268 = vector.multi_reduction <add>, %267, %cst_88 [0] : vector<32x8xf32> to vector<8xf32>
    %269 = vector.shape_cast %268 : vector<8xf32> to vector<1x8xf32>
    %c0_89 = arith.constant 0 : index
    %c0_90 = arith.constant 0 : index
    %270 = vector.load %arg17[%c0_89, %c0_90] : memref<1x1xf32, #tpu.memory_space<vmem>>, vector<1x1xf32>
    %271 = vector.broadcast %270 : vector<1x1xf32> to vector<1x8xf32>
    %272 = arith.addf %269, %271 : vector<1x8xf32>
    %c0_91 = arith.constant 0 : index
    %c0_92 = arith.constant 0 : index
    %273 = vector.load %arg18[%c0_91, %c0_92] : memref<1x8xf32, #tpu.memory_space<vmem>>, vector<1x8xf32>
    tpu.vector_store %arg18[%c0_91, %c0_92], %272 {strides = array<i32>} : memref<1x8xf32, #tpu.memory_space<vmem>>, vector<1x8xf32>,
    return
  }
  func.func @transform_0(%arg0: i32) -> (i32, i32, i32) {
    %c0_i32 = arith.constant 0 : i32
    %c0_i32_0 = arith.constant 0 : i32
    %c0_i32_1 = arith.constant 0 : i32
    return %arg0, %c0_i32, %c0_i32_0 : i32, i32, i32
  }
  func.func @transform_1(%arg0: i32) -> (i32, i32) {
    %c0_i32 = arith.constant 0 : i32
    %c0_i32_0 = arith.constant 0 : i32
    %c0_i32_1 = arith.constant 0 : i32
    return %c0_i32, %c0_i32_0 : i32, i32
  }
  func.func @transform_2(%arg0: i32) -> (i32, i32) {
    %c0_i32 = arith.constant 0 : i32
    %c0_i32_0 = arith.constant 0 : i32
    %c0_i32_1 = arith.constant 0 : i32
    return %c0_i32, %c0_i32_0 : i32, i32
  }
  func.func @transform_3(%arg0: i32) -> (i32, i32) {
    %c0_i32 = arith.constant 0 : i32
    %c0_i32_0 = arith.constant 0 : i32
    %c0_i32_1 = arith.constant 0 : i32
    return %c0_i32, %c0_i32_0 : i32, i32
  }
  func.func @transform_4(%arg0: i32) -> (i32, i32) {
    %c0_i32 = arith.constant 0 : i32
    %c0_i32_0 = arith.constant 0 : i32
    %c0_i32_1 = arith.constant 0 : i32
    return %c0_i32, %c0_i32_0 : i32, i32
  }
  func.func @transform_5(%arg0: i32) -> (i32, i32) {
    %c0_i32 = arith.constant 0 : i32
    %c0_i32_0 = arith.constant 0 : i32
    %c0_i32_1 = arith.constant 0 : i32
    return %c0_i32, %c0_i32_0 : i32, i32
  }
  func.func @transform_6(%arg0: i32) -> (i32, i32) {
    %c0_i32 = arith.constant 0 : i32
    %c0_i32_0 = arith.constant 0 : i32
    %c0_i32_1 = arith.constant 0 : i32
    return %c0_i32, %c0_i32_0 : i32, i32
  }
  func.func @transform_7(%arg0: i32) -> (i32, i32) {
    %c0_i32 = arith.constant 0 : i32
    %c0_i32_0 = arith.constant 0 : i32
    %c0_i32_1 = arith.constant 0 : i32
    return %c0_i32, %c0_i32_0 : i32, i32
  }
  func.func @transform_8(%arg0: i32) -> (i32, i32) {
    %c0_i32 = arith.constant 0 : i32
    %c0_i32_0 = arith.constant 0 : i32
    %c0_i32_1 = arith.constant 0 : i32
    return %c0_i32, %c0_i32_0 : i32, i32
  }
  func.func @transform_9(%arg0: i32) -> (i32, i32) {
    %c0_i32 = arith.constant 0 : i32
    %c0_i32_0 = arith.constant 0 : i32
    %c0_i32_1 = arith.constant 0 : i32
    return %c0_i32, %c0_i32_0 : i32, i32
  }
  func.func @transform_10(%arg0: i32) -> (i32, i32) {
    %c0_i32 = arith.constant 0 : i32
    %c0_i32_0 = arith.constant 0 : i32
    %c0_i32_1 = arith.constant 0 : i32
    return %c0_i32, %c0_i32_0 : i32, i32
  }
  func.func @transform_11(%arg0: i32) -> (i32, i32) {
    %c0_i32 = arith.constant 0 : i32
    %c0_i32_0 = arith.constant 0 : i32
    %c0_i32_1 = arith.constant 0 : i32
    return %c0_i32, %c0_i32_0 : i32, i32
  }
  func.func @transform_12(%arg0: i32) -> (i32, i32) {
    %c0_i32 = arith.constant 0 : i32
    %c0_i32_0 = arith.constant 0 : i32
    %c0_i32_1 = arith.constant 0 : i32
    return %c0_i32, %c0_i32_0 : i32, i32
  }
  func.func @transform_13(%arg0: i32) -> (i32, i32) {
    %c0_i32 = arith.constant 0 : i32
    %c0_i32_0 = arith.constant 0 : i32
    %c0_i32_1 = arith.constant 0 : i32
    return %c0_i32, %c0_i32_0 : i32, i32
  }
  func.func @transform_14(%arg0: i32) -> (i32, i32) {
    %c0_i32 = arith.constant 0 : i32
    %c0_i32_0 = arith.constant 0 : i32
    %c0_i32_1 = arith.constant 0 : i32
    return %c0_i32, %c0_i32_0 : i32, i32
  }
  func.func @transform_15(%arg0: i32) -> (i32, i32) {
    %c0_i32 = arith.constant 0 : i32
    %c0_i32_0 = arith.constant 0 : i32
    %c0_i32_1 = arith.constant 0 : i32
    return %c0_i32, %c0_i32_0 : i32, i32
  }
  func.func @transform_16(%arg0: i32) -> (i32, i32) {
    %c0_i32 = arith.constant 0 : i32
    %c0_i32_0 = arith.constant 0 : i32
    %c0_i32_1 = arith.constant 0 : i32
    return %c0_i32, %c0_i32_0 : i32, i32
  }
  func.func @transform_17(%arg0: i32) -> (i32, i32) {
    %c0_i32 = arith.constant 0 : i32
    %c0_i32_0 = arith.constant 0 : i32
    return %arg0, %c0_i32 : i32, i32
  }
}

module attributes {stable_mosaic.version = 11 : i64} {
  func.func @_model_kernel(%arg0: i32, %arg1: memref<2x8x32xf32, #tpu.memory_space<vmem>>, %arg2: memref<32x96xbf16, #tpu.memory_space<vmem>>, %arg3: memref<1x96xf32, #tpu.memory_space<vmem>>, %arg4: memref<32x32xbf16, #tpu.memory_space<vmem>>, %arg5: memref<1x32xf32, #tpu.memory_space<vmem>>, %arg6: memref<1x32xf32, #tpu.memory_space<vmem>>, %arg7: memref<1x32xf32, #tpu.memory_space<vmem>>, %arg8: memref<32x64xbf16, #tpu.memory_space<vmem>>, %arg9: memref<1x64xf32, #tpu.memory_space<vmem>>, %arg10: memref<64x32xbf16, #tpu.memory_space<vmem>>, %arg11: memref<1x32xf32, #tpu.memory_space<vmem>>, %arg12: memref<1x32xf32, #tpu.memory_space<vmem>>, %arg13: memref<1x32xf32, #tpu.memory_space<vmem>>, %arg14: memref<32x32xbf16, #tpu.memory_space<vmem>>, %arg15: memref<32x1xf32, #tpu.memory_space<vmem>>, %arg16: memref<32x1xf32, #tpu.memory_space<vmem>>, %arg17: memref<1x1xf32, #tpu.memory_space<vmem>>, %arg18: memref<1x8xf32, #tpu.memory_space<vmem>>) attributes {dimension_semantics = [#tpu.dimension_semantics<parallel>], iteration_bounds = array<i64: 1>, scalar_prefetch = 0 : i64, scratch_operands = 0 : i64, tpu.core_type = #tpu.core_type<tc>, window_params = [{transform_indices = @transform_0, window_bounds = array<i64: 2, 8, 32>}, {pipeline_mode = #tpu.pipeline_mode<synchronous>, transform_indices = @transform_1, window_bounds = array<i64: 32, 96>}, {pipeline_mode = #tpu.pipeline_mode<synchronous>, transform_indices = @transform_2, window_bounds = array<i64: 1, 96>}, {pipeline_mode = #tpu.pipeline_mode<synchronous>, transform_indices = @transform_3, window_bounds = array<i64: 32, 32>}, {pipeline_mode = #tpu.pipeline_mode<synchronous>, transform_indices = @transform_4, window_bounds = array<i64: 1, 32>}, {pipeline_mode = #tpu.pipeline_mode<synchronous>, transform_indices = @transform_5, window_bounds = array<i64: 1, 32>}, {pipeline_mode = #tpu.pipeline_mode<synchronous>, transform_indices = @transform_6, window_bounds = array<i64: 1, 32>}, {pipeline_mode = #tpu.pipeline_mode<synchronous>, transform_indices = @transform_7, window_bounds = array<i64: 32, 64>}, {pipeline_mode = #tpu.pipeline_mode<synchronous>, transform_indices = @transform_8, window_bounds = array<i64: 1, 64>}, {pipeline_mode = #tpu.pipeline_mode<synchronous>, transform_indices = @transform_9, window_bounds = array<i64: 64, 32>}, {pipeline_mode = #tpu.pipeline_mode<synchronous>, transform_indices = @transform_10, window_bounds = array<i64: 1, 32>}, {pipeline_mode = #tpu.pipeline_mode<synchronous>, transform_indices = @transform_11, window_bounds = array<i64: 1, 32>}, {pipeline_mode = #tpu.pipeline_mode<synchronous>, transform_indices = @transform_12, window_bounds = array<i64: 1, 32>}, {pipeline_mode = #tpu.pipeline_mode<synchronous>, transform_indices = @transform_13, window_bounds = array<i64: 32, 32>}, {pipeline_mode = #tpu.pipeline_mode<synchronous>, transform_indices = @transform_14, window_bounds = array<i64: 32, 1>}, {pipeline_mode = #tpu.pipeline_mode<synchronous>, transform_indices = @transform_15, window_bounds = array<i64: 32, 1>}, {pipeline_mode = #tpu.pipeline_mode<synchronous>, transform_indices = @transform_16, window_bounds = array<i64: 1, 1>}, {transform_indices = @transform_17, window_bounds = array<i64: 1, 8>}]} {
    %c0 = arith.constant 0 : index
    %c0_0 = arith.constant 0 : index
    %c0_1 = arith.constant 0 : index
    %0 = vector.load %arg1[%c0, %c0_0, %c0_1] : memref<2x8x32xf32, #tpu.memory_space<vmem>>, vector<2x8x32xf32>
    %1 = vector.shape_cast %0 : vector<2x8x32xf32> to vector<16x32xf32>
    %2 = arith.truncf %1 : vector<16x32xf32> to vector<16x32xbf16>
    %c0_2 = arith.constant 0 : index
    %c0_3 = arith.constant 0 : index
    %3 = vector.load %arg2[%c0_2, %c0_3] : memref<32x96xbf16, #tpu.memory_space<vmem>>, vector<32x96xbf16>
    %cst = arith.constant dense<0.000000e+00> : vector<16x96xf32>
    %4 = tpu.matmul %2, %3, %cst {dimension_numbers = #tpu.dot_dimension_numbers<[1], [0], [0], [1], [0, 0, 1, 1], [], []>} : vector<16x32xbf16>, vector<32x96xbf16>, vector<16x96xf32> -> vector<16x96xf32>
    %c0_4 = arith.constant 0 : index
    %c0_5 = arith.constant 0 : index
    %5 = vector.load %arg3[%c0_4, %c0_5] : memref<1x96xf32, #tpu.memory_space<vmem>>, vector<1x96xf32>
    %6 = vector.broadcast %5 : vector<1x96xf32> to vector<16x96xf32>
    %7 = arith.addf %4, %6 : vector<16x96xf32>
    %8 = vector.extract_strided_slice %7 {offsets = [0, 0], sizes = [8, 8], strides = [1, 1]} : vector<16x96xf32> to vector<8x8xf32>
    %9 = arith.truncf %8 : vector<8x8xf32> to vector<8x8xbf16>
    %10 = vector.extract_strided_slice %7 {offsets = [0, 32], sizes = [8, 8], strides = [1, 1]} : vector<16x96xf32> to vector<8x8xf32>
    %11 = arith.truncf %10 : vector<8x8xf32> to vector<8x8xbf16>
    %12 = vector.extract_strided_slice %7 {offsets = [0, 64], sizes = [8, 8], strides = [1, 1]} : vector<16x96xf32> to vector<8x8xf32>
    %13 = arith.truncf %12 : vector<8x8xf32> to vector<8x8xbf16>
    %14 = tpu.transpose %11, [1, 0] : vector<8x8xbf16> -> vector<8x8xbf16>
    %cst_6 = arith.constant dense<0.000000e+00> : vector<8x8xf32>
    %15 = tpu.matmul %9, %14, %cst_6 {dimension_numbers = #tpu.dot_dimension_numbers<[1], [0], [0], [1], [0, 0, 1, 1], [], []>} : vector<8x8xbf16>, vector<8x8xbf16>, vector<8x8xf32> -> vector<8x8xf32>
    %cst_7 = arith.constant 0.353553385 : f32
    %16 = vector.broadcast %cst_7 : f32 to vector<8x8xf32>
    %17 = arith.mulf %15, %16 : vector<8x8xf32>
    %cst_8 = arith.constant dense<0xFF800000> : vector<8xf32>
    %18 = vector.multi_reduction <maximumf>, %17, %cst_8 [1] : vector<8x8xf32> to vector<8xf32>
    %19 = vector.shape_cast %18 : vector<8xf32> to vector<8x1xf32>
    %20 = vector.broadcast %19 : vector<8x1xf32> to vector<8x8xf32>
    %21 = arith.subf %17, %20 : vector<8x8xf32>
    %22 = math.exp %21 : vector<8x8xf32>
    %cst_9 = arith.constant dense<0.000000e+00> : vector<8xf32>
    %23 = vector.multi_reduction <add>, %22, %cst_9 [1] : vector<8x8xf32> to vector<8xf32>
    %24 = vector.shape_cast %23 : vector<8xf32> to vector<8x1xf32>
    %25 = vector.broadcast %24 : vector<8x1xf32> to vector<8x8xf32>
    %26 = arith.divf %22, %25 : vector<8x8xf32>
    %27 = arith.truncf %26 : vector<8x8xf32> to vector<8x8xbf16>
    %cst_10 = arith.constant dense<0.000000e+00> : vector<8x8xf32>
    %28 = tpu.matmul %27, %13, %cst_10 {dimension_numbers = #tpu.dot_dimension_numbers<[1], [0], [0], [1], [0, 0, 1, 1], [], []>} : vector<8x8xbf16>, vector<8x8xbf16>, vector<8x8xf32> -> vector<8x8xf32>
    %29 = vector.extract_strided_slice %7 {offsets = [0, 8], sizes = [8, 8], strides = [1, 1]} : vector<16x96xf32> to vector<8x8xf32>
    %30 = arith.truncf %29 : vector<8x8xf32> to vector<8x8xbf16>
    %31 = vector.extract_strided_slice %7 {offsets = [0, 40], sizes = [8, 8], strides = [1, 1]} : vector<16x96xf32> to vector<8x8xf32>
    %32 = arith.truncf %31 : vector<8x8xf32> to vector<8x8xbf16>
    %33 = vector.extract_strided_slice %7 {offsets = [0, 72], sizes = [8, 8], strides = [1, 1]} : vector<16x96xf32> to vector<8x8xf32>
    %34 = arith.truncf %33 : vector<8x8xf32> to vector<8x8xbf16>
    %35 = tpu.transpose %32, [1, 0] : vector<8x8xbf16> -> vector<8x8xbf16>
    %cst_11 = arith.constant dense<0.000000e+00> : vector<8x8xf32>
    %36 = tpu.matmul %30, %35, %cst_11 {dimension_numbers = #tpu.dot_dimension_numbers<[1], [0], [0], [1], [0, 0, 1, 1], [], []>} : vector<8x8xbf16>, vector<8x8xbf16>, vector<8x8xf32> -> vector<8x8xf32>
    %cst_12 = arith.constant 0.353553385 : f32
    %37 = vector.broadcast %cst_12 : f32 to vector<8x8xf32>
    %38 = arith.mulf %36, %37 : vector<8x8xf32>
    %cst_13 = arith.constant dense<0xFF800000> : vector<8xf32>
    %39 = vector.multi_reduction <maximumf>, %38, %cst_13 [1] : vector<8x8xf32> to vector<8xf32>
    %40 = vector.shape_cast %39 : vector<8xf32> to vector<8x1xf32>
    %41 = vector.broadcast %40 : vector<8x1xf32> to vector<8x8xf32>
    %42 = arith.subf %38, %41 : vector<8x8xf32>
    %43 = math.exp %42 : vector<8x8xf32>
    %cst_14 = arith.constant dense<0.000000e+00> : vector<8xf32>
    %44 = vector.multi_reduction <add>, %43, %cst_14 [1] : vector<8x8xf32> to vector<8xf32>
    %45 = vector.shape_cast %44 : vector<8xf32> to vector<8x1xf32>
    %46 = vector.broadcast %45 : vector<8x1xf32> to vector<8x8xf32>
    %47 = arith.divf %43, %46 : vector<8x8xf32>
    %48 = arith.truncf %47 : vector<8x8xf32> to vector<8x8xbf16>
    %cst_15 = arith.constant dense<0.000000e+00> : vector<8x8xf32>
    %49 = tpu.matmul %48, %34, %cst_15 {dimension_numbers = #tpu.dot_dimension_numbers<[1], [0], [0], [1], [0, 0, 1, 1], [], []>} : vector<8x8xbf16>, vector<8x8xbf16>, vector<8x8xf32> -> vector<8x8xf32>
    %50 = vector.extract_strided_slice %7 {offsets = [0, 16], sizes = [8, 8], strides = [1, 1]} : vector<16x96xf32> to vector<8x8xf32>
    %51 = arith.truncf %50 : vector<8x8xf32> to vector<8x8xbf16>
    %52 = vector.extract_strided_slice %7 {offsets = [0, 48], sizes = [8, 8], strides = [1, 1]} : vector<16x96xf32> to vector<8x8xf32>
    %53 = arith.truncf %52 : vector<8x8xf32> to vector<8x8xbf16>
    %54 = vector.extract_strided_slice %7 {offsets = [0, 80], sizes = [8, 8], strides = [1, 1]} : vector<16x96xf32> to vector<8x8xf32>
    %55 = arith.truncf %54 : vector<8x8xf32> to vector<8x8xbf16>
    %56 = tpu.transpose %53, [1, 0] : vector<8x8xbf16> -> vector<8x8xbf16>
    %cst_16 = arith.constant dense<0.000000e+00> : vector<8x8xf32>
    %57 = tpu.matmul %51, %56, %cst_16 {dimension_numbers = #tpu.dot_dimension_numbers<[1], [0], [0], [1], [0, 0, 1, 1], [], []>} : vector<8x8xbf16>, vector<8x8xbf16>, vector<8x8xf32> -> vector<8x8xf32>
    %cst_17 = arith.constant 0.353553385 : f32
    %58 = vector.broadcast %cst_17 : f32 to vector<8x8xf32>
    %59 = arith.mulf %57, %58 : vector<8x8xf32>
    %cst_18 = arith.constant dense<0xFF800000> : vector<8xf32>
    %60 = vector.multi_reduction <maximumf>, %59, %cst_18 [1] : vector<8x8xf32> to vector<8xf32>
    %61 = vector.shape_cast %60 : vector<8xf32> to vector<8x1xf32>
    %62 = vector.broadcast %61 : vector<8x1xf32> to vector<8x8xf32>
    %63 = arith.subf %59, %62 : vector<8x8xf32>
    %64 = math.exp %63 : vector<8x8xf32>
    %cst_19 = arith.constant dense<0.000000e+00> : vector<8xf32>
    %65 = vector.multi_reduction <add>, %64, %cst_19 [1] : vector<8x8xf32> to vector<8xf32>
    %66 = vector.shape_cast %65 : vector<8xf32> to vector<8x1xf32>
    %67 = vector.broadcast %66 : vector<8x1xf32> to vector<8x8xf32>
    %68 = arith.divf %64, %67 : vector<8x8xf32>
    %69 = arith.truncf %68 : vector<8x8xf32> to vector<8x8xbf16>
    %cst_20 = arith.constant dense<0.000000e+00> : vector<8x8xf32>
    %70 = tpu.matmul %69, %55, %cst_20 {dimension_numbers = #tpu.dot_dimension_numbers<[1], [0], [0], [1], [0, 0, 1, 1], [], []>} : vector<8x8xbf16>, vector<8x8xbf16>, vector<8x8xf32> -> vector<8x8xf32>
    %71 = vector.extract_strided_slice %7 {offsets = [0, 24], sizes = [8, 8], strides = [1, 1]} : vector<16x96xf32> to vector<8x8xf32>
    %72 = arith.truncf %71 : vector<8x8xf32> to vector<8x8xbf16>
    %73 = vector.extract_strided_slice %7 {offsets = [0, 56], sizes = [8, 8], strides = [1, 1]} : vector<16x96xf32> to vector<8x8xf32>
    %74 = arith.truncf %73 : vector<8x8xf32> to vector<8x8xbf16>
    %75 = vector.extract_strided_slice %7 {offsets = [0, 88], sizes = [8, 8], strides = [1, 1]} : vector<16x96xf32> to vector<8x8xf32>
    %76 = arith.truncf %75 : vector<8x8xf32> to vector<8x8xbf16>
    %77 = tpu.transpose %74, [1, 0] : vector<8x8xbf16> -> vector<8x8xbf16>
    %cst_21 = arith.constant dense<0.000000e+00> : vector<8x8xf32>
    %78 = tpu.matmul %72, %77, %cst_21 {dimension_numbers = #tpu.dot_dimension_numbers<[1], [0], [0], [1], [0, 0, 1, 1], [], []>} : vector<8x8xbf16>, vector<8x8xbf16>, vector<8x8xf32> -> vector<8x8xf32>
    %cst_22 = arith.constant 0.353553385 : f32
    %79 = vector.broadcast %cst_22 : f32 to vector<8x8xf32>
    %80 = arith.mulf %78, %79 : vector<8x8xf32>
    %cst_23 = arith.constant dense<0xFF800000> : vector<8xf32>
    %81 = vector.multi_reduction <maximumf>, %80, %cst_23 [1] : vector<8x8xf32> to vector<8xf32>
    %82 = vector.shape_cast %81 : vector<8xf32> to vector<8x1xf32>
    %83 = vector.broadcast %82 : vector<8x1xf32> to vector<8x8xf32>
    %84 = arith.subf %80, %83 : vector<8x8xf32>
    %85 = math.exp %84 : vector<8x8xf32>
    %cst_24 = arith.constant dense<0.000000e+00> : vector<8xf32>
    %86 = vector.multi_reduction <add>, %85, %cst_24 [1] : vector<8x8xf32> to vector<8xf32>
    %87 = vector.shape_cast %86 : vector<8xf32> to vector<8x1xf32>
    %88 = vector.broadcast %87 : vector<8x1xf32> to vector<8x8xf32>
    %89 = arith.divf %85, %88 : vector<8x8xf32>
    %90 = arith.truncf %89 : vector<8x8xf32> to vector<8x8xbf16>
    %cst_25 = arith.constant dense<0.000000e+00> : vector<8x8xf32>
    %91 = tpu.matmul %90, %76, %cst_25 {dimension_numbers = #tpu.dot_dimension_numbers<[1], [0], [0], [1], [0, 0, 1, 1], [], []>} : vector<8x8xbf16>, vector<8x8xbf16>, vector<8x8xf32> -> vector<8x8xf32>
    %92 = tpu.concatenate %28, %49, %70, %91 in 1 : vector<8x8xf32>, vector<8x8xf32>, vector<8x8xf32>, vector<8x8xf32> -> vector<8x32xf32>
    %93 = vector.extract_strided_slice %7 {offsets = [8, 0], sizes = [8, 8], strides = [1, 1]} : vector<16x96xf32> to vector<8x8xf32>
    %94 = arith.truncf %93 : vector<8x8xf32> to vector<8x8xbf16>
    %95 = vector.extract_strided_slice %7 {offsets = [8, 32], sizes = [8, 8], strides = [1, 1]} : vector<16x96xf32> to vector<8x8xf32>
    %96 = arith.truncf %95 : vector<8x8xf32> to vector<8x8xbf16>
    %97 = vector.extract_strided_slice %7 {offsets = [8, 64], sizes = [8, 8], strides = [1, 1]} : vector<16x96xf32> to vector<8x8xf32>
    %98 = arith.truncf %97 : vector<8x8xf32> to vector<8x8xbf16>
    %99 = tpu.transpose %96, [1, 0] : vector<8x8xbf16> -> vector<8x8xbf16>
    %cst_26 = arith.constant dense<0.000000e+00> : vector<8x8xf32>
    %100 = tpu.matmul %94, %99, %cst_26 {dimension_numbers = #tpu.dot_dimension_numbers<[1], [0], [0], [1], [0, 0, 1, 1], [], []>} : vector<8x8xbf16>, vector<8x8xbf16>, vector<8x8xf32> -> vector<8x8xf32>
    %cst_27 = arith.constant 0.353553385 : f32
    %101 = vector.broadcast %cst_27 : f32 to vector<8x8xf32>
    %102 = arith.mulf %100, %101 : vector<8x8xf32>
    %cst_28 = arith.constant dense<0xFF800000> : vector<8xf32>
    %103 = vector.multi_reduction <maximumf>, %102, %cst_28 [1] : vector<8x8xf32> to vector<8xf32>
    %104 = vector.shape_cast %103 : vector<8xf32> to vector<8x1xf32>
    %105 = vector.broadcast %104 : vector<8x1xf32> to vector<8x8xf32>
    %106 = arith.subf %102, %105 : vector<8x8xf32>
    %107 = math.exp %106 : vector<8x8xf32>
    %cst_29 = arith.constant dense<0.000000e+00> : vector<8xf32>
    %108 = vector.multi_reduction <add>, %107, %cst_29 [1] : vector<8x8xf32> to vector<8xf32>
    %109 = vector.shape_cast %108 : vector<8xf32> to vector<8x1xf32>
    %110 = vector.broadcast %109 : vector<8x1xf32> to vector<8x8xf32>
    %111 = arith.divf %107, %110 : vector<8x8xf32>
    %112 = arith.truncf %111 : vector<8x8xf32> to vector<8x8xbf16>
    %cst_30 = arith.constant dense<0.000000e+00> : vector<8x8xf32>
    %113 = tpu.matmul %112, %98, %cst_30 {dimension_numbers = #tpu.dot_dimension_numbers<[1], [0], [0], [1], [0, 0, 1, 1], [], []>} : vector<8x8xbf16>, vector<8x8xbf16>, vector<8x8xf32> -> vector<8x8xf32>
    %114 = vector.extract_strided_slice %7 {offsets = [8, 8], sizes = [8, 8], strides = [1, 1]} : vector<16x96xf32> to vector<8x8xf32>
    %115 = arith.truncf %114 : vector<8x8xf32> to vector<8x8xbf16>
    %116 = vector.extract_strided_slice %7 {offsets = [8, 40], sizes = [8, 8], strides = [1, 1]} : vector<16x96xf32> to vector<8x8xf32>
    %117 = arith.truncf %116 : vector<8x8xf32> to vector<8x8xbf16>
    %118 = vector.extract_strided_slice %7 {offsets = [8, 72], sizes = [8, 8], strides = [1, 1]} : vector<16x96xf32> to vector<8x8xf32>
    %119 = arith.truncf %118 : vector<8x8xf32> to vector<8x8xbf16>
    %120 = tpu.transpose %117, [1, 0] : vector<8x8xbf16> -> vector<8x8xbf16>
    %cst_31 = arith.constant dense<0.000000e+00> : vector<8x8xf32>
    %121 = tpu.matmul %115, %120, %cst_31 {dimension_numbers = #tpu.dot_dimension_numbers<[1], [0], [0], [1], [0, 0, 1, 1], [], []>} : vector<8x8xbf16>, vector<8x8xbf16>, vector<8x8xf32> -> vector<8x8xf32>
    %cst_32 = arith.constant 0.353553385 : f32
    %122 = vector.broadcast %cst_32 : f32 to vector<8x8xf32>
    %123 = arith.mulf %121, %122 : vector<8x8xf32>
    %cst_33 = arith.constant dense<0xFF800000> : vector<8xf32>
    %124 = vector.multi_reduction <maximumf>, %123, %cst_33 [1] : vector<8x8xf32> to vector<8xf32>
    %125 = vector.shape_cast %124 : vector<8xf32> to vector<8x1xf32>
    %126 = vector.broadcast %125 : vector<8x1xf32> to vector<8x8xf32>
    %127 = arith.subf %123, %126 : vector<8x8xf32>
    %128 = math.exp %127 : vector<8x8xf32>
    %cst_34 = arith.constant dense<0.000000e+00> : vector<8xf32>
    %129 = vector.multi_reduction <add>, %128, %cst_34 [1] : vector<8x8xf32> to vector<8xf32>
    %130 = vector.shape_cast %129 : vector<8xf32> to vector<8x1xf32>
    %131 = vector.broadcast %130 : vector<8x1xf32> to vector<8x8xf32>
    %132 = arith.divf %128, %131 : vector<8x8xf32>
    %133 = arith.truncf %132 : vector<8x8xf32> to vector<8x8xbf16>
    %cst_35 = arith.constant dense<0.000000e+00> : vector<8x8xf32>
    %134 = tpu.matmul %133, %119, %cst_35 {dimension_numbers = #tpu.dot_dimension_numbers<[1], [0], [0], [1], [0, 0, 1, 1], [], []>} : vector<8x8xbf16>, vector<8x8xbf16>, vector<8x8xf32> -> vector<8x8xf32>
    %135 = vector.extract_strided_slice %7 {offsets = [8, 16], sizes = [8, 8], strides = [1, 1]} : vector<16x96xf32> to vector<8x8xf32>
    %136 = arith.truncf %135 : vector<8x8xf32> to vector<8x8xbf16>
    %137 = vector.extract_strided_slice %7 {offsets = [8, 48], sizes = [8, 8], strides = [1, 1]} : vector<16x96xf32> to vector<8x8xf32>
    %138 = arith.truncf %137 : vector<8x8xf32> to vector<8x8xbf16>
    %139 = vector.extract_strided_slice %7 {offsets = [8, 80], sizes = [8, 8], strides = [1, 1]} : vector<16x96xf32> to vector<8x8xf32>
    %140 = arith.truncf %139 : vector<8x8xf32> to vector<8x8xbf16>
    %141 = tpu.transpose %138, [1, 0] : vector<8x8xbf16> -> vector<8x8xbf16>
    %cst_36 = arith.constant dense<0.000000e+00> : vector<8x8xf32>
    %142 = tpu.matmul %136, %141, %cst_36 {dimension_numbers = #tpu.dot_dimension_numbers<[1], [0], [0], [1], [0, 0, 1, 1], [], []>} : vector<8x8xbf16>, vector<8x8xbf16>, vector<8x8xf32> -> vector<8x8xf32>
    %cst_37 = arith.constant 0.353553385 : f32
    %143 = vector.broadcast %cst_37 : f32 to vector<8x8xf32>
    %144 = arith.mulf %142, %143 : vector<8x8xf32>
    %cst_38 = arith.constant dense<0xFF800000> : vector<8xf32>
    %145 = vector.multi_reduction <maximumf>, %144, %cst_38 [1] : vector<8x8xf32> to vector<8xf32>
    %146 = vector.shape_cast %145 : vector<8xf32> to vector<8x1xf32>
    %147 = vector.broadcast %146 : vector<8x1xf32> to vector<8x8xf32>
    %148 = arith.subf %144, %147 : vector<8x8xf32>
    %149 = math.exp %148 : vector<8x8xf32>
    %cst_39 = arith.constant dense<0.000000e+00> : vector<8xf32>
    %150 = vector.multi_reduction <add>, %149, %cst_39 [1] : vector<8x8xf32> to vector<8xf32>
    %151 = vector.shape_cast %150 : vector<8xf32> to vector<8x1xf32>
    %152 = vector.broadcast %151 : vector<8x1xf32> to vector<8x8xf32>
    %153 = arith.divf %149, %152 : vector<8x8xf32>
    %154 = arith.truncf %153 : vector<8x8xf32> to vector<8x8xbf16>
    %cst_40 = arith.constant dense<0.000000e+00> : vector<8x8xf32>
    %155 = tpu.matmul %154, %140, %cst_40 {dimension_numbers = #tpu.dot_dimension_numbers<[1], [0], [0], [1], [0, 0, 1, 1], [], []>} : vector<8x8xbf16>, vector<8x8xbf16>, vector<8x8xf32> -> vector<8x8xf32>
    %156 = vector.extract_strided_slice %7 {offsets = [8, 24], sizes = [8, 8], strides = [1, 1]} : vector<16x96xf32> to vector<8x8xf32>
    %157 = arith.truncf %156 : vector<8x8xf32> to vector<8x8xbf16>
    %158 = vector.extract_strided_slice %7 {offsets = [8, 56], sizes = [8, 8], strides = [1, 1]} : vector<16x96xf32> to vector<8x8xf32>
    %159 = arith.truncf %158 : vector<8x8xf32> to vector<8x8xbf16>
    %160 = vector.extract_strided_slice %7 {offsets = [8, 88], sizes = [8, 8], strides = [1, 1]} : vector<16x96xf32> to vector<8x8xf32>
    %161 = arith.truncf %160 : vector<8x8xf32> to vector<8x8xbf16>
    %162 = tpu.transpose %159, [1, 0] : vector<8x8xbf16> -> vector<8x8xbf16>
    %cst_41 = arith.constant dense<0.000000e+00> : vector<8x8xf32>
    %163 = tpu.matmul %157, %162, %cst_41 {dimension_numbers = #tpu.dot_dimension_numbers<[1], [0], [0], [1], [0, 0, 1, 1], [], []>} : vector<8x8xbf16>, vector<8x8xbf16>, vector<8x8xf32> -> vector<8x8xf32>
    %cst_42 = arith.constant 0.353553385 : f32
    %164 = vector.broadcast %cst_42 : f32 to vector<8x8xf32>
    %165 = arith.mulf %163, %164 : vector<8x8xf32>
    %cst_43 = arith.constant dense<0xFF800000> : vector<8xf32>
    %166 = vector.multi_reduction <maximumf>, %165, %cst_43 [1] : vector<8x8xf32> to vector<8xf32>
    %167 = vector.shape_cast %166 : vector<8xf32> to vector<8x1xf32>
    %168 = vector.broadcast %167 : vector<8x1xf32> to vector<8x8xf32>
    %169 = arith.subf %165, %168 : vector<8x8xf32>
    %170 = math.exp %169 : vector<8x8xf32>
    %cst_44 = arith.constant dense<0.000000e+00> : vector<8xf32>
    %171 = vector.multi_reduction <add>, %170, %cst_44 [1] : vector<8x8xf32> to vector<8xf32>
    %172 = vector.shape_cast %171 : vector<8xf32> to vector<8x1xf32>
    %173 = vector.broadcast %172 : vector<8x1xf32> to vector<8x8xf32>
    %174 = arith.divf %170, %173 : vector<8x8xf32>
    %175 = arith.truncf %174 : vector<8x8xf32> to vector<8x8xbf16>
    %cst_45 = arith.constant dense<0.000000e+00> : vector<8x8xf32>
    %176 = tpu.matmul %175, %161, %cst_45 {dimension_numbers = #tpu.dot_dimension_numbers<[1], [0], [0], [1], [0, 0, 1, 1], [], []>} : vector<8x8xbf16>, vector<8x8xbf16>, vector<8x8xf32> -> vector<8x8xf32>
    %177 = tpu.concatenate %113, %134, %155, %176 in 1 : vector<8x8xf32>, vector<8x8xf32>, vector<8x8xf32>, vector<8x8xf32> -> vector<8x32xf32>
    %178 = tpu.concatenate %92, %177 in 0 : vector<8x32xf32>, vector<8x32xf32> -> vector<16x32xf32>
    %179 = arith.truncf %178 : vector<16x32xf32> to vector<16x32xbf16>
    %c0_46 = arith.constant 0 : index
    %c0_47 = arith.constant 0 : index
    %180 = vector.load %arg4[%c0_46, %c0_47] : memref<32x32xbf16, #tpu.memory_space<vmem>>, vector<32x32xbf16>
    %cst_48 = arith.constant dense<0.000000e+00> : vector<16x32xf32>
    %181 = tpu.matmul %179, %180, %cst_48 {dimension_numbers = #tpu.dot_dimension_numbers<[1], [0], [0], [1], [0, 0, 1, 1], [], []>} : vector<16x32xbf16>, vector<32x32xbf16>, vector<16x32xf32> -> vector<16x32xf32>
    %c0_49 = arith.constant 0 : index
    %c0_50 = arith.constant 0 : index
    %182 = vector.load %arg5[%c0_49, %c0_50] : memref<1x32xf32, #tpu.memory_space<vmem>>, vector<1x32xf32>
    %183 = vector.broadcast %182 : vector<1x32xf32> to vector<16x32xf32>
    %184 = arith.addf %181, %183 : vector<16x32xf32>
    %185 = arith.addf %1, %184 : vector<16x32xf32>
    %c0_51 = arith.constant 0 : index
    %c0_52 = arith.constant 0 : index
    %186 = vector.load %arg6[%c0_51, %c0_52] : memref<1x32xf32, #tpu.memory_space<vmem>>, vector<1x32xf32>
    %c0_53 = arith.constant 0 : index
    %c0_54 = arith.constant 0 : index
    %187 = vector.load %arg7[%c0_53, %c0_54] : memref<1x32xf32, #tpu.memory_space<vmem>>, vector<1x32xf32>
    %cst_55 = arith.constant dense<0.000000e+00> : vector<16xf32>
    %188 = vector.multi_reduction <add>, %185, %cst_55 [1] : vector<16x32xf32> to vector<16xf32>
    %189 = vector.shape_cast %188 : vector<16xf32> to vector<16x1xf32>
    %cst_56 = arith.constant 3.200000e+01 : f32
    %190 = vector.broadcast %cst_56 : f32 to vector<16x1xf32>
    %191 = arith.divf %189, %190 : vector<16x1xf32>
    %192 = vector.broadcast %191 : vector<16x1xf32> to vector<16x32xf32>
    %193 = arith.subf %185, %192 : vector<16x32xf32>
    %194 = vector.broadcast %191 : vector<16x1xf32> to vector<16x32xf32>
    %195 = arith.subf %185, %194 : vector<16x32xf32>
    %196 = arith.mulf %193, %195 : vector<16x32xf32>
    %cst_57 = arith.constant dense<0.000000e+00> : vector<16xf32>
    %197 = vector.multi_reduction <add>, %196, %cst_57 [1] : vector<16x32xf32> to vector<16xf32>
    %198 = vector.shape_cast %197 : vector<16xf32> to vector<16x1xf32>
    %cst_58 = arith.constant 3.200000e+01 : f32
    %199 = vector.broadcast %cst_58 : f32 to vector<16x1xf32>
    %200 = arith.divf %198, %199 : vector<16x1xf32>
    %201 = vector.broadcast %191 : vector<16x1xf32> to vector<16x32xf32>
    %202 = arith.subf %185, %201 : vector<16x32xf32>
    %cst_59 = arith.constant 9.99999974E-6 : f32
    %203 = vector.broadcast %cst_59 : f32 to vector<16x1xf32>
    %204 = arith.addf %200, %203 : vector<16x1xf32>
    %205 = math.rsqrt %204 : vector<16x1xf32>
    %206 = vector.broadcast %205 : vector<16x1xf32> to vector<16x32xf32>
    %207 = arith.mulf %202, %206 : vector<16x32xf32>
    %208 = vector.broadcast %186 : vector<1x32xf32> to vector<16x32xf32>
    %209 = arith.mulf %207, %208 : vector<16x32xf32>
    %210 = vector.broadcast %187 : vector<1x32xf32> to vector<16x32xf32>
    %211 = arith.addf %209, %210 : vector<16x32xf32>
    %212 = arith.truncf %211 : vector<16x32xf32> to vector<16x32xbf16>
    %c0_60 = arith.constant 0 : index
    %c0_61 = arith.constant 0 : index
    %213 = vector.load %arg8[%c0_60, %c0_61] : memref<32x64xbf16, #tpu.memory_space<vmem>>, vector<32x64xbf16>
    %cst_62 = arith.constant dense<0.000000e+00> : vector<16x64xf32>
    %214 = tpu.matmul %212, %213, %cst_62 {dimension_numbers = #tpu.dot_dimension_numbers<[1], [0], [0], [1], [0, 0, 1, 1], [], []>} : vector<16x32xbf16>, vector<32x64xbf16>, vector<16x64xf32> -> vector<16x64xf32>
    %c0_63 = arith.constant 0 : index
    %c0_64 = arith.constant 0 : index
    %215 = vector.load %arg9[%c0_63, %c0_64] : memref<1x64xf32, #tpu.memory_space<vmem>>, vector<1x64xf32>
    %216 = vector.broadcast %215 : vector<1x64xf32> to vector<16x64xf32>
    %217 = arith.addf %214, %216 : vector<16x64xf32>
    %cst_65 = arith.constant 0.000000e+00 : f32
    %218 = vector.broadcast %cst_65 : f32 to vector<16x64xf32>
    %219 = arith.maximumf %217, %218 : vector<16x64xf32>
    %220 = arith.truncf %219 : vector<16x64xf32> to vector<16x64xbf16>
    %c0_66 = arith.constant 0 : index
    %c0_67 = arith.constant 0 : index
    %221 = vector.load %arg10[%c0_66, %c0_67] : memref<64x32xbf16, #tpu.memory_space<vmem>>, vector<64x32xbf16>
    %cst_68 = arith.constant dense<0.000000e+00> : vector<16x32xf32>
    %222 = tpu.matmul %220, %221, %cst_68 {dimension_numbers = #tpu.dot_dimension_numbers<[1], [0], [0], [1], [0, 0, 1, 1], [], []>} : vector<16x64xbf16>, vector<64x32xbf16>, vector<16x32xf32> -> vector<16x32xf32>
    %c0_69 = arith.constant 0 : index
    %c0_70 = arith.constant 0 : index
    %223 = vector.load %arg11[%c0_69, %c0_70] : memref<1x32xf32, #tpu.memory_space<vmem>>, vector<1x32xf32>
    %224 = vector.broadcast %223 : vector<1x32xf32> to vector<16x32xf32>
    %225 = arith.addf %222, %224 : vector<16x32xf32>
    %226 = arith.addf %211, %225 : vector<16x32xf32>
    %c0_71 = arith.constant 0 : index
    %c0_72 = arith.constant 0 : index
    %227 = vector.load %arg12[%c0_71, %c0_72] : memref<1x32xf32, #tpu.memory_space<vmem>>, vector<1x32xf32>
    %c0_73 = arith.constant 0 : index
    %c0_74 = arith.constant 0 : index
    %228 = vector.load %arg13[%c0_73, %c0_74] : memref<1x32xf32, #tpu.memory_space<vmem>>, vector<1x32xf32>
    %cst_75 = arith.constant dense<0.000000e+00> : vector<16xf32>
    %229 = vector.multi_reduction <add>, %226, %cst_75 [1] : vector<16x32xf32> to vector<16xf32>
    %230 = vector.shape_cast %229 : vector<16xf32> to vector<16x1xf32>
    %cst_76 = arith.constant 3.200000e+01 : f32
    %231 = vector.broadcast %cst_76 : f32 to vector<16x1xf32>
    %232 = arith.divf %230, %231 : vector<16x1xf32>
    %233 = vector.broadcast %232 : vector<16x1xf32> to vector<16x32xf32>
    %234 = arith.subf %226, %233 : vector<16x32xf32>
    %235 = vector.broadcast %232 : vector<16x1xf32> to vector<16x32xf32>
    %236 = arith.subf %226, %235 : vector<16x32xf32>
    %237 = arith.mulf %234, %236 : vector<16x32xf32>
    %cst_77 = arith.constant dense<0.000000e+00> : vector<16xf32>
    %238 = vector.multi_reduction <add>, %237, %cst_77 [1] : vector<16x32xf32> to vector<16xf32>
    %239 = vector.shape_cast %238 : vector<16xf32> to vector<16x1xf32>
    %cst_78 = arith.constant 3.200000e+01 : f32
    %240 = vector.broadcast %cst_78 : f32 to vector<16x1xf32>
    %241 = arith.divf %239, %240 : vector<16x1xf32>
    %242 = vector.broadcast %232 : vector<16x1xf32> to vector<16x32xf32>
    %243 = arith.subf %226, %242 : vector<16x32xf32>
    %cst_79 = arith.constant 9.99999974E-6 : f32
    %244 = vector.broadcast %cst_79 : f32 to vector<16x1xf32>
    %245 = arith.addf %241, %244 : vector<16x1xf32>
    %246 = math.rsqrt %245 : vector<16x1xf32>
    %247 = vector.broadcast %246 : vector<16x1xf32> to vector<16x32xf32>
    %248 = arith.mulf %243, %247 : vector<16x32xf32>
    %249 = vector.broadcast %227 : vector<1x32xf32> to vector<16x32xf32>
    %250 = arith.mulf %248, %249 : vector<16x32xf32>
    %251 = vector.broadcast %228 : vector<1x32xf32> to vector<16x32xf32>
    %252 = arith.addf %250, %251 : vector<16x32xf32>
    %253 = vector.extract_strided_slice %252 {offsets = [4, 0], sizes = [4, 32], strides = [1, 1]} : vector<16x32xf32> to vector<4x32xf32>
    %254 = vector.extract_strided_slice %252 {offsets = [12, 0], sizes = [4, 32], strides = [1, 1]} : vector<16x32xf32> to vector<4x32xf32>
    %255 = tpu.concatenate %253, %254 in 0 : vector<4x32xf32>, vector<4x32xf32> -> vector<8x32xf32>
    %256 = tpu.transpose %255, [1, 0] : vector<8x32xf32> -> vector<32x8xf32>
    %257 = arith.truncf %256 : vector<32x8xf32> to vector<32x8xbf16>
    %c0_80 = arith.constant 0 : index
    %c0_81 = arith.constant 0 : index
    %258 = vector.load %arg14[%c0_80, %c0_81] : memref<32x32xbf16, #tpu.memory_space<vmem>>, vector<32x32xbf16>
    %cst_82 = arith.constant dense<0.000000e+00> : vector<32x8xf32>
    %259 = tpu.matmul %258, %257, %cst_82 {dimension_numbers = #tpu.dot_dimension_numbers<[1], [0], [0], [1], [0, 0, 1, 1], [], []>} : vector<32x32xbf16>, vector<32x8xbf16>, vector<32x8xf32> -> vector<32x8xf32>
    %c0_83 = arith.constant 0 : index
    %c0_84 = arith.constant 0 : index
    %260 = vector.load %arg15[%c0_83, %c0_84] : memref<32x1xf32, #tpu.memory_space<vmem>>, vector<32x1xf32>
    %261 = vector.broadcast %260 : vector<32x1xf32> to vector<32x8xf32>
    %262 = arith.addf %259, %261 : vector<32x8xf32>
    %cst_85 = arith.constant 0.000000e+00 : f32
    %263 = vector.broadcast %cst_85 : f32 to vector<32x8xf32>
    %264 = arith.maximumf %262, %263 : vector<32x8xf32>
    %c0_86 = arith.constant 0 : index
    %c0_87 = arith.constant 0 : index
    %265 = vector.load %arg16[%c0_86, %c0_87] : memref<32x1xf32, #tpu.memory_space<vmem>>, vector<32x1xf32>
    %266 = vector.broadcast %265 : vector<32x1xf32> to vector<32x8xf32>
    %267 = arith.mulf %264, %266 : vector<32x8xf32>
    %cst_88 = arith.constant dense<0.000000e+00> : vector<8xf32>
    %268 = vector.multi_reduction <add>, %267, %cst_88 [0] : vector<32x8xf32> to vector<8xf32>
    %269 = vector.shape_cast %268 : vector<8xf32> to vector<1x8xf32>
    %c0_89 = arith.constant 0 : index
    %c0_90 = arith.constant 0 : index
    %270 = vector.load %arg17[%c0_89, %c0_90] : memref<1x1xf32, #tpu.memory_space<vmem>>, vector<1x1xf32>
    %271 = vector.broadcast %270 : vector<1x1xf32> to vector<1x8xf32>
    %272 = arith.addf %269, %271 : vector<1x8xf32>
    %c0_91 = arith.constant 0 : index
    %c0_92 = arith.constant 0 : index
    %273 = vector.load %arg18[%c0_91, %c0_92] : memref<1x8xf32, #tpu.memory_space<vmem>>, vector<1x8xf32>
    tpu.vector_store %arg18[%c0_91, %c0_92], %272 {strides = array<i32>} : memref<1x8xf32, #tpu.memory_space<vmem>>, vector<1x8xf32>,
    return
  }
  func.func @transform_0(%arg0: i32) -> (i32, i32, i32) {
    %c0_i32 = arith.constant 0 : i32
    %c0_i32_0 = arith.constant 0 : i32
    %c0_i32_1 = arith.constant 0 : i32
    return %arg0, %c0_i32, %c0_i32_0 : i32, i32, i32
  }
  func.func @transform_1(%arg0: i32) -> (i32, i32) {
    %c0_i32 = arith.constant 0 : i32
    %c0_i32_0 = arith.constant 0 : i32
    %c0_i32_1 = arith.constant 0 : i32
    return %c0_i32, %c0_i32_0 : i32, i32
  }
  func.func @transform_2(%arg0: i32) -> (i32, i32) {
    %c0_i32 = arith.constant 0 : i32
    %c0_i32_0 = arith.constant 0 : i32
    %c0_i32_1 = arith.constant 0 : i32
    return %c0_i32, %c0_i32_0 : i32, i32
  }
  func.func @transform_3(%arg0: i32) -> (i32, i32) {
    %c0_i32 = arith.constant 0 : i32
    %c0_i32_0 = arith.constant 0 : i32
    %c0_i32_1 = arith.constant 0 : i32
    return %c0_i32, %c0_i32_0 : i32, i32
  }
  func.func @transform_4(%arg0: i32) -> (i32, i32) {
    %c0_i32 = arith.constant 0 : i32
    %c0_i32_0 = arith.constant 0 : i32
    %c0_i32_1 = arith.constant 0 : i32
    return %c0_i32, %c0_i32_0 : i32, i32
  }
  func.func @transform_5(%arg0: i32) -> (i32, i32) {
    %c0_i32 = arith.constant 0 : i32
    %c0_i32_0 = arith.constant 0 : i32
    %c0_i32_1 = arith.constant 0 : i32
    return %c0_i32, %c0_i32_0 : i32, i32
  }
  func.func @transform_6(%arg0: i32) -> (i32, i32) {
    %c0_i32 = arith.constant 0 : i32
    %c0_i32_0 = arith.constant 0 : i32
    %c0_i32_1 = arith.constant 0 : i32
    return %c0_i32, %c0_i32_0 : i32, i32
  }
  func.func @transform_7(%arg0: i32) -> (i32, i32) {
    %c0_i32 = arith.constant 0 : i32
    %c0_i32_0 = arith.constant 0 : i32
    %c0_i32_1 = arith.constant 0 : i32
    return %c0_i32, %c0_i32_0 : i32, i32
  }
  func.func @transform_8(%arg0: i32) -> (i32, i32) {
    %c0_i32 = arith.constant 0 : i32
    %c0_i32_0 = arith.constant 0 : i32
    %c0_i32_1 = arith.constant 0 : i32
    return %c0_i32, %c0_i32_0 : i32, i32
  }
  func.func @transform_9(%arg0: i32) -> (i32, i32) {
    %c0_i32 = arith.constant 0 : i32
    %c0_i32_0 = arith.constant 0 : i32
    %c0_i32_1 = arith.constant 0 : i32
    return %c0_i32, %c0_i32_0 : i32, i32
  }
  func.func @transform_10(%arg0: i32) -> (i32, i32) {
    %c0_i32 = arith.constant 0 : i32
    %c0_i32_0 = arith.constant 0 : i32
    %c0_i32_1 = arith.constant 0 : i32
    return %c0_i32, %c0_i32_0 : i32, i32
  }
  func.func @transform_11(%arg0: i32) -> (i32, i32) {
    %c0_i32 = arith.constant 0 : i32
    %c0_i32_0 = arith.constant 0 : i32
    %c0_i32_1 = arith.constant 0 : i32
    return %c0_i32, %c0_i32_0 : i32, i32
  }
  func.func @transform_12(%arg0: i32) -> (i32, i32) {
    %c0_i32 = arith.constant 0 : i32
    %c0_i32_0 = arith.constant 0 : i32
    %c0_i32_1 = arith.constant 0 : i32
    return %c0_i32, %c0_i32_0 : i32, i32
  }
  func.func @transform_13(%arg0: i32) -> (i32, i32) {
    %c0_i32 = arith.constant 0 : i32
    %c0_i32_0 = arith.constant 0 : i32
    %c0_i32_1 = arith.constant 0 : i32
    return %c0_i32, %c0_i32_0 : i32, i32
  }
  func.func @transform_14(%arg0: i32) -> (i32, i32) {
    %c0_i32 = arith.constant 0 : i32
    %c0_i32_0 = arith.constant 0 : i32
    %c0_i32_1 = arith.constant 0 : i32
    return %c0_i32, %c0_i32_0 : i32, i32
  }
  func.func @transform_15(%arg0: i32) -> (i32, i32) {
    %c0_i32 = arith.constant 0 : i32
    %c0_i32_0 = arith.constant 0 : i32
    %c0_i32_1 = arith.constant 0 : i32
    return %c0_i32, %c0_i32_0 : i32, i32
  }
  func.func @transform_16(%arg0: i32) -> (i32, i32) {
    %c0_i32 = arith.constant 0 : i32
    %c0_i32_0 = arith.constant 0 : i32
    %c0_i32_1 = arith.constant 0 : i32
    return %c0_i32, %c0_i32_0 : i32, i32
  }
  func.func @transform_17(%arg0: i32) -> (i32, i32) {
    %c0_i32 = arith.constant 0 : i32
    %c0_i32_0 = arith.constant 0 : i32
    return %arg0, %c0_i32 : i32, i32
  }
}

</mosaic_0001>

<bundles_post_ra>
// kernel: model_forward.1
= control target key start
LH: loop header
LB: loop body
LE: loop exit
PB: predicated region body
PF: predicated region fallthrough
CT: control target
= control target key end

     0   :  { %v1879_v0 = vmov 0.0   ;;  %vm1880_vm0 = vmmov 0   ;;  %vm85_vm1 = vcmask 261120   ;;  %s1881_s21 = smov 120   ;;  %s1882_s22 = smov 96   ;;  %vm134_vm2 = vcmask 64512   ;;  %s2304_s1 = inlined_call_operand.vmem [shape: bf16[32,96], index: 1, kind: input, shape index: {}]   ;;  %s2305_s0 = inlined_call_operand.vmem [shape: f32[2,8,32], index: 0, kind: input, shape index: {}]   ;;  %s2306_s2 = inlined_call_operand.vmem [shape: f32[1,96], index: 2, kind: input, shape index: {}]   ;;  %s2307_s3 = inlined_call_operand.vmem [shape: bf16[32,32], index: 3, kind: input, shape index: {}]   ;;  %s2308_s4 = inlined_call_operand.vmem [shape: f32[1,32], index: 4, kind: input, shape index: {}]   ;;  %s2309_s7 = inlined_call_operand.vmem [shape: bf16[32,64], index: 7, kind: input, shape index: {}]   ;;  %s2310_s9 = inlined_call_operand.vmem [shape: bf16[64,32], index: 9, kind: input, shape index: {}]   ;;  %s2311_s5 = inlined_call_operand.vmem [shape: f32[1,32], index: 5, kind: input, shape index: {}]   ;;  %s2312_s6 = inlined_call_operand.vmem [shape: f32[1,32], index: 6, kind: input, shape index: {}]   ;;  %s2313_s8 = inlined_call_operand.vmem [shape: f32[1,64], index: 8, kind: input, shape index: {}]   ;;  %s2314_s10 = inlined_call_operand.vmem [shape: f32[1,32], index: 10, kind: input, shape index: {}]   ;;  %s2315_s11 = inlined_call_operand.vmem [shape: f32[1,32], index: 11, kind: input, shape index: {}]   ;;  %s2316_s12 = inlined_call_operand.vmem [shape: f32[1,32], index: 12, kind: input, shape index: {}]   ;;  %s2317_s13 = inlined_call_operand.vmem [shape: bf16[32,32], index: 13, kind: input, shape index: {}]   ;;  %s2318_s14 = inlined_call_operand.vmem [shape: f32[32,1], index: 14, kind: input, shape index: {}]   ;;  %s2319_s16 = inlined_call_operand.<no memory space> [shape: f32[1,1], index: 16, kind: input, shape index: {}]   ;;  %s2320_s15 = inlined_call_operand.vmem [shape: f32[32,1], index: 15, kind: input, shape index: {}]   ;;  %s2321_s17 = inlined_call_operand.vmem [shape: f32[1,8], index: 17, kind: output, shape index: {}]  }
   0x1   :  { %2324 = sst [smem:[#allocation3_spill]] %s2304_s1  ;;  %1653 = vmatprep.subr.bf16.mxu0 %v1879_v0  ;;  %1657 = vmatprep.mubr.msk.bf16.mxu0 %vm1880_vm0, %v1879_v0  ;;  %v1561_v6 = vld [vmem:[%s2306_s2] ss:$0 sm:$0xff]  ;;  %s1883_s23 = smov 80   ;;  %vm199_vm3 = vcmask 1043456   ;;  %vm589_vm4 = vcmask 130048  }
   0x2   :  { %2325 = sst [smem:[#allocation4_spill]] %s2305_s0  ;;  %s2326_s26 = sld [smem:[#allocation3_spill]]  ;;  %1661 = vmatprep.subr.bf16.mxu1 %v1879_v0  ;;  %1663 = vmatprep.mubr.msk.bf16.mxu1 %vm1880_vm0, %v1879_v0  ;;  %vm591_vm5 = vcmask 195584   ;;  %vm1277_vm6 = vcmask 523264   ;;  %vm1555_vm7 = vcmask 57344  }
   0x3   :  { %s2327_s30 = sld [smem:[#allocation4_spill]]  ;;  %s1884_s24 = smov 88  }
   0x4   :  { %s1885_s2 = smov 72   ;;  %s1886_s25 = smov 112  }
   0x5   :  { %s1888_s27 = smov 56   ;;  %s1889_s28 = smov 64  }
   0x6   :  { %s1890_s29 = smov 48   ;;  %s1891_s1 = smov 40  }
   0x7   :  { %s1892_s19 = smov 8  }
   0x8   :  { %v1827_v1 = vld [vmem:[%s2326_s26] sm:$0xff]   ;;  %v1828_v2 = vld [vmem:[%s2326_s26 + $0x8] sm:$0xff]   ;;  %s1887_s26 = smov 104  }
   0x9   :  { %1654 = vmatpush3.bf16.msra.mxu0 %v1827_v1  ;;  %v2001_v3 = vld [vmem:[%s2327_s30] sm:$0xff]  ;;  %v2006_v4 = vld [vmem:[%s2327_s30 + $0x8] sm:$0xff] }
   0xa   :  { %1655 = vmatprep.subr.bf16.mxu0 %v1879_v0  ;;  %v61_v5 = vpack.c.bf16 %v2006_v4, %v2001_v3 }
   0xd   :  { %1656 = vmatpush3.bf16.msra.mxu0 %v1828_v2 }
   0xe   :  { %1667 = vmatprep.subr.bf16.mxu0 %v1879_v0 }
  0x10   :  { %1658 = vmatmul.mubr.msk.bf16.vlgmr.msra.gmra.mrb[0].mxu0 %vm85_vm1, %v61_v5 }
  0x11   :  { %1669 = vmatprep.mubr.msk.bf16.mxu0 %vm1880_vm0, %v1879_v0 }
  0xe3   :  { %v123_v7 = vpop.f32.mrb[0].mxu0 }
  0xe4   :  { %v124_v8 = vadd.f32 %v1561_v6, %v123_v7  ;;  %v1659_v9 = vpop.f32.mrb[1].mxu0 }
  0xe5   :  { %v126_v10 = vpop.f32.mrb[2].mxu0 }
  0xe6   :  { %v2018_v11 = vpack.c.bf16 %v124_v8, %v124_v8  ;;  %v1660_v12 = vpop.f32.mrb[3].mxu0  ;;  %v127_v13 = vadd.f32 %v1561_v6, %v126_v10 }
  0xe8   :  { %243 = vrot.lane.b32.xlu1 %v2018_v11, %s1881_s21  ;;  %132 = vrot.lane.b32.xlu0 %v2018_v11, %s1882_s22  ;;  %v2026_v14 = vpack.c.bf16 %v127_v13, %v127_v13 }
  0xec   :  { %356 = vrot.lane.b32.xlu1 %v2018_v11, %s1883_s23  ;;  %245 = vrot.lane.b32.xlu0 %v2018_v11, %s1884_s24 }
  0xf0   :  { %467 = vrot.lane.b32.xlu1 %v2018_v11, %s1885_s2  ;;  %354 = vrot.lane.b32.xlu0 %v2018_v11, %s1886_s25 }
  0xf4   :  { %465 = vrot.lane.b32.xlu0 %v2018_v11, %s1887_s26  ;;  %595 = vrot.lane.b32.xlu1 %v2026_v14, %s1882_s22  ;;  %s1894_s22 = smov 24  }
  0xf8   :  { %706 = vrot.lane.b32.xlu0 %v2026_v14, %s1884_s24  ;;  %704 = vrot.lane.b32.xlu1 %v2026_v14, %s1881_s21  ;;  %s1893_s21 = smov 16  }
  0xfc   :  { %817 = vrot.lane.b32.xlu0 %v2026_v14, %s1883_s23  ;;  %815 = vrot.lane.b32.xlu1 %v2026_v14, %s1886_s25 }
 0x100   :  { %928 = vrot.lane.b32.xlu0 %v2026_v14, %s1885_s2  ;;  %926 = vrot.lane.b32.xlu1 %v2026_v14, %s1887_s26 }
 0x15a   :  { %v133_v15 = vpop.permute.xlu0 %132  ;;  %v244_v18 = vpop.permute.xlu1 %243 }
 0x15b   :  { %v139_v16 = vsel %vm134_vm2, %v133_v15, 0 }
 0x15c   :  { %1662 = vmatpush3.bf16.xpose.msra.mxu1 %v139_v16 }
 0x15d   :  { %1673 = vmatprep.subr.bf16.mxu1 %v1879_v0 }
 0x15e   :  { %v246_v17 = vpop.permute.xlu0 %245  ;;  %v357_v20 = vpop.permute.xlu1 %356 }
 0x15f   :  { %v251_v19 = vsel %vm134_vm2, %v246_v17, 0  ;;  %v362_v21 = vsel %vm134_vm2, %v357_v20, 0 }
 0x162   :  { %v468_v22 = vpop.permute.xlu1 %467  ;;  %v355_v23 = vpop.permute.xlu0 %354 }
 0x163   :  { %1664 = vmatmul.mubr.msk.bf16.vlgmr.msra.gmra.mrb[0].mxu1 %vm134_vm2, %v2018_v11  ;;  %v473_v24 = vsel %vm134_vm2, %v468_v22, 0 }
 0x164   :  { %1674 = vmatpush3.bf16.xpose.msra.mxu1 %v251_v19  ;;  %1675 = vmatprep.mubr.msk.bf16.mxu1 %vm1880_vm0, %v1879_v0 }
 0x165   :  { %1685 = vmatprep.subr.bf16.mxu1 %v1879_v0 }
 0x166   :  { %v596_v25 = vpop.permute.xlu1 %595  ;;  %v466_v26 = vpop.permute.xlu0 %465 }
 0x167   :  { %v601_v27 = vsel %vm134_vm2, %v596_v25, 0 }
 0x16a   :  { %v707_v28 = vpop.permute.xlu0 %706  ;;  %v705_v31 = vpop.permute.xlu1 %704 }
 0x16b   :  { %1676 = vmatmul.mubr.msk.bf16.vlgmr.msra.gmra.mrb[4].mxu1 %vm134_vm2, %v244_v18  ;;  %v712_v29 = vsel %vm134_vm2, %v707_v28, 0 }
 0x16c   :  { %1686 = vmatpush3.bf16.xpose.msra.mxu1 %v362_v21  ;;  %1687 = vmatprep.mubr.msk.bf16.mxu1 %vm1880_vm0, %v1879_v0 }
 0x16d   :  { %1697 = vmatprep.subr.bf16.mxu1 %v1879_v0 }
 0x16e   :  { %v818_v30 = vpop.permute.xlu0 %817  ;;  %v816_v34 = vpop.permute.xlu1 %815 }
 0x16f   :  { %v823_v32 = vsel %vm134_vm2, %v818_v30, 0 }
 0x172   :  { %v929_v33 = vpop.permute.xlu0 %928  ;;  %v927_v36 = vpop.permute.xlu1 %926 }
 0x173   :  { %1688 = vmatmul.mubr.msk.bf16.vlgmr.msra.gmra.mrb[8].mxu1 %vm134_vm2, %v355_v23  ;;  %v934_v35 = vsel %vm134_vm2, %v929_v33, 0 }
 0x174   :  { %1698 = vmatpush3.bf16.xpose.msra.mxu1 %v473_v24  ;;  %1699 = vmatprep.mubr.msk.bf16.mxu1 %vm1880_vm0, %v1879_v0 }
 0x175   :  { %1709 = vmatprep.subr.bf16.mxu1 %v1879_v0 }
 0x17b   :  { %1700 = vmatmul.mubr.msk.bf16.vlgmr.msra.gmra.mrb[12].mxu1 %vm134_vm2, %v466_v26 }
 0x17c   :  { %1710 = vmatpush3.bf16.xpose.msra.mxu1 %v601_v27  ;;  %1711 = vmatprep.mubr.msk.bf16.mxu1 %vm1880_vm0, %v1879_v0 }
 0x17d   :  { %1721 = vmatprep.subr.bf16.mxu1 %v1879_v0 }
 0x183   :  { %1712 = vmatmul.mubr.msk.bf16.vlgmr.msra.gmra.mrb[16].mxu1 %vm134_vm2, %v2026_v14 }
 0x184   :  { %1722 = vmatpush3.bf16.xpose.msra.mxu1 %v712_v29  ;;  %1723 = vmatprep.mubr.msk.bf16.mxu1 %vm1880_vm0, %v1879_v0 }
 0x185   :  { %1733 = vmatprep.subr.bf16.mxu1 %v1879_v0 }
 0x18b   :  { %1724 = vmatmul.mubr.msk.bf16.vlgmr.msra.gmra.mrb[20].mxu1 %vm134_vm2, %v705_v31 }
 0x18c   :  { %1734 = vmatpush3.bf16.xpose.msra.mxu1 %v823_v32  ;;  %1735 = vmatprep.mubr.msk.bf16.mxu1 %vm1880_vm0, %v1879_v0 }
 0x18d   :  { %1745 = vmatprep.subr.bf16.mxu1 %v1879_v0 }
 0x193   :  { %1736 = vmatmul.mubr.msk.bf16.vlgmr.msra.gmra.mrb[24].mxu1 %vm134_vm2, %v816_v34 }
 0x194   :  { %1746 = vmatpush3.bf16.xpose.msra.mxu1 %v934_v35  ;;  %1747 = vmatprep.mubr.msk.bf16.mxu1 %vm1880_vm0, %v1879_v0 }
 0x195   :  { %1757 = vmatprep.subr.bf16.mxu1 %v1879_v0 }
 0x19b   :  { %1748 = vmatmul.mubr.msk.bf16.vlgmr.msra.gmra.mrb[28].mxu1 %vm134_vm2, %v927_v36 }
 0x19c   :  { %1761 = vmatprep.mubr.msk.bf16.mxu1 %vm1880_vm0, %v1879_v0 }
 0x236   :  { %v175_v37 = vpop.f32.mrb[0].mxu1 }
 0x237   :  { %v181_v38 = vmul.f32 0.35355338, %v175_v37  ;;  %v1665_v39 = vpop.f32.mrb[1].mxu1 }
 0x238   :  { %v178_v40 = vpop.f32.mrb[2].mxu1 }
 0x239   :  { %v1666_v41 = vpop.f32.mrb[3].mxu1  ;;  %v182_v42 = vsel %vm134_vm2, %v181_v38, -inf }
 0x23a   :  { %183 = vmax.xlane.f32.xlu0 %v182_v42 }
 0x23e   :  { %v287_v43 = vpop.f32.mrb[4].mxu1 }
 0x23f   :  { %v293_v44 = vmul.f32 0.35355338, %v287_v43  ;;  %v1677_v45 = vpop.f32.mrb[5].mxu1 }
 0x240   :  { %v290_v46 = vpop.f32.mrb[6].mxu1 }
 0x241   :  { %v1678_v47 = vpop.f32.mrb[7].mxu1  ;;  %v294_v48 = vsel %vm134_vm2, %v293_v44, -inf }
 0x242   :  { %295 = vmax.xlane.f32.xlu1 %v294_v48 }
 0x246   :  { %v398_v49 = vpop.f32.mrb[8].mxu1 }
 0x247   :  { %v404_v50 = vmul.f32 0.35355338, %v398_v49  ;;  %v1689_v51 = vpop.f32.mrb[9].mxu1 }
 0x248   :  { %v401_v52 = vpop.f32.mrb[10].mxu1 }
 0x249   :  { %v1690_v53 = vpop.f32.mrb[11].mxu1  ;;  %v405_v54 = vsel %vm134_vm2, %v404_v50, -inf }
 0x24a   :  { %406 = vmax.xlane.f32.xlu0 %v405_v54 }
 0x24e   :  { %v509_v55 = vpop.f32.mrb[12].mxu1 }
 0x24f   :  { %v2081_v56 = vmul.f32 0.35355338, %v509_v55  ;;  %v1701_v57 = vpop.f32.mrb[13].mxu1 }
 0x250   :  { %v512_v58 = vpop.f32.mrb[14].mxu1 }
 0x251   :  { %v1702_v59 = vpop.f32.mrb[15].mxu1  ;;  %v516_v60 = vsel %vm134_vm2, %v2081_v56, -inf }
 0x252   :  { %517 = vmax.xlane.f32.xlu0 %v516_v60 }
 0x256   :  { %v637_v61 = vpop.f32.mrb[16].mxu1 }
 0x257   :  { %v2085_v62 = vmul.f32 0.35355338, %v637_v61  ;;  %v1713_v63 = vpop.f32.mrb[17].mxu1 }
 0x258   :  { %v640_v1 = vpop.f32.mrb[18].mxu1 }
 0x259   :  { %v1714_v2 = vpop.f32.mrb[19].mxu1  ;;  %v644_v5 = vsel %vm134_vm2, %v2085_v62, -inf }
 0x25a   :  { %645 = vmax.xlane.f32.xlu1 %v644_v5 }
 0x25e   :  { %v748_v6 = vpop.f32.mrb[20].mxu1 }
 0x25f   :  { %v2089_v7 = vmul.f32 0.35355338, %v748_v6  ;;  %v1725_v8 = vpop.f32.mrb[21].mxu1 }
 0x260   :  { %v751_v9 = vpop.f32.mrb[22].mxu1 }
 0x261   :  { %v1726_v10 = vpop.f32.mrb[23].mxu1  ;;  %v755_v12 = vsel %vm134_vm2, %v2089_v7, -inf }
 0x262   :  { %756 = vmax.xlane.f32.xlu0 %v755_v12 }
 0x266   :  { %v859_v13 = vpop.f32.mrb[24].mxu1 }
 0x267   :  { %v865_v15 = vmul.f32 0.35355338, %v859_v13  ;;  %v1737_v16 = vpop.f32.mrb[25].mxu1 }
 0x268   :  { %v862_v17 = vpop.f32.mrb[26].mxu1 }
 0x269   :  { %v1738_v18 = vpop.f32.mrb[27].mxu1  ;;  %v866_v19 = vsel %vm134_vm2, %v865_v15, -inf }
 0x26a   :  { %867 = vmax.xlane.f32.xlu1 %v866_v19 }
 0x26e   :  { %v970_v20 = vpop.f32.mrb[28].mxu1 }
 0x26f   :  { %v1749_v21 = vpop.f32.mrb[29].mxu1  ;;  %v2098_v24 = vmul.f32 0.35355338, %v970_v20 }
 0x270   :  { %v973_v22 = vpop.f32.mrb[30].mxu1 }
 0x271   :  { %v1750_v23 = vpop.f32.mrb[31].mxu1  ;;  %v977_v25 = vsel %vm134_vm2, %v2098_v24, -inf }
 0x278   :  { %306 = vrot.lane.b32.xlu0 %v2018_v11, %s1888_s27 }
 0x27b   :  { %194 = vrot.lane.b32.xlu1 %v2018_v11, %s1889_s28 }
 0x297   :  { %978 = vmax.xlane.f32.xlu0 %v977_v25 }
 0x2c7   :  { %v184_v26 = vpop.xlane.xlu0 %183 }
 0x2c8   :  { %v185_v27 = vsub.f32 %v181_v38, %v184_v26 }
 0x2ca   :  { %v186_v28 = vmul.f32 1.442695, %v185_v27 }
 0x2cc   :  { %1839 = vpow2.f32 %v186_v28 }
 0x2cf   :  { %v296_v29 = vpop.xlane.xlu1 %295 }
 0x2d0   :  { %v297_v30 = vsub.f32 %v293_v44, %v296_v29 }
 0x2d2   :  { %v298_v31 = vmul.f32 1.442695, %v297_v30 }
 0x2d4   :  { %1841 = vpow2.f32 %v298_v31 }
 0x2d6   :  { %v2102_v32 = vpop.eup %1839 }
 0x2d7   :  { %v407_v33 = vpop.xlane.xlu0 %406  ;;  %v188_v34 = vsel %vm134_vm2, %v2102_v32, 0.0 }
 0x2d8   :  { %v408_v35 = vsub.f32 %v404_v50, %v407_v33  ;;  %189 = vadd.xlane.f32.xlu1 %v188_v34 }
 0x2da   :  { %v409_v36 = vmul.f32 1.442695, %v408_v35 }
 0x2dc   :  { %1843 = vpow2.f32 %v409_v36 }
 0x2de   :  { %v2106_v37 = vpop.eup %1841 }
 0x2df   :  { %v300_v38 = vsel %vm134_vm2, %v2106_v37, 0.0  ;;  %v518_v44 = vpop.xlane.xlu0 %517 }
 0x2e0   :  { %301 = vadd.xlane.f32.xlu0 %v300_v38  ;;  %v519_v46 = vsub.f32 %v2081_v56, %v518_v44 }
 0x2e2   :  { %v520_v47 = vmul.f32 1.442695, %v519_v46 }
 0x2e4   :  { %1845 = vpow2.f32 %v520_v47 }
 0x2e6   :  { %v2110_v39 = vpop.eup %1843 }
 0x2e7   :  { %v411_v40 = vsel %vm134_vm2, %v2110_v39, 0.0  ;;  %v646_v41 = vpop.xlane.xlu1 %645 }
 0x2e8   :  { %412 = vadd.xlane.f32.xlu1 %v411_v40  ;;  %v647_v48 = vsub.f32 %v2085_v62, %v646_v41 }
 0x2ea   :  { %v648_v51 = vmul.f32 1.442695, %v647_v48 }
 0x2ec   :  { %1847 = vpow2.f32 %v648_v51 }
 0x2ee   :  { %v1846_v54 = vpop.eup %1845 }
 0x2ef   :  { %v757_v49 = vpop.xlane.xlu0 %756  ;;  %v522_v55 = vsel %vm134_vm2, %v1846_v54, 0.0 }
 0x2f0   :  { %v758_v50 = vsub.f32 %v2089_v7, %v757_v49 }
 0x2f3   :  { %v307_v62 = vpop.permute.xlu0 %306 }
 0x2f4   :  { %v312_v13 = vsel %vm199_vm3, %v307_v62, 0 }
 0x2f6   :  { %417 = vrot.lane.b32.xlu0 %v2018_v11, %s1890_s29  ;;  %v2124_v57 = vpop.eup %1847 }
 0x2f7   :  { %v868_v42 = vpop.xlane.xlu1 %867  ;;  %v650_v58 = vsel %vm134_vm2, %v2124_v57, 0.0 }
 0x2f8   :  { %v869_v52 = vsub.f32 %v865_v15, %v868_v42 }
 0x2f9   :  { %528 = vrot.lane.b32.xlu1 %v2018_v11, %s1891_s1  ;;  %v759_v11 = vmul.f32 1.442695, %v758_v50 }
 0x2fa   :  { %v870_v53 = vmul.f32 1.442695, %v869_v52 }
 0x2fb   :  { %v195_v43 = vpop.permute.xlu1 %194  ;;  %1849 = vpow2.f32 %v759_v11 }
 0x2fc   :  { %v201_v45 = vsel %vm199_vm3, %v195_v43, 0  ;;  %1851 = vpow2.f32 %v870_v53 }
 0x2fd   :  { %1668 = vmatpush3.bf16.msra.mxu0 %v201_v45 }
 0x2fe   :  { %1679 = vmatprep.subr.bf16.mxu0 %v1879_v0 }
 0x305   :  { %v2126_v56 = vpop.eup %1849 }
 0x306   :  { %v2130_v59 = vpop.eup %1851  ;;  %v761_v60 = vsel %vm134_vm2, %v2126_v56, 0.0 }
 0x307   :  { %v872_v61 = vsel %vm134_vm2, %v2130_v59, 0.0 }
 0x315   :  { %523 = vadd.xlane.f32.xlu0 %v522_v55 }
 0x319   :  { %651 = vadd.xlane.f32.xlu0 %v650_v58 }
 0x31d   :  { %762 = vadd.xlane.f32.xlu1 %v761_v60  ;;  %873 = vadd.xlane.f32.xlu0 %v872_v61 }
 0x324   :  { %v979_v63 = vpop.xlane.xlu0 %978 }
 0x325   :  { %v980_v1 = vsub.f32 %v2098_v24, %v979_v63 }
 0x327   :  { %v981_v2 = vmul.f32 1.442695, %v980_v1 }
 0x329   :  { %1853 = vpow2.f32 %v981_v2 }
 0x32e   :  { %767 = vrot.lane.b32.xlu1 %v2026_v14, %s1888_s27 }
 0x332   :  { %878 = vrot.lane.b32.xlu1 %v2026_v14, %s1890_s29 }
 0x333   :  { %v2141_v5 = vpop.eup %1853 }
 0x334   :  { %v983_v6 = vsel %vm134_vm2, %v2141_v5, 0.0 }
 0x335   :  { %984 = vadd.xlane.f32.xlu0 %v983_v6 }
 0x336   :  { %989 = vrot.lane.b32.xlu1 %v2026_v14, %s1891_s1 }
 0x34b   :  { %656 = vrot.lane.b32.xlu0 %v2026_v14, %s1889_s28 }
 0x365   :  { %v190_v7 = vpop.xlane.xlu1 %189 }
 0x366   :  { %1855 = vrcp.f32 %v190_v7 }
 0x36d   :  { %v302_v8 = vpop.xlane.xlu0 %301 }
 0x36e   :  { %1857 = vrcp.f32 %v302_v8 }
 0x370   :  { %v1856_v9 = vpop.eup %1855 }
 0x371   :  { %v192_v10 = vmul.f32 %v1856_v9, %v2102_v32  ;;  %v418_v17 = vpop.permute.xlu0 %417 }
 0x372   :  { %v423_v19 = vsel %vm199_vm3, %v418_v17, 0 }
 0x373   :  { %v193_v12 = vpack.c.bf16 %v192_v10, %v192_v10 }
 0x375   :  { %1670 = vmatmul.mubr.msk.bf16.vlgmr.msra.gmra.mrb[4].mxu0 %vm134_vm2, %v193_v12  ;;  %v413_v15 = vpop.xlane.xlu1 %412 }
 0x376   :  { %1680 = vmatpush3.bf16.msra.mxu0 %v312_v13  ;;  %1859 = vrcp.f32 %v413_v15  ;;  %1681 = vmatprep.mubr.msk.bf16.mxu0 %vm1880_vm0, %v1879_v0 }
 0x377   :  { %1691 = vmatprep.subr.bf16.mxu0 %v1879_v0 }
 0x378   :  { %v1858_v14 = vpop.eup %1857 }
 0x379   :  { %v304_v16 = vmul.f32 %v1858_v14, %v2106_v37  ;;  %v529_v22 = vpop.permute.xlu1 %528  ;;  %v1829_v14 = vld [vmem:[%s2307_s3] sm:$0xff]  }
 0x37a   :  { %v534_v24 = vsel %vm199_vm3, %v529_v22, 0  ;;  %1758 = vmatpush3.bf16.msra.mxu1 %v1829_v14 }
 0x37b   :  { %v305_v18 = vpack.c.bf16 %v304_v16, %v304_v16  ;;  %1759 = vmatprep.subr.bf16.mxu1 %v1879_v0 }
 0x37d   :  { %1682 = vmatmul.mubr.msk.bf16.vlgmr.msra.gmra.mrb[8].mxu0 %vm134_vm2, %v305_v18  ;;  %v1830_v18 = vld [vmem:[%s2307_s3 + $0x8] sm:$0xff]  }
 0x37e   :  { %1692 = vmatpush3.bf16.msra.mxu0 %v423_v19  ;;  %1693 = vmatprep.mubr.msk.bf16.mxu0 %vm1880_vm0, %v1879_v0 }
 0x37f   :  { %1703 = vmatprep.subr.bf16.mxu0 %v1879_v0  ;;  %1760 = vmatpush3.bf16.msra.mxu1 %v1830_v18 }
 0x380   :  { %v1860_v20 = vpop.eup %1859  ;;  %1773 = vmatprep.subr.bf16.mxu1 %v1879_v0 }
 0x381   :  { %v415_v21 = vmul.f32 %v1860_v20, %v2110_v39 }
 0x383   :  { %v416_v23 = vpack.c.bf16 %v415_v21, %v415_v21 }
 0x385   :  { %1694 = vmatmul.mubr.msk.bf16.vlgmr.msra.gmra.mrb[12].mxu0 %vm134_vm2, %v416_v23 }
 0x386   :  { %1704 = vmatpush3.bf16.msra.mxu0 %v534_v24  ;;  %1705 = vmatprep.mubr.msk.bf16.mxu0 %vm1880_vm0, %v1879_v0 }
 0x387   :  { %1715 = vmatprep.subr.bf16.mxu0 %v1879_v0 }
 0x3a2   :  { %v524_v25 = vpop.xlane.xlu0 %523 }
 0x3a3   :  { %1861 = vrcp.f32 %v524_v25 }
 0x3a6   :  { %v652_v29 = vpop.xlane.xlu0 %651 }
 0x3a7   :  { %1863 = vrcp.f32 %v652_v29 }
 0x3aa   :  { %v763_v30 = vpop.xlane.xlu1 %762  ;;  %v874_v31 = vpop.xlane.xlu0 %873 }
 0x3ab   :  { %1865 = vrcp.f32 %v763_v30 }
 0x3ac   :  { %1867 = vrcp.f32 %v874_v31 }
 0x3ad   :  { %v1862_v26 = vpop.eup %1861 }
 0x3ae   :  { %v526_v27 = vmul.f32 %v1862_v26, %v1846_v54  ;;  %v768_v37 = vpop.permute.xlu1 %767 }
 0x3af   :  { %v773_v40 = vsel %vm199_vm3, %v768_v37, 0 }
 0x3b0   :  { %v527_v28 = vpack.c.bf16 %v526_v27, %v526_v27 }
 0x3b1   :  { %v1864_v32 = vpop.eup %1863 }
 0x3b2   :  { %1706 = vmatmul.mubr.msk.bf16.vlgmr.msra.gmra.mrb[16].mxu0 %vm134_vm2, %v527_v28  ;;  %v654_v34 = vmul.f32 %v1864_v32, %v2124_v57  ;;  %v879_v42 = vpop.permute.xlu1 %878 }
 0x3b3   :  { %1717 = vmatprep.mubr.msk.bf16.mxu0 %vm1880_vm0, %v1879_v0  ;;  %v884_v45 = vsel %vm199_vm3, %v879_v42, 0 }
 0x3b4   :  { %v655_v38 = vpack.c.bf16 %v654_v34, %v654_v34 }
 0x3b5   :  { %v1866_v39 = vpop.eup %1865 }
 0x3b6   :  { %v765_v41 = vmul.f32 %v1866_v39, %v2126_v56  ;;  %v1868_v44 = vpop.eup %1867  ;;  %v990_v47 = vpop.permute.xlu1 %989 }
 0x3b7   :  { %v876_v46 = vmul.f32 %v1868_v44, %v2130_v59  ;;  %v995_v50 = vsel %vm199_vm3, %v990_v47, 0 }
 0x3b8   :  { %v766_v43 = vpack.c.bf16 %v765_v41, %v765_v41 }
 0x3b9   :  { %v877_v48 = vpack.c.bf16 %v876_v46, %v876_v46 }
 0x3c2   :  { %v985_v33 = vpop.xlane.xlu0 %984 }
 0x3c3   :  { %1869 = vrcp.f32 %v985_v33 }
 0x3c6   :  { %v657_v35 = vpop.permute.xlu0 %656 }
 0x3c7   :  { %v662_v36 = vsel %vm199_vm3, %v657_v35, 0 }
 0x3c8   :  { %1716 = vmatpush3.bf16.msra.mxu0 %v662_v36 }
 0x3c9   :  { %1727 = vmatprep.subr.bf16.mxu0 %v1879_v0 }
 0x3cb   :  { %1718 = vmatmul.mubr.msk.bf16.vlgmr.msra.gmra.mrb[20].mxu0 %vm134_vm2, %v655_v38 }
 0x3cc   :  { %1728 = vmatpush3.bf16.msra.mxu0 %v773_v40  ;;  %1729 = vmatprep.mubr.msk.bf16.mxu0 %vm1880_vm0, %v1879_v0 }
 0x3cd   :  { %1739 = vmatprep.subr.bf16.mxu0 %v1879_v0  ;;  %v1870_v49 = vpop.eup %1869 }
 0x3ce   :  { %v987_v51 = vmul.f32 %v1870_v49, %v2141_v5 }
 0x3d0   :  { %v988_v52 = vpack.c.bf16 %v987_v51, %v987_v51 }
 0x3d3   :  { %1730 = vmatmul.mubr.msk.bf16.vlgmr.msra.gmra.mrb[24].mxu0 %vm134_vm2, %v766_v43 }
 0x3d4   :  { %1740 = vmatpush3.bf16.msra.mxu0 %v884_v45  ;;  %1741 = vmatprep.mubr.msk.bf16.mxu0 %vm1880_vm0, %v1879_v0  ;;  %v1581_v45 = vld [vmem:[%s2308_s4] ss:$0 sm:$0xff] }
 0x3d5   :  { %1751 = vmatprep.subr.bf16.mxu0 %v1879_v0 }
 0x3db   :  { %1742 = vmatmul.mubr.msk.bf16.vlgmr.msra.gmra.mrb[28].mxu0 %vm134_vm2, %v877_v48 }
 0x3dc   :  { %1752 = vmatpush3.bf16.msra.mxu0 %v995_v50  ;;  %1753 = vmatprep.mubr.msk.bf16.mxu0 %vm1880_vm0, %v1879_v0 }
 0x3dd   :  { %1765 = vmatprep.subr.bf16.mxu0 %v1879_v0 }
 0x3e3   :  { %1754 = vmatmul.mubr.msk.bf16.vlgmr.msra.gmra.mrb[32].mxu0 %vm134_vm2, %v988_v52 }
 0x3e4   :  { %1769 = vmatprep.mubr.msk.bf16.mxu0 %vm1880_vm0, %v1879_v0 }
 0x448   :  { %v237_v11 = vpop.f32.mrb[4].mxu0 }
 0x449   :  { %v1671_v53 = vpop.f32.mrb[5].mxu0 }
 0x44a   :  { %v240_v54 = vpop.f32.mrb[6].mxu0 }
 0x44b   :  { %v1672_v55 = vpop.f32.mrb[7].mxu0 }
 0x450   :  { %v348_v57 = vpop.f32.mrb[8].mxu0 }
 0x451   :  { %v1683_v56 = vpop.f32.mrb[9].mxu0 }
 0x452   :  { %v351_v58 = vpop.f32.mrb[10].mxu0 }
 0x453   :  { %v1684_v59 = vpop.f32.mrb[11].mxu0 }
 0x458   :  { %v459_v60 = vpop.f32.mrb[12].mxu0 }
 0x459   :  { %v1695_v61 = vpop.f32.mrb[13].mxu0 }
 0x45a   :  { %v462_v62 = vpop.f32.mrb[14].mxu0 }
 0x45b   :  { %v1696_v63 = vpop.f32.mrb[15].mxu0 }
 0x485   :  { %v570_v1 = vpop.f32.mrb[16].mxu0 }
 0x486   :  { %v1707_v2 = vpop.f32.mrb[17].mxu0 }
 0x487   :  { %v573_v5 = vpop.f32.mrb[18].mxu0  ;;  %v1833_v2 = vld [vmem:[%s2310_s9] sm:$0xff]  }
 0x488   :  { %v1708_v6 = vpop.f32.mrb[19].mxu0  ;;  %v1834_v5 = vld [vmem:[%s2310_s9 + $0x8] sm:$0xff]  }
 0x49e   :  { %v698_v7 = vpop.f32.mrb[20].mxu0 }
 0x49f   :  { %v1719_v8 = vpop.f32.mrb[21].mxu0 }
 0x4a0   :  { %v701_v9 = vpop.f32.mrb[22].mxu0 }
 0x4a1   :  { %v1720_v10 = vpop.f32.mrb[23].mxu0 }
 0x4a6   :  { %v809_v12 = vpop.f32.mrb[24].mxu0 }
 0x4a7   :  { %v1810_v13 = vpack.i.bf16 %v809_v12, %v348_v57  ;;  %v1731_v15 = vpop.f32.mrb[25].mxu0 }
 0x4a8   :  { %v812_v16 = vpop.f32.mrb[26].mxu0  ;;  %v1585_v15 = vld [vmem:[%s2311_s5] ss:$0 sm:$0xff] }
 0x4a9   :  { %1811 = vrot.lane.b32.xlu1 %v1810_v13, %s1892_s19  ;;  %v1732_v17 = vpop.f32.mrb[27].mxu0 }
 0x4ae   :  { %v920_v19 = vpop.f32.mrb[28].mxu0 }
 0x4af   :  { %v1815_v20 = vpack.i.bf16 %v920_v19, %v459_v60  ;;  %v1743_v21 = vpop.f32.mrb[29].mxu0  ;;  %v1586_v19 = vld [vmem:[%s2312_s6] ss:$0 sm:$0xff] }
 0x4b0   :  { %v923_v22 = vpop.f32.mrb[30].mxu0 }
 0x4b1   :  { %1816 = vrot.lane.b32.xlu1 %v1815_v20, %s1893_s21  ;;  %v1744_v23 = vpop.f32.mrb[31].mxu0 }
 0x4b6   :  { %v1031_v24 = vpop.f32.mrb[32].mxu0 }
 0x4b7   :  { %v1820_v25 = vpack.i.bf16 %v1031_v24, %v570_v1  ;;  %v1755_v26 = vpop.f32.mrb[33].mxu0  ;;  %v1832_v1 = vld [vmem:[%s2309_s7 + $0x8] sm:$0xff]   ;;  %v1835_v24 = vld [vmem:[%s2310_s9 + $0x10] sm:$0xff]  }
 0x4b8   :  { %v1034_v27 = vpop.f32.mrb[34].mxu0  ;;  %v1587_v26 = vld [vmem:[%s2313_s8] ss:$0 sm:$0xff] }
 0x4b9   :  { %1821 = vrot.lane.b32.xlu0 %v1820_v25, %s1894_s22  ;;  %v1756_v28 = vpop.f32.mrb[35].mxu0  ;;  %v1836_v25 = vld [vmem:[%s2310_s9 + $0x18] sm:$0xff]  }
 0x51b   :  { %v1812_v29 = vpop.permute.xlu1 %1811 }
 0x51c   :  { %v1814_v31 = vunpack.i.h.bf16 %v1812_v29  ;;  %v1813_v32 = vunpack.i.l.bf16 %v1812_v29 }
 0x51e   :  { %v1049_v36 = vsel %vm134_vm2, %v698_v7, %v1814_v31  ;;  %v588_v37 = vsel %vm134_vm2, %v237_v11, %v1813_v32 }
 0x523   :  { %v1817_v30 = vpop.permute.xlu1 %1816 }
 0x524   :  { %v1819_v33 = vunpack.i.h.bf16 %v1817_v30  ;;  %v1818_v34 = vunpack.i.l.bf16 %v1817_v30 }
 0x526   :  { %v1050_v40 = vsel %vm589_vm4, %v1049_v36, %v1819_v33  ;;  %v590_v41 = vsel %vm589_vm4, %v588_v37, %v1818_v34 }
 0x52b   :  { %v1822_v35 = vpop.permute.xlu0 %1821 }
 0x52c   :  { %v1824_v38 = vunpack.i.h.bf16 %v1822_v35  ;;  %v1823_v39 = vunpack.i.l.bf16 %v1822_v35 }
 0x52e   :  { %v1051_v42 = vsel %vm591_vm5, %v1050_v40, %v1824_v38  ;;  %v592_v43 = vsel %vm591_vm5, %v590_v41, %v1823_v39 }
 0x52f   :  { %v1052_v44 = vpack.c.bf16 %v1051_v42, %v592_v43 }
 0x531   :  { %1762 = vmatmul.mubr.msk.bf16.vlgmr.msra.gmra.mrb[32].mxu1 %vm85_vm1, %v1052_v44 }
 0x532   :  { %1781 = vmatprep.mubr.msk.bf16.mxu1 %vm1880_vm0, %v1879_v0  ;;  %1774 = vmatpush3.bf16.msra.mxu1 %v1833_v2 }
 0x533   :  { %1775 = vmatprep.subr.bf16.mxu1 %v1879_v0 }
 0x536   :  { %1776 = vmatpush3.bf16.msra.mxu1 %v1834_v5 }
 0x537   :  { %1777 = vmatprep.subr.bf16.mxu1 %v1879_v0 }
 0x53a   :  { %1778 = vmatpush3.bf16.msra.mxu1 %v1835_v24 }
 0x53b   :  { %1779 = vmatprep.subr.bf16.mxu1 %v1879_v0 }
 0x53e   :  { %1780 = vmatpush3.bf16.msra.mxu1 %v1836_v25 }
 0x604   :  { %v1113_v46 = vpop.f32.mrb[32].mxu1 }
 0x605   :  { %v1114_v47 = vadd.f32 %v1581_v45, %v1113_v46  ;;  %v1763_v48 = vpop.f32.mrb[33].mxu1 }
 0x606   :  { %v1116_v49 = vpop.f32.mrb[34].mxu1 }
 0x607   :  { %v1117_v50 = vadd.f32 %v1581_v45, %v1116_v49  ;;  %v1764_v51 = vpop.f32.mrb[35].mxu1  ;;  %v1120_v52 = vadd.f32 %v1114_v47, %v2001_v3 }
 0x609   :  { %v1124_v11 = vsel %vm85_vm1, %v1120_v52, 0.0  ;;  %v1121_v53 = vadd.f32 %v1117_v50, %v2006_v4  ;;  %v1831_v4 = vld [vmem:[%s2309_s7] sm:$0xff]  }
 0x60a   :  { %1125 = vadd.xlane.f32.xlu1 %v1124_v11  ;;  %1766 = vmatpush3.bf16.msra.mxu0 %v1831_v4  ;;  %v1598_v4 = vld [vmem:[%s2316_s12] ss:$0 sm:$0xff] }
 0x60b   :  { %v1127_v54 = vsel %vm85_vm1, %v1121_v53, 0.0  ;;  %1767 = vmatprep.subr.bf16.mxu0 %v1879_v0  ;;  %v1591_v0 = vld [vmem:[%s2314_s10] ss:$0 sm:$0xff] }
 0x60c   :  { %1128 = vadd.xlane.f32.xlu0 %v1127_v54 }
 0x60e   :  { %1768 = vmatpush3.bf16.msra.mxu0 %v1832_v1 }
 0x697   :  { %v1126_v55 = vpop.xlane.xlu1 %1125 }
 0x698   :  { %v1131_v57 = vmul.f32 0.03125, %v1126_v55 }
 0x699   :  { %v1129_v56 = vpop.xlane.xlu0 %1128 }
 0x69a   :  { %v1133_v58 = vsub.f32 %v1120_v52, %v1131_v57  ;;  %v1132_v59 = vmul.f32 0.03125, %v1129_v56 }
 0x69c   :  { %v1134_v60 = vsub.f32 %v1121_v53, %v1132_v59  ;;  %v1135_v61 = vmul.f32 %v1133_v58, %v1133_v58 }
 0x69e   :  { %v1137_v62 = vsel %vm85_vm1, %v1135_v61, 0.0  ;;  %v1136_v63 = vmul.f32 %v1134_v60, %v1134_v60 }
 0x69f   :  { %1138 = vadd.xlane.f32.xlu0 %v1137_v62  ;;  %v1597_v62 = vld [vmem:[%s2315_s11] ss:$0 sm:$0xff] }
 0x6a0   :  { %v1140_v3 = vsel %vm85_vm1, %v1136_v63, 0.0 }
 0x6a1   :  { %1141 = vadd.xlane.f32.xlu1 %v1140_v3 }
 0x72c   :  { %v1139_v6 = vpop.xlane.xlu0 %1138 }
 0x72d   :  { %v1143_v7 = vmul.f32 0.03125, %v1139_v6 }
 0x72e   :  { %v1142_v8 = vpop.xlane.xlu1 %1141 }
 0x72f   :  { %v1145_v9 = vadd.f32 1e-05, %v1143_v7  ;;  %v1144_v10 = vmul.f32 0.03125, %v1142_v8 }
 0x731   :  { %1871 = vrsqrt.f32 %v1145_v9  ;;  %v1146_v12 = vadd.f32 1e-05, %v1144_v10  ;;  %v1837_v10 = vld [vmem:[%s2317_s13] sm:$0xff]  }
 0x733   :  { %1873 = vrsqrt.f32 %v1146_v12  ;;  %v1895_v12 = vmov 0  }
 0x734   :  { %1825 = vset.pattern.permute.xlu1 %v1895_v12 }
 0x73b   :  { %v1872_v13 = vpop.eup %1871 }
 0x73c   :  { %v1149_v14 = vmul.f32 %v1872_v13, %v1133_v58  ;;  %v1410_v13 = vld [vmem:[%s2318_s14] sm:$0xff] }
 0x73d   :  { %v1874_v16 = vpop.eup %1873 }
 0x73e   :  { %v1157_v17 = vmul.f32 %v1585_v15, %v1149_v14  ;;  %v1150_v18 = vmul.f32 %v1874_v16, %v1134_v60  ;;  %v1411_v14 = vld [vmem:[%s2318_s14 + $0x8] sm:$0xff]  ;;  %v1412_v16 = vld [vmem:[%s2318_s14 + $0x10] sm:$0xff] }
 0x740   :  { %v1158_v20 = vmul.f32 %v1585_v15, %v1150_v18  ;;  %v1165_v21 = vadd.f32 %v1586_v19, %v1157_v17  ;;  %v22_v15 = vstv %s2319_s16  ;;  %v1413_v17 = vld [vmem:[%s2318_s14 + $0x18] sm:$0xff]  ;;  %v1503_v18 = vld [vmem:[%s2320_s15] sm:$0xff] }
 0x741   :  { %23 = vst [vmem:[#allocation2] sm:$0x1] %v22_v15 }
 0x742   :  { %v1166_v22 = vadd.f32 %v1586_v19, %v1158_v20  ;;  %v1504_v19 = vld [vmem:[%s2320_s15 + $0x8] sm:$0xff]  ;;  %v1505_v20 = vld [vmem:[%s2320_s15 + $0x10] sm:$0xff] }
 0x744   :  { %v1167_v23 = vpack.c.bf16 %v1166_v22, %v1165_v21 }
 0x746   :  { %1770 = vmatmul.mubr.msk.bf16.vlgmr.msra.gmra.mrb[36].mxu0 %vm85_vm1, %v1167_v23 }
 0x747   :  { %1789 = vmatprep.mubr.msk.bf16.mxu0 %vm85_vm1, %v1837_v10 }
 0x819   :  { %v1228_v27 = vpop.f32.mrb[36].mxu0 }
 0x81a   :  { %v1229_v28 = vadd.f32 %v1587_v26, %v1228_v27  ;;  %v1771_v29 = vpop.f32.mrb[37].mxu0 }
 0x81b   :  { %v1231_v30 = vpop.f32.mrb[38].mxu0  ;;  %v1838_v29 = vld [vmem:[%s2317_s13 + $0x8] sm:$0xff]  }
 0x81c   :  { %v1232_v31 = vadd.f32 %v1587_v26, %v1231_v30  ;;  %v1772_v32 = vpop.f32.mrb[39].mxu0  ;;  %v1235_v33 = vmax.f32 %v1229_v28, 0.0 }
 0x81e   :  { %v1236_v34 = vmax.f32 %v1232_v31, 0.0 }
 0x820   :  { %v1237_v35 = vpack.c.bf16 %v1236_v34, %v1235_v33 }
 0x822   :  { %1782 = vmatmul.mubr.msk.bf16.vlgmr.msra.gmra.mrb[36].mxu1 %vm1277_vm6, %v1237_v35 }
 0x8f5   :  { %v1315_v36 = vpop.f32.mrb[36].mxu1 }
 0x8f6   :  { %v1316_v37 = vadd.f32 %v1591_v0, %v1315_v36  ;;  %v1783_v38 = vpop.f32.mrb[37].mxu1 }
 0x8f7   :  { %v1318_v39 = vpop.f32.mrb[38].mxu1 }
 0x8f8   :  { %v1319_v40 = vadd.f32 %v1591_v0, %v1318_v39  ;;  %v1784_v41 = vpop.f32.mrb[39].mxu1  ;;  %v1322_v42 = vadd.f32 %v1316_v37, %v1165_v21  ;;  %v1506_v21 = vld [vmem:[%s2320_s15 + $0x18] sm:$0xff] }
 0x8fa   :  { %v1326_v43 = vsel %vm85_vm1, %v1322_v42, 0.0  ;;  %v1323_v44 = vadd.f32 %v1319_v40, %v1166_v22  ;;  %v1544_v22 = vld [vmem:[#allocation2] sm:$0x1] }
 0x8fb   :  { %1327 = vadd.xlane.f32.xlu0 %v1326_v43 }
 0x8fc   :  { %v1329_v45 = vsel %vm85_vm1, %v1323_v44, 0.0 }
 0x8fd   :  { %1330 = vadd.xlane.f32.xlu1 %v1329_v45 }
 0x988   :  { %v1328_v46 = vpop.xlane.xlu0 %1327 }
 0x989   :  { %v1332_v47 = vmul.f32 0.03125, %v1328_v46 }
 0x98a   :  { %v1331_v48 = vpop.xlane.xlu1 %1330 }
 0x98b   :  { %v1334_v49 = vsub.f32 %v1322_v42, %v1332_v47  ;;  %v1333_v50 = vmul.f32 0.03125, %v1331_v48 }
 0x98d   :  { %v1335_v51 = vsub.f32 %v1323_v44, %v1333_v50  ;;  %v1336_v52 = vmul.f32 %v1334_v49, %v1334_v49 }
 0x98f   :  { %v1338_v11 = vsel %vm85_vm1, %v1336_v52, 0.0  ;;  %v1337_v53 = vmul.f32 %v1335_v51, %v1335_v51 }
 0x990   :  { %1339 = vadd.xlane.f32.xlu0 %v1338_v11 }
 0x991   :  { %v1341_v54 = vsel %vm85_vm1, %v1337_v53, 0.0 }
 0x992   :  { %1342 = vadd.xlane.f32.xlu1 %v1341_v54 }
 0x9a3   :  { %1416 = vperm.xlu1 %1825, %v1410_v13  }
 0x9a7   :  { %1421 = vperm.xlu1 %1825, %v1411_v14  }
 0x9ab   :  { %1426 = vperm.xlu1 %1825, %v1412_v16  }
 0x9af   :  { %1431 = vperm.xlu1 %1825, %v1413_v17  }
 0x9b3   :  { %1509 = vperm.xlu1 %1825, %v1503_v18  }
 0x9b7   :  { %1514 = vperm.xlu1 %1825, %v1504_v19  }
 0x9bb   :  { %1519 = vperm.xlu1 %1825, %v1505_v20  }
 0x9bf   :  { %1524 = vperm.xlu1 %1825, %v1506_v21  }
 0xa1d   :  { %v1340_v55 = vpop.xlane.xlu0 %1339 }
 0xa1e   :  { %v1344_v57 = vmul.f32 0.03125, %v1340_v55 }
 0xa1f   :  { %v1343_v56 = vpop.xlane.xlu1 %1342 }
 0xa20   :  { %v1346_v58 = vadd.f32 1e-05, %v1344_v57  ;;  %v1345_v59 = vmul.f32 0.03125, %v1343_v56  ;;  %v1550_v56 = vlaneseq }
 0xa22   :  { %1875 = vrsqrt.f32 %v1346_v58  ;;  %v1347_v60 = vadd.f32 1e-05, %v1345_v59 }
 0xa23   :  { %v1417_v30 = vpop.permute.xlu1 %1416 }
 0xa24   :  { %1877 = vrsqrt.f32 %v1347_v60  ;;  %v1551_v60 = vshrl.u32 %v1550_v56, 7 }
 0xa27   :  { %v1422_v31 = vpop.permute.xlu1 %1421 }
 0xa2b   :  { %v1427_v32 = vpop.permute.xlu1 %1426 }
 0xa2c   :  { %v1876_v61 = vpop.eup %1875 }
 0xa2d   :  { %v1350_v63 = vmul.f32 %v1876_v61, %v1334_v49 }
 0xa2e   :  { %v1878_v3 = vpop.eup %1877 }
 0xa2f   :  { %v1351_v1 = vmul.f32 %v1878_v3, %v1335_v51  ;;  %v1358_v2 = vmul.f32 %v1597_v62, %v1350_v63  ;;  %v1432_v33 = vpop.permute.xlu1 %1431  ;;  %v1552_v63 = vsub.s32 0, %v1551_v60 }
 0xa31   :  { %v1359_v5 = vmul.f32 %v1597_v62, %v1351_v1  ;;  %v1366_v6 = vadd.f32 %v1598_v4, %v1358_v2 }
 0xa33   :  { %v1367_v7 = vadd.f32 %v1598_v4, %v1359_v5  ;;  %v1369_v8 = vrot.slane %v1366_v6, 4  ;;  %v1510_v34 = vpop.permute.xlu1 %1509 }
 0xa35   :  { %v1371_v9 = vsel %vm199_vm3, %v1369_v8, %v1367_v7 }
 0xa36   :  { %1372 = vxpose.xlu0.b32.start.end [1/1] (short) (narrow) %v1371_v9, 32 }
 0xa37   :  { %v1515_v35 = vpop.permute.xlu1 %1514 }
 0xa3b   :  { %v1520_v40 = vpop.permute.xlu1 %1519 }
 0xa3f   :  { %v1525_v51 = vpop.permute.xlu1 %1524 }
 0xa5f   :  { %1826 = vset.pattern.permute.xlu0 %v1895_v12 }
 0xa6b   :  { %1547 = vperm.xlu0 %1826, %v1544_v22  }
 0xab6   :  { %v1388_v23 = vpop.trf.xlu0 }
 0xaba   :  { %v1389_v24 = vpop.trf.xlu0 }
 0xabb   :  { %v1404_v25 = vpack.c.bf16 %v1389_v24, %v1388_v23 }
 0xabd   :  { %1785 = vmatprep.subr.bf16.mxu0 %v1404_v25 }
 0xabe   :  { %1786 = vmatpush3.bf16.msra.mxu0 %v1404_v25  ;;  %v1390_v26 = vpop.trf.xlu0 }
 0xac2   :  { %v1391_v27 = vpop.trf.xlu0 }
 0xac3   :  { %v1405_v28 = vpack.c.bf16 %v1391_v27, %v1390_v26 }
 0xac5   :  { %1787 = vmatprep.subr.bf16.mxu0 %v1405_v28 }
 0xac6   :  { %1788 = vmatpush3.bf16.msra.mxu0 %v1405_v28 }
 0xac9   :  { %1790 = vmatmul.mubr.msk.bf16.vlgmr.msra.gmra.mrb[40].mxu0 %vm85_vm1, %v1838_v29 }
 0xaea   :  { %v1548_v4 = vpop.permute.xlu0 %1547 }
 0xaeb   :  { %v1553_v5 = vrot.slane %v1548_v4, %v1552_v63 }
 0xb9c   :  { %v1791_v0 = vpop.f32.mrb[40].mxu0 }
 0xb9d   :  { %v1493_v36 = vadd.f32 %v1791_v0, %v1427_v32  ;;  %v1484_v37 = vpop.f32.mrb[41].mxu0 }
 0xb9e   :  { %v1485_v38 = vadd.f32 %v1484_v37, %v1417_v30  ;;  %v1792_v39 = vpop.f32.mrb[42].mxu0 }
 0xb9f   :  { %v1496_v41 = vadd.f32 %v1792_v39, %v1432_v33  ;;  %v1487_v42 = vpop.f32.mrb[43].mxu0  ;;  %v1501_v43 = vmax.f32 %v1493_v36, 0.0 }
 0xba0   :  { %v1499_v44 = vmax.f32 %v1485_v38, 0.0  ;;  %v1488_v45 = vadd.f32 %v1487_v42, %v1422_v31 }
 0xba1   :  { %v1502_v47 = vmax.f32 %v1496_v41, 0.0  ;;  %v1529_v49 = vmul.f32 %v1520_v40, %v1501_v43 }
 0xba2   :  { %v1527_v46 = vmul.f32 %v1510_v34, %v1499_v44  ;;  %v1500_v48 = vmax.f32 %v1488_v45, 0.0 }
 0xba3   :  { %v1530_v11 = vmul.f32 %v1525_v51, %v1502_v47  ;;  %v1534_v55 = vsel %vm134_vm2, %v1529_v49, 0.0 }
 0xba4   :  { %v1528_v50 = vmul.f32 %v1515_v35, %v1500_v48  ;;  %v1531_v52 = vsel %vm134_vm2, %v1527_v46, 0.0 }
 0xba5   :  { %v1536_v58 = vsel %vm134_vm2, %v1530_v11, 0.0 }
 0xba6   :  { %v1532_v53 = vsel %vm134_vm2, %v1528_v50, 0.0 }
 0xba7   :  { %v1533_v54 = vadd.f32 %v1532_v53, %v1531_v52 }
 0xba9   :  { %v1535_v57 = vadd.f32 %v1534_v55, %v1533_v54 }
 0xbab   :  { %v1537_v59 = vadd.f32 %v1536_v58, %v1535_v57 }
 0xbad   :  { %v1538_v61 = vrot.slane %v1537_v59, 4 }
 0xbaf   :  { %v1539_v62 = vadd.f32 %v1538_v61, %v1537_v59 }
 0xbb1   :  { %v1540_v3 = vrot.slane %v1539_v62, 2 }
 0xbb3   :  { %v1541_v1 = vadd.f32 %v1540_v3, %v1539_v62 }
 0xbb5   :  { %v1542_v2 = vrot.slane %v1541_v1, 1 }
 0xbb7   :  { %v1543_v6 = vadd.f32 %v1542_v2, %v1541_v1 }
 0xbb9   :  { %v1554_v7 = vadd.f32 %v1553_v5, %v1543_v6 }
 0xbbb   :  { %1556 = vst.msk [vmem:[%s2321_s17] sm:$0x1] %vm1555_vm7, %v1554_v7 }

// kernel: model_forward.1
= control target key start
LH: loop header
LB: loop body
LE: loop exit
PB: predicated region body
PF: predicated region fallthrough
CT: control target
= control target key end

     0   :  { %v1879_v0 = vmov 0.0   ;;  %vm1880_vm0 = vmmov 0   ;;  %vm85_vm1 = vcmask 261120   ;;  %s1881_s21 = smov 120   ;;  %s1882_s22 = smov 96   ;;  %vm134_vm2 = vcmask 64512   ;;  %s2304_s1 = inlined_call_operand.vmem [shape: bf16[32,96], index: 1, kind: input, shape index: {}]   ;;  %s2305_s0 = inlined_call_operand.vmem [shape: f32[2,8,32], index: 0, kind: input, shape index: {}]   ;;  %s2306_s2 = inlined_call_operand.vmem [shape: f32[1,96], index: 2, kind: input, shape index: {}]   ;;  %s2307_s3 = inlined_call_operand.vmem [shape: bf16[32,32], index: 3, kind: input, shape index: {}]   ;;  %s2308_s4 = inlined_call_operand.vmem [shape: f32[1,32], index: 4, kind: input, shape index: {}]   ;;  %s2309_s7 = inlined_call_operand.vmem [shape: bf16[32,64], index: 7, kind: input, shape index: {}]   ;;  %s2310_s9 = inlined_call_operand.vmem [shape: bf16[64,32], index: 9, kind: input, shape index: {}]   ;;  %s2311_s5 = inlined_call_operand.vmem [shape: f32[1,32], index: 5, kind: input, shape index: {}]   ;;  %s2312_s6 = inlined_call_operand.vmem [shape: f32[1,32], index: 6, kind: input, shape index: {}]   ;;  %s2313_s8 = inlined_call_operand.vmem [shape: f32[1,64], index: 8, kind: input, shape index: {}]   ;;  %s2314_s10 = inlined_call_operand.vmem [shape: f32[1,32], index: 10, kind: input, shape index: {}]   ;;  %s2315_s11 = inlined_call_operand.vmem [shape: f32[1,32], index: 11, kind: input, shape index: {}]   ;;  %s2316_s12 = inlined_call_operand.vmem [shape: f32[1,32], index: 12, kind: input, shape index: {}]   ;;  %s2317_s13 = inlined_call_operand.vmem [shape: bf16[32,32], index: 13, kind: input, shape index: {}]   ;;  %s2318_s14 = inlined_call_operand.vmem [shape: f32[32,1], index: 14, kind: input, shape index: {}]   ;;  %s2319_s16 = inlined_call_operand.<no memory space> [shape: f32[1,1], index: 16, kind: input, shape index: {}]   ;;  %s2320_s15 = inlined_call_operand.vmem [shape: f32[32,1], index: 15, kind: input, shape index: {}]   ;;  %s2321_s17 = inlined_call_operand.vmem [shape: f32[1,8], index: 17, kind: output, shape index: {}]  }
   0x1   :  { %2324 = sst [smem:[#allocation3_spill]] %s2304_s1  ;;  %1653 = vmatprep.subr.bf16.mxu0 %v1879_v0  ;;  %1657 = vmatprep.mubr.msk.bf16.mxu0 %vm1880_vm0, %v1879_v0  ;;  %v1561_v6 = vld [vmem:[%s2306_s2] ss:$0 sm:$0xff]  ;;  %s1883_s23 = smov 80   ;;  %vm199_vm3 = vcmask 1043456   ;;  %vm589_vm4 = vcmask 130048  }
   0x2   :  { %2325 = sst [smem:[#allocation4_spill]] %s2305_s0  ;;  %s2326_s26 = sld [smem:[#allocation3_spill]]  ;;  %1661 = vmatprep.subr.bf16.mxu1 %v1879_v0  ;;  %1663 = vmatprep.mubr.msk.bf16.mxu1 %vm1880_vm0, %v1879_v0  ;;  %vm591_vm5 = vcmask 195584   ;;  %vm1277_vm6 = vcmask 523264   ;;  %vm1555_vm7 = vcmask 57344  }
   0x3   :  { %s2327_s30 = sld [smem:[#allocation4_spill]]  ;;  %s1884_s24 = smov 88  }
   0x4   :  { %s1885_s2 = smov 72   ;;  %s1886_s25 = smov 112  }
   0x5   :  { %s1888_s27 = smov 56   ;;  %s1889_s28 = smov 64  }
   0x6   :  { %s1890_s29 = smov 48   ;;  %s1891_s1 = smov 40  }
   0x7   :  { %s1892_s19 = smov 8  }
   0x8   :  { %v1827_v1 = vld [vmem:[%s2326_s26] sm:$0xff]   ;;  %v1828_v2 = vld [vmem:[%s2326_s26 + $0x8] sm:$0xff]   ;;  %s1887_s26 = smov 104  }
   0x9   :  { %1654 = vmatpush3.bf16.msra.mxu0 %v1827_v1  ;;  %v2001_v3 = vld [vmem:[%s2327_s30] sm:$0xff]  ;;  %v2006_v4 = vld [vmem:[%s2327_s30 + $0x8] sm:$0xff] }
   0xa   :  { %1655 = vmatprep.subr.bf16.mxu0 %v1879_v0  ;;  %v61_v5 = vpack.c.bf16 %v2006_v4, %v2001_v3 }
   0xd   :  { %1656 = vmatpush3.bf16.msra.mxu0 %v1828_v2 }
   0xe   :  { %1667 = vmatprep.subr.bf16.mxu0 %v1879_v0 }
  0x10   :  { %1658 = vmatmul.mubr.msk.bf16.vlgmr.msra.gmra.mrb[0].mxu0 %vm85_vm1, %v61_v5 }
  0x11   :  { %1669 = vmatprep.mubr.msk.bf16.mxu0 %vm1880_vm0, %v1879_v0 }
  0xe3   :  { %v123_v7 = vpop.f32.mrb[0].mxu0 }
  0xe4   :  { %v124_v8 = vadd.f32 %v1561_v6, %v123_v7  ;;  %v1659_v9 = vpop.f32.mrb[1].mxu0 }
  0xe5   :  { %v126_v10 = vpop.f32.mrb[2].mxu0 }
  0xe6   :  { %v2018_v11 = vpack.c.bf16 %v124_v8, %v124_v8  ;;  %v1660_v12 = vpop.f32.mrb[3].mxu0  ;;  %v127_v13 = vadd.f32 %v1561_v6, %v126_v10 }
  0xe8   :  { %243 = vrot.lane.b32.xlu1 %v2018_v11, %s1881_s21  ;;  %132 = vrot.lane.b32.xlu0 %v2018_v11, %s1882_s22  ;;  %v2026_v14 = vpack.c.bf16 %v127_v13, %v127_v13 }
  0xec   :  { %356 = vrot.lane.b32.xlu1 %v2018_v11, %s1883_s23  ;;  %245 = vrot.lane.b32.xlu0 %v2018_v11, %s1884_s24 }
  0xf0   :  { %467 = vrot.lane.b32.xlu1 %v2018_v11, %s1885_s2  ;;  %354 = vrot.lane.b32.xlu0 %v2018_v11, %s1886_s25 }
  0xf4   :  { %465 = vrot.lane.b32.xlu0 %v2018_v11, %s1887_s26  ;;  %595 = vrot.lane.b32.xlu1 %v2026_v14, %s1882_s22  ;;  %s1894_s22 = smov 24  }
  0xf8   :  { %706 = vrot.lane.b32.xlu0 %v2026_v14, %s1884_s24  ;;  %704 = vrot.lane.b32.xlu1 %v2026_v14, %s1881_s21  ;;  %s1893_s21 = smov 16  }
  0xfc   :  { %817 = vrot.lane.b32.xlu0 %v2026_v14, %s1883_s23  ;;  %815 = vrot.lane.b32.xlu1 %v2026_v14, %s1886_s25 }
 0x100   :  { %928 = vrot.lane.b32.xlu0 %v2026_v14, %s1885_s2  ;;  %926 = vrot.lane.b32.xlu1 %v2026_v14, %s1887_s26 }
 0x15a   :  { %v133_v15 = vpop.permute.xlu0 %132  ;;  %v244_v18 = vpop.permute.xlu1 %243 }
 0x15b   :  { %v139_v16 = vsel %vm134_vm2, %v133_v15, 0 }
 0x15c   :  { %1662 = vmatpush3.bf16.xpose.msra.mxu1 %v139_v16 }
 0x15d   :  { %1673 = vmatprep.subr.bf16.mxu1 %v1879_v0 }
 0x15e   :  { %v246_v17 = vpop.permute.xlu0 %245  ;;  %v357_v20 = vpop.permute.xlu1 %356 }
 0x15f   :  { %v251_v19 = vsel %vm134_vm2, %v246_v17, 0  ;;  %v362_v21 = vsel %vm134_vm2, %v357_v20, 0 }
 0x162   :  { %v468_v22 = vpop.permute.xlu1 %467  ;;  %v355_v23 = vpop.permute.xlu0 %354 }
 0x163   :  { %1664 = vmatmul.mubr.msk.bf16.vlgmr.msra.gmra.mrb[0].mxu1 %vm134_vm2, %v2018_v11  ;;  %v473_v24 = vsel %vm134_vm2, %v468_v22, 0 }
 0x164   :  { %1674 = vmatpush3.bf16.xpose.msra.mxu1 %v251_v19  ;;  %1675 = vmatprep.mubr.msk.bf16.mxu1 %vm1880_vm0, %v1879_v0 }
 0x165   :  { %1685 = vmatprep.subr.bf16.mxu1 %v1879_v0 }
 0x166   :  { %v596_v25 = vpop.permute.xlu1 %595  ;;  %v466_v26 = vpop.permute.xlu0 %465 }
 0x167   :  { %v601_v27 = vsel %vm134_vm2, %v596_v25, 0 }
 0x16a   :  { %v707_v28 = vpop.permute.xlu0 %706  ;;  %v705_v31 = vpop.permute.xlu1 %704 }
 0x16b   :  { %1676 = vmatmul.mubr.msk.bf16.vlgmr.msra.gmra.mrb[4].mxu1 %vm134_vm2, %v244_v18  ;;  %v712_v29 = vsel %vm134_vm2, %v707_v28, 0 }
 0x16c   :  { %1686 = vmatpush3.bf16.xpose.msra.mxu1 %v362_v21  ;;  %1687 = vmatprep.mubr.msk.bf16.mxu1 %vm1880_vm0, %v1879_v0 }
 0x16d   :  { %1697 = vmatprep.subr.bf16.mxu1 %v1879_v0 }
 0x16e   :  { %v818_v30 = vpop.permute.xlu0 %817  ;;  %v816_v34 = vpop.permute.xlu1 %815 }
 0x16f   :  { %v823_v32 = vsel %vm134_vm2, %v818_v30, 0 }
 0x172   :  { %v929_v33 = vpop.permute.xlu0 %928  ;;  %v927_v36 = vpop.permute.xlu1 %926 }
 0x173   :  { %1688 = vmatmul.mubr.msk.bf16.vlgmr.msra.gmra.mrb[8].mxu1 %vm134_vm2, %v355_v23  ;;  %v934_v35 = vsel %vm134_vm2, %v929_v33, 0 }
 0x174   :  { %1698 = vmatpush3.bf16.xpose.msra.mxu1 %v473_v24  ;;  %1699 = vmatprep.mubr.msk.bf16.mxu1 %vm1880_vm0, %v1879_v0 }
 0x175   :  { %1709 = vmatprep.subr.bf16.mxu1 %v1879_v0 }
 0x17b   :  { %1700 = vmatmul.mubr.msk.bf16.vlgmr.msra.gmra.mrb[12].mxu1 %vm134_vm2, %v466_v26 }
 0x17c   :  { %1710 = vmatpush3.bf16.xpose.msra.mxu1 %v601_v27  ;;  %1711 = vmatprep.mubr.msk.bf16.mxu1 %vm1880_vm0, %v1879_v0 }
 0x17d   :  { %1721 = vmatprep.subr.bf16.mxu1 %v1879_v0 }
 0x183   :  { %1712 = vmatmul.mubr.msk.bf16.vlgmr.msra.gmra.mrb[16].mxu1 %vm134_vm2, %v2026_v14 }
 0x184   :  { %1722 = vmatpush3.bf16.xpose.msra.mxu1 %v712_v29  ;;  %1723 = vmatprep.mubr.msk.bf16.mxu1 %vm1880_vm0, %v1879_v0 }
 0x185   :  { %1733 = vmatprep.subr.bf16.mxu1 %v1879_v0 }
 0x18b   :  { %1724 = vmatmul.mubr.msk.bf16.vlgmr.msra.gmra.mrb[20].mxu1 %vm134_vm2, %v705_v31 }
 0x18c   :  { %1734 = vmatpush3.bf16.xpose.msra.mxu1 %v823_v32  ;;  %1735 = vmatprep.mubr.msk.bf16.mxu1 %vm1880_vm0, %v1879_v0 }
 0x18d   :  { %1745 = vmatprep.subr.bf16.mxu1 %v1879_v0 }
 0x193   :  { %1736 = vmatmul.mubr.msk.bf16.vlgmr.msra.gmra.mrb[24].mxu1 %vm134_vm2, %v816_v34 }
 0x194   :  { %1746 = vmatpush3.bf16.xpose.msra.mxu1 %v934_v35  ;;  %1747 = vmatprep.mubr.msk.bf16.mxu1 %vm1880_vm0, %v1879_v0 }
 0x195   :  { %1757 = vmatprep.subr.bf16.mxu1 %v1879_v0 }
 0x19b   :  { %1748 = vmatmul.mubr.msk.bf16.vlgmr.msra.gmra.mrb[28].mxu1 %vm134_vm2, %v927_v36 }
 0x19c   :  { %1761 = vmatprep.mubr.msk.bf16.mxu1 %vm1880_vm0, %v1879_v0 }
 0x236   :  { %v175_v37 = vpop.f32.mrb[0].mxu1 }
 0x237   :  { %v181_v38 = vmul.f32 0.35355338, %v175_v37  ;;  %v1665_v39 = vpop.f32.mrb[1].mxu1 }
 0x238   :  { %v178_v40 = vpop.f32.mrb[2].mxu1 }
 0x239   :  { %v1666_v41 = vpop.f32.mrb[3].mxu1  ;;  %v182_v42 = vsel %vm134_vm2, %v181_v38, -inf }
 0x23a   :  { %183 = vmax.xlane.f32.xlu0 %v182_v42 }
 0x23e   :  { %v287_v43 = vpop.f32.mrb[4].mxu1 }
 0x23f   :  { %v293_v44 = vmul.f32 0.35355338, %v287_v43  ;;  %v1677_v45 = vpop.f32.mrb[5].mxu1 }
 0x240   :  { %v290_v46 = vpop.f32.mrb[6].mxu1 }
 0x241   :  { %v1678_v47 = vpop.f32.mrb[7].mxu1  ;;  %v294_v48 = vsel %vm134_vm2, %v293_v44, -inf }
 0x242   :  { %295 = vmax.xlane.f32.xlu1 %v294_v48 }
 0x246   :  { %v398_v49 = vpop.f32.mrb[8].mxu1 }
 0x247   :  { %v404_v50 = vmul.f32 0.35355338, %v398_v49  ;;  %v1689_v51 = vpop.f32.mrb[9].mxu1 }
 0x248   :  { %v401_v52 = vpop.f32.mrb[10].mxu1 }
 0x249   :  { %v1690_v53 = vpop.f32.mrb[11].mxu1  ;;  %v405_v54 = vsel %vm134_vm2, %v404_v50, -inf }
 0x24a   :  { %406 = vmax.xlane.f32.xlu0 %v405_v54 }
 0x24e   :  { %v509_v55 = vpop.f32.mrb[12].mxu1 }
 0x24f   :  { %v2081_v56 = vmul.f32 0.35355338, %v509_v55  ;;  %v1701_v57 = vpop.f32.mrb[13].mxu1 }
 0x250   :  { %v512_v58 = vpop.f32.mrb[14].mxu1 }
 0x251   :  { %v1702_v59 = vpop.f32.mrb[15].mxu1  ;;  %v516_v60 = vsel %vm134_vm2, %v2081_v56, -inf }
 0x252   :  { %517 = vmax.xlane.f32.xlu0 %v516_v60 }
 0x256   :  { %v637_v61 = vpop.f32.mrb[16].mxu1 }
 0x257   :  { %v2085_v62 = vmul.f32 0.35355338, %v637_v61  ;;  %v1713_v63 = vpop.f32.mrb[17].mxu1 }
 0x258   :  { %v640_v1 = vpop.f32.mrb[18].mxu1 }
 0x259   :  { %v1714_v2 = vpop.f32.mrb[19].mxu1  ;;  %v644_v5 = vsel %vm134_vm2, %v2085_v62, -inf }
 0x25a   :  { %645 = vmax.xlane.f32.xlu1 %v644_v5 }
 0x25e   :  { %v748_v6 = vpop.f32.mrb[20].mxu1 }
 0x25f   :  { %v2089_v7 = vmul.f32 0.35355338, %v748_v6  ;;  %v1725_v8 = vpop.f32.mrb[21].mxu1 }
 0x260   :  { %v751_v9 = vpop.f32.mrb[22].mxu1 }
 0x261   :  { %v1726_v10 = vpop.f32.mrb[23].mxu1  ;;  %v755_v12 = vsel %vm134_vm2, %v2089_v7, -inf }
 0x262   :  { %756 = vmax.xlane.f32.xlu0 %v755_v12 }
 0x266   :  { %v859_v13 = vpop.f32.mrb[24].mxu1 }
 0x267   :  { %v865_v15 = vmul.f32 0.35355338, %v859_v13  ;;  %v1737_v16 = vpop.f32.mrb[25].mxu1 }
 0x268   :  { %v862_v17 = vpop.f32.mrb[26].mxu1 }
 0x269   :  { %v1738_v18 = vpop.f32.mrb[27].mxu1  ;;  %v866_v19 = vsel %vm134_vm2, %v865_v15, -inf }
 0x26a   :  { %867 = vmax.xlane.f32.xlu1 %v866_v19 }
 0x26e   :  { %v970_v20 = vpop.f32.mrb[28].mxu1 }
 0x26f   :  { %v1749_v21 = vpop.f32.mrb[29].mxu1  ;;  %v2098_v24 = vmul.f32 0.35355338, %v970_v20 }
 0x270   :  { %v973_v22 = vpop.f32.mrb[30].mxu1 }
 0x271   :  { %v1750_v23 = vpop.f32.mrb[31].mxu1  ;;  %v977_v25 = vsel %vm134_vm2, %v2098_v24, -inf }
 0x278   :  { %306 = vrot.lane.b32.xlu0 %v2018_v11, %s1888_s27 }
 0x27b   :  { %194 = vrot.lane.b32.xlu1 %v2018_v11, %s1889_s28 }
 0x297   :  { %978 = vmax.xlane.f32.xlu0 %v977_v25 }
 0x2c7   :  { %v184_v26 = vpop.xlane.xlu0 %183 }
 0x2c8   :  { %v185_v27 = vsub.f32 %v181_v38, %v184_v26 }
 0x2ca   :  { %v186_v28 = vmul.f32 1.442695, %v185_v27 }
 0x2cc   :  { %1839 = vpow2.f32 %v186_v28 }
 0x2cf   :  { %v296_v29 = vpop.xlane.xlu1 %295 }
 0x2d0   :  { %v297_v30 = vsub.f32 %v293_v44, %v296_v29 }
 0x2d2   :  { %v298_v31 = vmul.f32 1.442695, %v297_v30 }
 0x2d4   :  { %1841 = vpow2.f32 %v298_v31 }
 0x2d6   :  { %v2102_v32 = vpop.eup %1839 }
 0x2d7   :  { %v407_v33 = vpop.xlane.xlu0 %406  ;;  %v188_v34 = vsel %vm134_vm2, %v2102_v32, 0.0 }
 0x2d8   :  { %v408_v35 = vsub.f32 %v404_v50, %v407_v33  ;;  %189 = vadd.xlane.f32.xlu1 %v188_v34 }
 0x2da   :  { %v409_v36 = vmul.f32 1.442695, %v408_v35 }
 0x2dc   :  { %1843 = vpow2.f32 %v409_v36 }
 0x2de   :  { %v2106_v37 = vpop.eup %1841 }
 0x2df   :  { %v300_v38 = vsel %vm134_vm2, %v2106_v37, 0.0  ;;  %v518_v44 = vpop.xlane.xlu0 %517 }
 0x2e0   :  { %301 = vadd.xlane.f32.xlu0 %v300_v38  ;;  %v519_v46 = vsub.f32 %v2081_v56, %v518_v44 }
 0x2e2   :  { %v520_v47 = vmul.f32 1.442695, %v519_v46 }
 0x2e4   :  { %1845 = vpow2.f32 %v520_v47 }
 0x2e6   :  { %v2110_v39 = vpop.eup %1843 }
 0x2e7   :  { %v411_v40 = vsel %vm134_vm2, %v2110_v39, 0.0  ;;  %v646_v41 = vpop.xlane.xlu1 %645 }
 0x2e8   :  { %412 = vadd.xlane.f32.xlu1 %v411_v40  ;;  %v647_v48 = vsub.f32 %v2085_v62, %v646_v41 }
 0x2ea   :  { %v648_v51 = vmul.f32 1.442695, %v647_v48 }
 0x2ec   :  { %1847 = vpow2.f32 %v648_v51 }
 0x2ee   :  { %v1846_v54 = vpop.eup %1845 }
 0x2ef   :  { %v757_v49 = vpop.xlane.xlu0 %756  ;;  %v522_v55 = vsel %vm134_vm2, %v1846_v54, 0.0 }
 0x2f0   :  { %v758_v50 = vsub.f32 %v2089_v7, %v757_v49 }
 0x2f3   :  { %v307_v62 = vpop.permute.xlu0 %306 }
 0x2f4   :  { %v312_v13 = vsel %vm199_vm3, %v307_v62, 0 }
 0x2f6   :  { %417 = vrot.lane.b32.xlu0 %v2018_v11, %s1890_s29  ;;  %v2124_v57 = vpop.eup %1847 }
 0x2f7   :  { %v868_v42 = vpop.xlane.xlu1 %867  ;;  %v650_v58 = vsel %vm134_vm2, %v2124_v57, 0.0 }
 0x2f8   :  { %v869_v52 = vsub.f32 %v865_v15, %v868_v42 }
 0x2f9   :  { %528 = vrot.lane.b32.xlu1 %v2018_v11, %s1891_s1  ;;  %v759_v11 = vmul.f32 1.442695, %v758_v50 }
 0x2fa   :  { %v870_v53 = vmul.f32 1.442695, %v869_v52 }
 0x2fb   :  { %v195_v43 = vpop.permute.xlu1 %194  ;;  %1849 = vpow2.f32 %v759_v11 }
 0x2fc   :  { %v201_v45 = vsel %vm199_vm3, %v195_v43, 0  ;;  %1851 = vpow2.f32 %v870_v53 }
 0x2fd   :  { %1668 = vmatpush3.bf16.msra.mxu0 %v201_v45 }
 0x2fe   :  { %1679 = vmatprep.subr.bf16.mxu0 %v1879_v0 }
 0x305   :  { %v2126_v56 = vpop.eup %1849 }
 0x306   :  { %v2130_v59 = vpop.eup %1851  ;;  %v761_v60 = vsel %vm134_vm2, %v2126_v56, 0.0 }
 0x307   :  { %v872_v61 = vsel %vm134_vm2, %v2130_v59, 0.0 }
 0x315   :  { %523 = vadd.xlane.f32.xlu0 %v522_v55 }
 0x319   :  { %651 = vadd.xlane.f32.xlu0 %v650_v58 }
 0x31d   :  { %762 = vadd.xlane.f32.xlu1 %v761_v60  ;;  %873 = vadd.xlane.f32.xlu0 %v872_v61 }
 0x324   :  { %v979_v63 = vpop.xlane.xlu0 %978 }
 0x325   :  { %v980_v1 = vsub.f32 %v2098_v24, %v979_v63 }
 0x327   :  { %v981_v2 = vmul.f32 1.442695, %v980_v1 }
 0x329   :  { %1853 = vpow2.f32 %v981_v2 }
 0x32e   :  { %767 = vrot.lane.b32.xlu1 %v2026_v14, %s1888_s27 }
 0x332   :  { %878 = vrot.lane.b32.xlu1 %v2026_v14, %s1890_s29 }
 0x333   :  { %v2141_v5 = vpop.eup %1853 }
 0x334   :  { %v983_v6 = vsel %vm134_vm2, %v2141_v5, 0.0 }
 0x335   :  { %984 = vadd.xlane.f32.xlu0 %v983_v6 }
 0x336   :  { %989 = vrot.lane.b32.xlu1 %v2026_v14, %s1891_s1 }
 0x34b   :  { %656 = vrot.lane.b32.xlu0 %v2026_v14, %s1889_s28 }
 0x365   :  { %v190_v7 = vpop.xlane.xlu1 %189 }
 0x366   :  { %1855 = vrcp.f32 %v190_v7 }
 0x36d   :  { %v302_v8 = vpop.xlane.xlu0 %301 }
 0x36e   :  { %1857 = vrcp.f32 %v302_v8 }
 0x370   :  { %v1856_v9 = vpop.eup %1855 }
 0x371   :  { %v192_v10 = vmul.f32 %v1856_v9, %v2102_v32  ;;  %v418_v17 = vpop.permute.xlu0 %417 }
 0x372   :  { %v423_v19 = vsel %vm199_vm3, %v418_v17, 0 }
 0x373   :  { %v193_v12 = vpack.c.bf16 %v192_v10, %v192_v10 }
 0x375   :  { %1670 = vmatmul.mubr.msk.bf16.vlgmr.msra.gmra.mrb[4].mxu0 %vm134_vm2, %v193_v12  ;;  %v413_v15 = vpop.xlane.xlu1 %412 }
 0x376   :  { %1680 = vmatpush3.bf16.msra.mxu0 %v312_v13  ;;  %1859 = vrcp.f32 %v413_v15  ;;  %1681 = vmatprep.mubr.msk.bf16.mxu0 %vm1880_vm0, %v1879_v0 }
 0x377   :  { %1691 = vmatprep.subr.bf16.mxu0 %v1879_v0 }
 0x378   :  { %v1858_v14 = vpop.eup %1857 }
 0x379   :  { %v304_v16 = vmul.f32 %v1858_v14, %v2106_v37  ;;  %v529_v22 = vpop.permute.xlu1 %528  ;;  %v1829_v14 = vld [vmem:[%s2307_s3] sm:$0xff]  }
 0x37a   :  { %v534_v24 = vsel %vm199_vm3, %v529_v22, 0  ;;  %1758 = vmatpush3.bf16.msra.mxu1 %v1829_v14 }
 0x37b   :  { %v305_v18 = vpack.c.bf16 %v304_v16, %v304_v16  ;;  %1759 = vmatprep.subr.bf16.mxu1 %v1879_v0 }
 0x37d   :  { %1682 = vmatmul.mubr.msk.bf16.vlgmr.msra.gmra.mrb[8].mxu0 %vm134_vm2, %v305_v18  ;;  %v1830_v18 = vld [vmem:[%s2307_s3 + $0x8] sm:$0xff]  }
 0x37e   :  { %1692 = vmatpush3.bf16.msra.mxu0 %v423_v19  ;;  %1693 = vmatprep.mubr.msk.bf16.mxu0 %vm1880_vm0, %v1879_v0 }
 0x37f   :  { %1703 = vmatprep.subr.bf16.mxu0 %v1879_v0  ;;  %1760 = vmatpush3.bf16.msra.mxu1 %v1830_v18 }
 0x380   :  { %v1860_v20 = vpop.eup %1859  ;;  %1773 = vmatprep.subr.bf16.mxu1 %v1879_v0 }
 0x381   :  { %v415_v21 = vmul.f32 %v1860_v20, %v2110_v39 }
 0x383   :  { %v416_v23 = vpack.c.bf16 %v415_v21, %v415_v21 }
 0x385   :  { %1694 = vmatmul.mubr.msk.bf16.vlgmr.msra.gmra.mrb[12].mxu0 %vm134_vm2, %v416_v23 }
 0x386   :  { %1704 = vmatpush3.bf16.msra.mxu0 %v534_v24  ;;  %1705 = vmatprep.mubr.msk.bf16.mxu0 %vm1880_vm0, %v1879_v0 }
 0x387   :  { %1715 = vmatprep.subr.bf16.mxu0 %v1879_v0 }
 0x3a2   :  { %v524_v25 = vpop.xlane.xlu0 %523 }
 0x3a3   :  { %1861 = vrcp.f32 %v524_v25 }
 0x3a6   :  { %v652_v29 = vpop.xlane.xlu0 %651 }
 0x3a7   :  { %1863 = vrcp.f32 %v652_v29 }
 0x3aa   :  { %v763_v30 = vpop.xlane.xlu1 %762  ;;  %v874_v31 = vpop.xlane.xlu0 %873 }
 0x3ab   :  { %1865 = vrcp.f32 %v763_v30 }
 0x3ac   :  { %1867 = vrcp.f32 %v874_v31 }
 0x3ad   :  { %v1862_v26 = vpop.eup %1861 }
 0x3ae   :  { %v526_v27 = vmul.f32 %v1862_v26, %v1846_v54  ;;  %v768_v37 = vpop.permute.xlu1 %767 }
 0x3af   :  { %v773_v40 = vsel %vm199_vm3, %v768_v37, 0 }
 0x3b0   :  { %v527_v28 = vpack.c.bf16 %v526_v27, %v526_v27 }
 0x3b1   :  { %v1864_v32 = vpop.eup %1863 }
 0x3b2   :  { %1706 = vmatmul.mubr.msk.bf16.vlgmr.msra.gmra.mrb[16].mxu0 %vm134_vm2, %v527_v28  ;;  %v654_v34 = vmul.f32 %v1864_v32, %v2124_v57  ;;  %v879_v42 = vpop.permute.xlu1 %878 }
 0x3b3   :  { %1717 = vmatprep.mubr.msk.bf16.mxu0 %vm1880_vm0, %v1879_v0  ;;  %v884_v45 = vsel %vm199_vm3, %v879_v42, 0 }
 0x3b4   :  { %v655_v38 = vpack.c.bf16 %v654_v34, %v654_v34 }
 0x3b5   :  { %v1866_v39 = vpop.eup %1865 }
 0x3b6   :  { %v765_v41 = vmul.f32 %v1866_v39, %v2126_v56  ;;  %v1868_v44 = vpop.eup %1867  ;;  %v990_v47 = vpop.permute.xlu1 %989 }
 0x3b7   :  { %v876_v46 = vmul.f32 %v1868_v44, %v2130_v59  ;;  %v995_v50 = vsel %vm199_vm3, %v990_v47, 0 }
 0x3b8   :  { %v766_v43 = vpack.c.bf16 %v765_v41, %v765_v41 }
 0x3b9   :  { %v877_v48 = vpack.c.bf16 %v876_v46, %v876_v46 }
 0x3c2   :  { %v985_v33 = vpop.xlane.xlu0 %984 }
 0x3c3   :  { %1869 = vrcp.f32 %v985_v33 }
 0x3c6   :  { %v657_v35 = vpop.permute.xlu0 %656 }
 0x3c7   :  { %v662_v36 = vsel %vm199_vm3, %v657_v35, 0 }
 0x3c8   :  { %1716 = vmatpush3.bf16.msra.mxu0 %v662_v36 }
 0x3c9   :  { %1727 = vmatprep.subr.bf16.mxu0 %v1879_v0 }
 0x3cb   :  { %1718 = vmatmul.mubr.msk.bf16.vlgmr.msra.gmra.mrb[20].mxu0 %vm134_vm2, %v655_v38 }
 0x3cc   :  { %1728 = vmatpush3.bf16.msra.mxu0 %v773_v40  ;;  %1729 = vmatprep.mubr.msk.bf16.mxu0 %vm1880_vm0, %v1879_v0 }
 0x3cd   :  { %1739 = vmatprep.subr.bf16.mxu0 %v1879_v0  ;;  %v1870_v49 = vpop.eup %1869 }
 0x3ce   :  { %v987_v51 = vmul.f32 %v1870_v49, %v2141_v5 }
 0x3d0   :  { %v988_v52 = vpack.c.bf16 %v987_v51, %v987_v51 }
 0x3d3   :  { %1730 = vmatmul.mubr.msk.bf16.vlgmr.msra.gmra.mrb[24].mxu0 %vm134_vm2, %v766_v43 }
 0x3d4   :  { %1740 = vmatpush3.bf16.msra.mxu0 %v884_v45  ;;  %1741 = vmatprep.mubr.msk.bf16.mxu0 %vm1880_vm0, %v1879_v0  ;;  %v1581_v45 = vld [vmem:[%s2308_s4] ss:$0 sm:$0xff] }
 0x3d5   :  { %1751 = vmatprep.subr.bf16.mxu0 %v1879_v0 }
 0x3db   :  { %1742 = vmatmul.mubr.msk.bf16.vlgmr.msra.gmra.mrb[28].mxu0 %vm134_vm2, %v877_v48 }
 0x3dc   :  { %1752 = vmatpush3.bf16.msra.mxu0 %v995_v50  ;;  %1753 = vmatprep.mubr.msk.bf16.mxu0 %vm1880_vm0, %v1879_v0 }
 0x3dd   :  { %1765 = vmatprep.subr.bf16.mxu0 %v1879_v0 }
 0x3e3   :  { %1754 = vmatmul.mubr.msk.bf16.vlgmr.msra.gmra.mrb[32].mxu0 %vm134_vm2, %v988_v52 }
 0x3e4   :  { %1769 = vmatprep.mubr.msk.bf16.mxu0 %vm1880_vm0, %v1879_v0 }
 0x448   :  { %v237_v11 = vpop.f32.mrb[4].mxu0 }
 0x449   :  { %v1671_v53 = vpop.f32.mrb[5].mxu0 }
 0x44a   :  { %v240_v54 = vpop.f32.mrb[6].mxu0 }
 0x44b   :  { %v1672_v55 = vpop.f32.mrb[7].mxu0 }
 0x450   :  { %v348_v57 = vpop.f32.mrb[8].mxu0 }
 0x451   :  { %v1683_v56 = vpop.f32.mrb[9].mxu0 }
 0x452   :  { %v351_v58 = vpop.f32.mrb[10].mxu0 }
 0x453   :  { %v1684_v59 = vpop.f32.mrb[11].mxu0 }
 0x458   :  { %v459_v60 = vpop.f32.mrb[12].mxu0 }
 0x459   :  { %v1695_v61 = vpop.f32.mrb[13].mxu0 }
 0x45a   :  { %v462_v62 = vpop.f32.mrb[14].mxu0 }
 0x45b   :  { %v1696_v63 = vpop.f32.mrb[15].mxu0 }
 0x485   :  { %v570_v1 = vpop.f32.mrb[16].mxu0 }
 0x486   :  { %v1707_v2 = vpop.f32.mrb[17].mxu0 }
 0x487   :  { %v573_v5 = vpop.f32.mrb[18].mxu0  ;;  %v1833_v2 = vld [vmem:[%s2310_s9] sm:$0xff]  }
 0x488   :  { %v1708_v6 = vpop.f32.mrb[19].mxu0  ;;  %v1834_v5 = vld [vmem:[%s2310_s9 + $0x8] sm:$0xff]  }
 0x49e   :  { %v698_v7 = vpop.f32.mrb[20].mxu0 }
 0x49f   :  { %v1719_v8 = vpop.f32.mrb[21].mxu0 }
 0x4a0   :  { %v701_v9 = vpop.f32.mrb[22].mxu0 }
 0x4a1   :  { %v1720_v10 = vpop.f32.mrb[23].mxu0 }
 0x4a6   :  { %v809_v12 = vpop.f32.mrb[24].mxu0 }
 0x4a7   :  { %v1810_v13 = vpack.i.bf16 %v809_v12, %v348_v57  ;;  %v1731_v15 = vpop.f32.mrb[25].mxu0 }
 0x4a8   :  { %v812_v16 = vpop.f32.mrb[26].mxu0  ;;  %v1585_v15 = vld [vmem:[%s2311_s5] ss:$0 sm:$0xff] }
 0x4a9   :  { %1811 = vrot.lane.b32.xlu1 %v1810_v13, %s1892_s19  ;;  %v1732_v17 = vpop.f32.mrb[27].mxu0 }
 0x4ae   :  { %v920_v19 = vpop.f32.mrb[28].mxu0 }
 0x4af   :  { %v1815_v20 = vpack.i.bf16 %v920_v19, %v459_v60  ;;  %v1743_v21 = vpop.f32.mrb[29].mxu0  ;;  %v1586_v19 = vld [vmem:[%s2312_s6] ss:$0 sm:$0xff] }
 0x4b0   :  { %v923_v22 = vpop.f32.mrb[30].mxu0 }
 0x4b1   :  { %1816 = vrot.lane.b32.xlu1 %v1815_v20, %s1893_s21  ;;  %v1744_v23 = vpop.f32.mrb[31].mxu0 }
 0x4b6   :  { %v1031_v24 = vpop.f32.mrb[32].mxu0 }
 0x4b7   :  { %v1820_v25 = vpack.i.bf16 %v1031_v24, %v570_v1  ;;  %v1755_v26 = vpop.f32.mrb[33].mxu0  ;;  %v1832_v1 = vld [vmem:[%s2309_s7 + $0x8] sm:$0xff]   ;;  %v1835_v24 = vld [vmem:[%s2310_s9 + $0x10] sm:$0xff]  }
 0x4b8   :  { %v1034_v27 = vpop.f32.mrb[34].mxu0  ;;  %v1587_v26 = vld [vmem:[%s2313_s8] ss:$0 sm:$0xff] }
 0x4b9   :  { %1821 = vrot.lane.b32.xlu0 %v1820_v25, %s1894_s22  ;;  %v1756_v28 = vpop.f32.mrb[35].mxu0  ;;  %v1836_v25 = vld [vmem:[%s2310_s9 + $0x18] sm:$0xff]  }
 0x51b   :  { %v1812_v29 = vpop.permute.xlu1 %1811 }
 0x51c   :  { %v1814_v31 = vunpack.i.h.bf16 %v1812_v29  ;;  %v1813_v32 = vunpack.i.l.bf16 %v1812_v29 }
 0x51e   :  { %v1049_v36 = vsel %vm134_vm2, %v698_v7, %v1814_v31  ;;  %v588_v37 = vsel %vm134_vm2, %v237_v11, %v1813_v32 }
 0x523   :  { %v1817_v30 = vpop.permute.xlu1 %1816 }
 0x524   :  { %v1819_v33 = vunpack.i.h.bf16 %v1817_v30  ;;  %v1818_v34 = vunpack.i.l.bf16 %v1817_v30 }
 0x526   :  { %v1050_v40 = vsel %vm589_vm4, %v1049_v36, %v1819_v33  ;;  %v590_v41 = vsel %vm589_vm4, %v588_v37, %v1818_v34 }
 0x52b   :  { %v1822_v35 = vpop.permute.xlu0 %1821 }
 0x52c   :  { %v1824_v38 = vunpack.i.h.bf16 %v1822_v35  ;;  %v1823_v39 = vunpack.i.l.bf16 %v1822_v35 }
 0x52e   :  { %v1051_v42 = vsel %vm591_vm5, %v1050_v40, %v1824_v38  ;;  %v592_v43 = vsel %vm591_vm5, %v590_v41, %v1823_v39 }
 0x52f   :  { %v1052_v44 = vpack.c.bf16 %v1051_v42, %v592_v43 }
 0x531   :  { %1762 = vmatmul.mubr.msk.bf16.vlgmr.msra.gmra.mrb[32].mxu1 %vm85_vm1, %v1052_v44 }
 0x532   :  { %1781 = vmatprep.mubr.msk.bf16.mxu1 %vm1880_vm0, %v1879_v0  ;;  %1774 = vmatpush3.bf16.msra.mxu1 %v1833_v2 }
 0x533   :  { %1775 = vmatprep.subr.bf16.mxu1 %v1879_v0 }
 0x536   :  { %1776 = vmatpush3.bf16.msra.mxu1 %v1834_v5 }
 0x537   :  { %1777 = vmatprep.subr.bf16.mxu1 %v1879_v0 }
 0x53a   :  { %1778 = vmatpush3.bf16.msra.mxu1 %v1835_v24 }
 0x53b   :  { %1779 = vmatprep.subr.bf16.mxu1 %v1879_v0 }
 0x53e   :  { %1780 = vmatpush3.bf16.msra.mxu1 %v1836_v25 }
 0x604   :  { %v1113_v46 = vpop.f32.mrb[32].mxu1 }
 0x605   :  { %v1114_v47 = vadd.f32 %v1581_v45, %v1113_v46  ;;  %v1763_v48 = vpop.f32.mrb[33].mxu1 }
 0x606   :  { %v1116_v49 = vpop.f32.mrb[34].mxu1 }
 0x607   :  { %v1117_v50 = vadd.f32 %v1581_v45, %v1116_v49  ;;  %v1764_v51 = vpop.f32.mrb[35].mxu1  ;;  %v1120_v52 = vadd.f32 %v1114_v47, %v2001_v3 }
 0x609   :  { %v1124_v11 = vsel %vm85_vm1, %v1120_v52, 0.0  ;;  %v1121_v53 = vadd.f32 %v1117_v50, %v2006_v4  ;;  %v1831_v4 = vld [vmem:[%s2309_s7] sm:$0xff]  }
 0x60a   :  { %1125 = vadd.xlane.f32.xlu1 %v1124_v11  ;;  %1766 = vmatpush3.bf16.msra.mxu0 %v1831_v4  ;;  %v1598_v4 = vld [vmem:[%s2316_s12] ss:$0 sm:$0xff] }
 0x60b   :  { %v1127_v54 = vsel %vm85_vm1, %v1121_v53, 0.0  ;;  %1767 = vmatprep.subr.bf16.mxu0 %v1879_v0  ;;  %v1591_v0 = vld [vmem:[%s2314_s10] ss:$0 sm:$0xff] }
 0x60c   :  { %1128 = vadd.xlane.f32.xlu0 %v1127_v54 }
 0x60e   :  { %1768 = vmatpush3.bf16.msra.mxu0 %v1832_v1 }
 0x697   :  { %v1126_v55 = vpop.xlane.xlu1 %1125 }
 0x698   :  { %v1131_v57 = vmul.f32 0.03125, %v1126_v55 }
 0x699   :  { %v1129_v56 = vpop.xlane.xlu0 %1128 }
 0x69a   :  { %v1133_v58 = vsub.f32 %v1120_v52, %v1131_v57  ;;  %v1132_v59 = vmul.f32 0.03125, %v1129_v56 }
 0x69c   :  { %v1134_v60 = vsub.f32 %v1121_v53, %v1132_v59  ;;  %v1135_v61 = vmul.f32 %v1133_v58, %v1133_v58 }
 0x69e   :  { %v1137_v62 = vsel %vm85_vm1, %v1135_v61, 0.0  ;;  %v1136_v63 = vmul.f32 %v1134_v60, %v1134_v60 }
 0x69f   :  { %1138 = vadd.xlane.f32.xlu0 %v1137_v62  ;;  %v1597_v62 = vld [vmem:[%s2315_s11] ss:$0 sm:$0xff] }
 0x6a0   :  { %v1140_v3 = vsel %vm85_vm1, %v1136_v63, 0.0 }
 0x6a1   :  { %1141 = vadd.xlane.f32.xlu1 %v1140_v3 }
 0x72c   :  { %v1139_v6 = vpop.xlane.xlu0 %1138 }
 0x72d   :  { %v1143_v7 = vmul.f32 0.03125, %v1139_v6 }
 0x72e   :  { %v1142_v8 = vpop.xlane.xlu1 %1141 }
 0x72f   :  { %v1145_v9 = vadd.f32 1e-05, %v1143_v7  ;;  %v1144_v10 = vmul.f32 0.03125, %v1142_v8 }
 0x731   :  { %1871 = vrsqrt.f32 %v1145_v9  ;;  %v1146_v12 = vadd.f32 1e-05, %v1144_v10  ;;  %v1837_v10 = vld [vmem:[%s2317_s13] sm:$0xff]  }
 0x733   :  { %1873 = vrsqrt.f32 %v1146_v12  ;;  %v1895_v12 = vmov 0  }
 0x734   :  { %1825 = vset.pattern.permute.xlu1 %v1895_v12 }
 0x73b   :  { %v1872_v13 = vpop.eup %1871 }
 0x73c   :  { %v1149_v14 = vmul.f32 %v1872_v13, %v1133_v58  ;;  %v1410_v13 = vld [vmem:[%s2318_s14] sm:$0xff] }
 0x73d   :  { %v1874_v16 = vpop.eup %1873 }
 0x73e   :  { %v1157_v17 = vmul.f32 %v1585_v15, %v1149_v14  ;;  %v1150_v18 = vmul.f32 %v1874_v16, %v1134_v60  ;;  %v1411_v14 = vld [vmem:[%s2318_s14 + $0x8] sm:$0xff]  ;;  %v1412_v16 = vld [vmem:[%s2318_s14 + $0x10] sm:$0xff] }
 0x740   :  { %v1158_v20 = vmul.f32 %v1585_v15, %v1150_v18  ;;  %v1165_v21 = vadd.f32 %v1586_v19, %v1157_v17  ;;  %v22_v15 = vstv %s2319_s16  ;;  %v1413_v17 = vld [vmem:[%s2318_s14 + $0x18] sm:$0xff]  ;;  %v1503_v18 = vld [vmem:[%s2320_s15] sm:$0xff] }
 0x741   :  { %23 = vst [vmem:[#allocation2] sm:$0x1] %v22_v15 }
 0x742   :  { %v1166_v22 = vadd.f32 %v1586_v19, %v1158_v20  ;;  %v1504_v19 = vld [vmem:[%s2320_s15 + $0x8] sm:$0xff]  ;;  %v1505_v20 = vld [vmem:[%s2320_s15 + $0x10] sm:$0xff] }
 0x744   :  { %v1167_v23 = vpack.c.bf16 %v1166_v22, %v1165_v21 }
 0x746   :  { %1770 = vmatmul.mubr.msk.bf16.vlgmr.msra.gmra.mrb[36].mxu0 %vm85_vm1, %v1167_v23 }
 0x747   :  { %1789 = vmatprep.mubr.msk.bf16.mxu0 %vm85_vm1, %v1837_v10 }
 0x819   :  { %v1228_v27 = vpop.f32.mrb[36].mxu0 }
 0x81a   :  { %v1229_v28 = vadd.f32 %v1587_v26, %v1228_v27  ;;  %v1771_v29 = vpop.f32.mrb[37].mxu0 }
 0x81b   :  { %v1231_v30 = vpop.f32.mrb[38].mxu0  ;;  %v1838_v29 = vld [vmem:[%s2317_s13 + $0x8] sm:$0xff]  }
 0x81c   :  { %v1232_v31 = vadd.f32 %v1587_v26, %v1231_v30  ;;  %v1772_v32 = vpop.f32.mrb[39].mxu0  ;;  %v1235_v33 = vmax.f32 %v1229_v28, 0.0 }
 0x81e   :  { %v1236_v34 = vmax.f32 %v1232_v31, 0.0 }
 0x820   :  { %v1237_v35 = vpack.c.bf16 %v1236_v34, %v1235_v33 }
 0x822   :  { %1782 = vmatmul.mubr.msk.bf16.vlgmr.msra.gmra.mrb[36].mxu1 %vm1277_vm6, %v1237_v35 }
 0x8f5   :  { %v1315_v36 = vpop.f32.mrb[36].mxu1 }
 0x8f6   :  { %v1316_v37 = vadd.f32 %v1591_v0, %v1315_v36  ;;  %v1783_v38 = vpop.f32.mrb[37].mxu1 }
 0x8f7   :  { %v1318_v39 = vpop.f32.mrb[38].mxu1 }
 0x8f8   :  { %v1319_v40 = vadd.f32 %v1591_v0, %v1318_v39  ;;  %v1784_v41 = vpop.f32.mrb[39].mxu1  ;;  %v1322_v42 = vadd.f32 %v1316_v37, %v1165_v21  ;;  %v1506_v21 = vld [vmem:[%s2320_s15 + $0x18] sm:$0xff] }
 0x8fa   :  { %v1326_v43 = vsel %vm85_vm1, %v1322_v42, 0.0  ;;  %v1323_v44 = vadd.f32 %v1319_v40, %v1166_v22  ;;  %v1544_v22 = vld [vmem:[#allocation2] sm:$0x1] }
 0x8fb   :  { %1327 = vadd.xlane.f32.xlu0 %v1326_v43 }
 0x8fc   :  { %v1329_v45 = vsel %vm85_vm1, %v1323_v44, 0.0 }
 0x8fd   :  { %1330 = vadd.xlane.f32.xlu1 %v1329_v45 }
 0x988   :  { %v1328_v46 = vpop.xlane.xlu0 %1327 }
 0x989   :  { %v1332_v47 = vmul.f32 0.03125, %v1328_v46 }
 0x98a   :  { %v1331_v48 = vpop.xlane.xlu1 %1330 }
 0x98b   :  { %v1334_v49 = vsub.f32 %v1322_v42, %v1332_v47  ;;  %v1333_v50 = vmul.f32 0.03125, %v1331_v48 }
 0x98d   :  { %v1335_v51 = vsub.f32 %v1323_v44, %v1333_v50  ;;  %v1336_v52 = vmul.f32 %v1334_v49, %v1334_v49 }
 0x98f   :  { %v1338_v11 = vsel %vm85_vm1, %v1336_v52, 0.0  ;;  %v1337_v53 = vmul.f32 %v1335_v51, %v1335_v51 }
 0x990   :  { %1339 = vadd.xlane.f32.xlu0 %v1338_v11 }
 0x991   :  { %v1341_v54 = vsel %vm85_vm1, %v1337_v53, 0.0 }
 0x992   :  { %1342 = vadd.xlane.f32.xlu1 %v1341_v54 }
 0x9a3   :  { %1416 = vperm.xlu1 %1825, %v1410_v13  }
 0x9a7   :  { %1421 = vperm.xlu1 %1825, %v1411_v14  }
 0x9ab   :  { %1426 = vperm.xlu1 %1825, %v1412_v16  }
 0x9af   :  { %1431 = vperm.xlu1 %1825, %v1413_v17  }
 0x9b3   :  { %1509 = vperm.xlu1 %1825, %v1503_v18  }
 0x9b7   :  { %1514 = vperm.xlu1 %1825, %v1504_v19  }
 0x9bb   :  { %1519 = vperm.xlu1 %1825, %v1505_v20  }
 0x9bf   :  { %1524 = vperm.xlu1 %1825, %v1506_v21  }
 0xa1d   :  { %v1340_v55 = vpop.xlane.xlu0 %1339 }
 0xa1e   :  { %v1344_v57 = vmul.f32 0.03125, %v1340_v55 }
 0xa1f   :  { %v1343_v56 = vpop.xlane.xlu1 %1342 }
 0xa20   :  { %v1346_v58 = vadd.f32 1e-05, %v1344_v57  ;;  %v1345_v59 = vmul.f32 0.03125, %v1343_v56  ;;  %v1550_v56 = vlaneseq }
 0xa22   :  { %1875 = vrsqrt.f32 %v1346_v58  ;;  %v1347_v60 = vadd.f32 1e-05, %v1345_v59 }
 0xa23   :  { %v1417_v30 = vpop.permute.xlu1 %1416 }
 0xa24   :  { %1877 = vrsqrt.f32 %v1347_v60  ;;  %v1551_v60 = vshrl.u32 %v1550_v56, 7 }
 0xa27   :  { %v1422_v31 = vpop.permute.xlu1 %1421 }
 0xa2b   :  { %v1427_v32 = vpop.permute.xlu1 %1426 }
 0xa2c   :  { %v1876_v61 = vpop.eup %1875 }
 0xa2d   :  { %v1350_v63 = vmul.f32 %v1876_v61, %v1334_v49 }
 0xa2e   :  { %v1878_v3 = vpop.eup %1877 }
 0xa2f   :  { %v1351_v1 = vmul.f32 %v1878_v3, %v1335_v51  ;;  %v1358_v2 = vmul.f32 %v1597_v62, %v1350_v63  ;;  %v1432_v33 = vpop.permute.xlu1 %1431  ;;  %v1552_v63 = vsub.s32 0, %v1551_v60 }
 0xa31   :  { %v1359_v5 = vmul.f32 %v1597_v62, %v1351_v1  ;;  %v1366_v6 = vadd.f32 %v1598_v4, %v1358_v2 }
 0xa33   :  { %v1367_v7 = vadd.f32 %v1598_v4, %v1359_v5  ;;  %v1369_v8 = vrot.slane %v1366_v6, 4  ;;  %v1510_v34 = vpop.permute.xlu1 %1509 }
 0xa35   :  { %v1371_v9 = vsel %vm199_vm3, %v1369_v8, %v1367_v7 }
 0xa36   :  { %1372 = vxpose.xlu0.b32.start.end [1/1] (short) (narrow) %v1371_v9, 32 }
 0xa37   :  { %v1515_v35 = vpop.permute.xlu1 %1514 }
 0xa3b   :  { %v1520_v40 = vpop.permute.xlu1 %1519 }
 0xa3f   :  { %v1525_v51 = vpop.permute.xlu1 %1524 }
 0xa5f   :  { %1826 = vset.pattern.permute.xlu0 %v1895_v12 }
 0xa6b   :  { %1547 = vperm.xlu0 %1826, %v1544_v22  }
 0xab6   :  { %v1388_v23 = vpop.trf.xlu0 }
 0xaba   :  { %v1389_v24 = vpop.trf.xlu0 }
 0xabb   :  { %v1404_v25 = vpack.c.bf16 %v1389_v24, %v1388_v23 }
 0xabd   :  { %1785 = vmatprep.subr.bf16.mxu0 %v1404_v25 }
 0xabe   :  { %1786 = vmatpush3.bf16.msra.mxu0 %v1404_v25  ;;  %v1390_v26 = vpop.trf.xlu0 }
 0xac2   :  { %v1391_v27 = vpop.trf.xlu0 }
 0xac3   :  { %v1405_v28 = vpack.c.bf16 %v1391_v27, %v1390_v26 }
 0xac5   :  { %1787 = vmatprep.subr.bf16.mxu0 %v1405_v28 }
 0xac6   :  { %1788 = vmatpush3.bf16.msra.mxu0 %v1405_v28 }
 0xac9   :  { %1790 = vmatmul.mubr.msk.bf16.vlgmr.msra.gmra.mrb[40].mxu0 %vm85_vm1, %v1838_v29 }
 0xaea   :  { %v1548_v4 = vpop.permute.xlu0 %1547 }
 0xaeb   :  { %v1553_v5 = vrot.slane %v1548_v4, %v1552_v63 }
 0xb9c   :  { %v1791_v0 = vpop.f32.mrb[40].mxu0 }
 0xb9d   :  { %v1493_v36 = vadd.f32 %v1791_v0, %v1427_v32  ;;  %v1484_v37 = vpop.f32.mrb[41].mxu0 }
 0xb9e   :  { %v1485_v38 = vadd.f32 %v1484_v37, %v1417_v30  ;;  %v1792_v39 = vpop.f32.mrb[42].mxu0 }
 0xb9f   :  { %v1496_v41 = vadd.f32 %v1792_v39, %v1432_v33  ;;  %v1487_v42 = vpop.f32.mrb[43].mxu0  ;;  %v1501_v43 = vmax.f32 %v1493_v36, 0.0 }
 0xba0   :  { %v1499_v44 = vmax.f32 %v1485_v38, 0.0  ;;  %v1488_v45 = vadd.f32 %v1487_v42, %v1422_v31 }
 0xba1   :  { %v1502_v47 = vmax.f32 %v1496_v41, 0.0  ;;  %v1529_v49 = vmul.f32 %v1520_v40, %v1501_v43 }
 0xba2   :  { %v1527_v46 = vmul.f32 %v1510_v34, %v1499_v44  ;;  %v1500_v48 = vmax.f32 %v1488_v45, 0.0 }
 0xba3   :  { %v1530_v11 = vmul.f32 %v1525_v51, %v1502_v47  ;;  %v1534_v55 = vsel %vm134_vm2, %v1529_v49, 0.0 }
 0xba4   :  { %v1528_v50 = vmul.f32 %v1515_v35, %v1500_v48  ;;  %v1531_v52 = vsel %vm134_vm2, %v1527_v46, 0.0 }
 0xba5   :  { %v1536_v58 = vsel %vm134_vm2, %v1530_v11, 0.0 }
 0xba6   :  { %v1532_v53 = vsel %vm134_vm2, %v1528_v50, 0.0 }
 0xba7   :  { %v1533_v54 = vadd.f32 %v1532_v53, %v1531_v52 }
 0xba9   :  { %v1535_v57 = vadd.f32 %v1534_v55, %v1533_v54 }
 0xbab   :  { %v1537_v59 = vadd.f32 %v1536_v58, %v1535_v57 }
 0xbad   :  { %v1538_v61 = vrot.slane %v1537_v59, 4 }
 0xbaf   :  { %v1539_v62 = vadd.f32 %v1538_v61, %v1537_v59 }
 0xbb1   :  { %v1540_v3 = vrot.slane %v1539_v62, 2 }
 0xbb3   :  { %v1541_v1 = vadd.f32 %v1540_v3, %v1539_v62 }
 0xbb5   :  { %v1542_v2 = vrot.slane %v1541_v1, 1 }
 0xbb7   :  { %v1543_v6 = vadd.f32 %v1542_v2, %v1541_v1 }
 0xbb9   :  { %v1554_v7 = vadd.f32 %v1553_v5, %v1543_v6 }
 0xbbb   :  { %1556 = vst.msk [vmem:[%s2321_s17] sm:$0x1] %vm1555_vm7, %v1554_v7 }

</bundles_post_ra>
